<compile_context>
chip_gen: v6e
topology: v6e:2x2x1
jax: 0.10.0
libtpu: 0.0.40
codegen_flags: <defaults>
</compile_context>

<pallas_src>
import functools

import jax
import jax.numpy as jnp
from jax.experimental import pallas as pl
from jax.experimental.pallas import tpu as pltpu

_VMEM_BUDGET = 36 * 1024 * 1024          # per-step working-set target (v7x-safe)
_VMEM_LIMIT_CAP = 48 * 1024 * 1024       # never request all of v7x's 64 MiB


def _calc_same_pad(i: int, k: int, s: int, d: int) -> int:
    # identical to the PyTorch helper
    return max((-(i // -s) - 1) * s + (k - 1) * d + 1 - i, 0)


def _round_up(x: int, m: int) -> int:
    return (x + m - 1) // m * m


def _pick_tile_h(ho: int, wo: int, n_batch: int, fits, *, max_tile_m: int = 2048) -> int:
    """Largest divisor of `ho` whose tile_m = tile_h*wo is 8-aligned, fits the
    VMEM budget and the tile_m cap; prefers >=2 row tiles when the batch alone
    cannot give the (batch, row) grid >=2 steps (v7x has 2 TensorCores)."""
    divs = [d for d in range(1, ho + 1) if ho % d == 0 and (d * wo) % 8 == 0]
    if not divs:
        # TODO(synk): pad Wo / tile_m for shapes with no 8-aligned row tile;
        # a single full-extent tile is the (legal) fallback.
        return ho
    cands = [d for d in divs if fits(d)] or [min(divs)]
    cands = [d for d in cands if d * wo <= max_tile_m] or [min(cands)]
    if n_batch < 2:
        multi = [d for d in cands if d < ho]
        if multi:
            cands = multi
    return max(cands)


def _conv2d_same_kernel(x_ref, w_ref, b_ref, o_ref, *, kh, kw, tile_h, wo, cin):
    # x_ref : (tile_h + kh - 1, Wp, Cin)   halo'd input row window (VMEM)
    # w_ref : (kh*kw*Cin, Cout_pad)        folded weights, resident (1 buffer)
    # b_ref : (1, Cout_pad)                f32 bias, resident (1 buffer)
    # o_ref : (tile_h*Wo, Cout_pad)        lane-dense output tile
    tile_m = tile_h * wo
    k_dim = kh * kw * cin

    # im2col in registers: slice each tap straight from the ref (no halo
    # temporary, no scratch round-trip, no masked narrow column stores).
    # K is ordered (i, j, c) to match the wrapper's weight flattening
    # (kh, kw, Cin, Cout_pad) -> (kh*kw*Cin, Cout_pad).
    taps = []
    for i in range(kh):                       # static, unrolled
        for j in range(kw):
            taps.append(x_ref[i:i + tile_h, j:j + wo, :])   # (tile_h, Wo, Cin)
    col = jnp.concatenate(taps, axis=-1)                    # (tile_h, Wo, K)
    col = col.reshape(tile_m, k_dim)

    # Single MXU matmul, f32 accumulation; bias added once to the f32 result.
    acc = jnp.dot(col, w_ref[...], preferred_element_type=jnp.float32)
    acc = acc + b_ref[...]                                  # (1, Cout_pad) bcast
    o_ref[...] = acc.astype(o_ref.dtype)


def conv2d_same(x_nchw, weight_oihw, bias=None, *, stride=1, dilation=1,
                groups=1, compute_dtype=jnp.bfloat16, out_format="NCHW"):
    """PyTorch Conv2dSame.forward.  x: (N, Cin, H, W) -> (N, Cout, Ho, Wo).

    compute_dtype: MXU input dtype (default bf16 on v6e/v7x; accumulation and
    bias stay f32; pass jnp.float32 for an exact-precision path).
    """
    assert stride == 1 and dilation == 1 and groups == 1, (
        "Pallas kernel path implements the default Conv2dSame configuration "
        "(stride=1, dilation=1, groups=1)")

    n, cin, ih, iw = x_nchw.shape
    cout, cin_w, kh, kw = weight_oihw.shape
    assert cin_w == cin
    if bias is None:
        bias = jnp.zeros((cout,), jnp.float32)

    out_dtype = x_nchw.dtype
    cdtype = jnp.dtype(compute_dtype) if compute_dtype is not None else jnp.dtype(out_dtype)

    pad_h = _calc_same_pad(ih, kh, stride, dilation)
    pad_w = _calc_same_pad(iw, kw, stride, dilation)

    # Cast to the compute dtype BEFORE the layout glue so transpose/pad/window
    # gather move half the bytes in the bf16 path.
    x_c = x_nchw.astype(cdtype)
    x_nhwc = jnp.transpose(x_c, (0, 2, 3, 1))
    x_pad = jnp.pad(
        x_nhwc,
        ((0, 0),
         (pad_h // 2, pad_h - pad_h // 2),
         (pad_w // 2, pad_w - pad_w // 2),
         (0, 0)))
    hp, wp = x_pad.shape[1], x_pad.shape[2]
    ho, wo = hp - kh + 1, wp - kw + 1                # stride=1, dilation=1

    # Weights: OIHW -> (kh, kw, Cin, Cout) -> (kh*kw*Cin, Cout_pad); Cout padded
    # to a multiple of 128 so output stores are lane-dense (no masked vst).
    k_dim = kh * kw * cin
    cout_pad = _round_up(cout, 128)
    w_flat = jnp.transpose(weight_oihw, (2, 3, 1, 0)).reshape(k_dim, cout)
    w_flat = jnp.pad(w_flat, ((0, 0), (0, cout_pad - cout))).astype(cdtype)
    b_pad = jnp.pad(bias.astype(jnp.float32),
                    (0, cout_pad - cout)).reshape(1, cout_pad)

    csize = cdtype.itemsize
    osize = jnp.dtype(out_dtype).itemsize

    def _need_bytes(d):
        halo_d = d + kh - 1
        tm = d * wo
        return (2 * halo_d * wp * cin * csize        # double-buffered input window
                + k_dim * cout_pad * csize           # resident weights (1 buffer)
                + cout_pad * 4                       # resident bias
                + 2 * tm * cout_pad * osize          # double-buffered output tile
                + tm * k_dim * max(csize, 4)         # im2col value (regs / VMEM spill)
                + tm * cout_pad * 4)                 # f32 accumulator value

    tile_h = _pick_tile_h(ho, wo, n, lambda d: _need_bytes(d) <= _VMEM_BUDGET)
    tile_m = tile_h * wo
    n_row_tiles = ho // tile_h
    halo = tile_h + kh - 1

    # Overlapping halo row windows: each grid step only needs a
    # (tile_h+kh-1, Wp, Cin) block in VMEM, auto-prefetched by BlockSpec.
    if n_row_tiles == 1:
        x_tiles = x_pad[:, None]                       # (N, 1, Hp, Wp, Cin)
    else:
        row_idx = (jnp.arange(n_row_tiles)[:, None] * tile_h
                   + jnp.arange(halo)[None, :])
        x_tiles = x_pad[:, row_idx]                    # (N, T, halo, Wp, Cin)

    kernel = functools.partial(_conv2d_same_kernel,
                               kh=kh, kw=kw, tile_h=tile_h, wo=wo, cin=cin)

    vmem_limit = int(min(_VMEM_LIMIT_CAP,
                         max(16 * 1024 * 1024, 2 * _need_bytes(tile_h))))

    def _run(single_buffer_resident):
        def resident(shape):
            kwargs = {}
            if single_buffer_resident:
                # constant block at every step -> one buffer is enough
                kwargs["pipeline_mode"] = pl.Buffered(1)
            return pl.BlockSpec(shape, lambda b, r: (0,) * len(shape), **kwargs)

        return pl.pallas_call(
            kernel,
            out_shape=jax.ShapeDtypeStruct((n, ho * wo, cout_pad), out_dtype),
            grid_spec=pltpu.PrefetchScalarGridSpec(
                num_scalar_prefetch=0,
                grid=(n, n_row_tiles),
                in_specs=[
                    # halo'd input row window of this (batch, row-tile) step
                    pl.BlockSpec((None, None, halo, wp, cin),
                                 lambda b, r: (b, r, 0, 0, 0)),
                    resident((k_dim, cout_pad)),       # folded weights
                    resident((1, cout_pad)),           # f32 bias
                ],
                out_specs=pl.BlockSpec((None, tile_m, cout_pad),
                                       lambda b, r: (b, r, 0)),
            ),
            compiler_params=pltpu.CompilerParams(
                dimension_semantics=("parallel", "parallel"),
                vmem_limit_bytes=vmem_limit),
        )(x_tiles, w_flat, b_pad)

    try:
        out_flat = _run(True)
    except Exception:   # pragma: no cover — pipeline_mode=Buffered(1) unsupported
        out_flat = _run(False)

    # (N, Ho*Wo, Cout_pad) -> (N, Ho, Wo, Cout) -> requested layout.
    out_nhwc = out_flat.reshape(n, ho, wo, cout_pad)[..., :cout]
    if out_format == "NHWC":
        return out_nhwc
    return jnp.transpose(out_nhwc, (0, 3, 1, 2))       # PyTorch NCHW


def _reference_conv2d_same(x, w, b):
    n, cin, ih, iw = x.shape
    cout, _, kh, kw = w.shape
    ph = _calc_same_pad(ih, kh, 1, 1)
    pw = _calc_same_pad(iw, kw, 1, 1)
    y = jax.lax.conv_general_dilated(
        x, w, window_strides=(1, 1),
        padding=((ph // 2, ph - ph // 2), (pw // 2, pw - pw // 2)),
        dimension_numbers=("NCHW", "OIHW", "NCHW"))
    return y + b.reshape(1, cout, 1, 1)


if __name__ == "__main__":
    # Conv2dSame(in_channels=4, out_channels=8, kernel_size=3, bias=True)
    N, CIN, H, W = 2, 4, 16, 16
    COUT, KH, KW = 8, 3, 3

    key = jax.random.PRNGKey(0)
    kx, kw_, kb = jax.random.split(key, 3)

    x = jax.random.normal(kx, (N, CIN, H, W), dtype=jnp.float32)
    fan_in = CIN * KH * KW
    bound = 1.0 / (fan_in ** 0.5)
    weight = jax.random.uniform(kw_, (COUT, CIN, KH, KW),
                                dtype=jnp.float32, minval=-bound, maxval=bound)
    bias = jax.random.uniform(kb, (COUT,), dtype=jnp.float32,
                              minval=-bound, maxval=bound)

    ref = _reference_conv2d_same(x, weight, bias)

    # exact-precision path
    out_f32 = jax.block_until_ready(
        conv2d_same(x, weight, bias, compute_dtype=jnp.float32))
    assert out_f32.shape == (N, COUT, H, W)
    assert jnp.allclose(out_f32, ref, atol=1e-4, rtol=1e-4), "f32 mismatch"

    # default path (bf16 MXU inputs, f32 accumulation)
    out_bf16 = jax.block_until_ready(conv2d_same(x, weight, bias))
    assert out_bf16.shape == (N, COUT, H, W)
    assert jnp.allclose(out_bf16, ref, atol=5e-2, rtol=5e-2), "bf16 mismatch"

    # multi-row-tile / halo-window path (N=1 forces >=2 row tiles)
    N2, CIN2, H2, W2, COUT2 = 1, 8, 48, 48, 16
    k2x, k2w, k2b = jax.random.split(jax.random.PRNGKey(1), 3)
    x2 = jax.random.normal(k2x, (N2, CIN2, H2, W2), dtype=jnp.float32)
    bound2 = 1.0 / ((CIN2 * KH * KW) ** 0.5)
    w2 = jax.random.uniform(k2w, (COUT2, CIN2, KH, KW),
                            dtype=jnp.float32, minval=-bound2, maxval=bound2)
    b2 = jax.random.uniform(k2b, (COUT2,), dtype=jnp.float32,
                            minval=-bound2, maxval=bound2)
    ref2 = _reference_conv2d_same(x2, w2, b2)
    out2 = jax.block_until_ready(
        conv2d_same(x2, w2, b2, compute_dtype=jnp.float32))
    assert out2.shape == (N2, COUT2, H2, W2)
    assert jnp.allclose(out2, ref2, atol=1e-4, rtol=1e-4), "halo-tile mismatch"

    print("KERNEL_OK")
</pallas_src>

<mosaic_0001>
module attributes {stable_mosaic.version = 11 : i64} {
  func.func @_conv2d_same_kernel(%arg0: i32, %arg1: i32, %arg2: memref<1x1x18x18x4xf32, #tpu.memory_space<vmem>>, %arg3: memref<36x128xf32, #tpu.memory_space<vmem>>, %arg4: memref<1x128xf32, #tpu.memory_space<vmem>>, %arg5: memref<1x256x128xf32, #tpu.memory_space<vmem>>) attributes {dimension_semantics = [#tpu.dimension_semantics<parallel>, #tpu.dimension_semantics<parallel>], iteration_bounds = array<i64: 2, 1>, scalar_prefetch = 0 : i64, scratch_operands = 0 : i64, tpu.core_type = #tpu.core_type<tc>, window_params = [{transform_indices = @transform_0, window_bounds = array<i64: 1, 1, 18, 18, 4>}, {pipeline_mode = #tpu.pipeline_mode<synchronous>, transform_indices = @transform_1, window_bounds = array<i64: 36, 128>}, {pipeline_mode = #tpu.pipeline_mode<synchronous>, transform_indices = @transform_2, window_bounds = array<i64: 1, 128>}, {transform_indices = @transform_3, window_bounds = array<i64: 1, 256, 128>}]} {
    %c0 = arith.constant 0 : index
    %c0_0 = arith.constant 0 : index
    %c0_1 = arith.constant 0 : index
    %c0_2 = arith.constant 0 : index
    %c0_3 = arith.constant 0 : index
    %0 = vector.load %arg2[%c0, %c0_0, %c0_1, %c0_2, %c0_3] : memref<1x1x18x18x4xf32, #tpu.memory_space<vmem>>, vector<1x1x16x16x4xf32>
    %1 = vector.shape_cast %0 : vector<1x1x16x16x4xf32> to vector<16x16x4xf32>
    %c0_4 = arith.constant 0 : index
    %c0_5 = arith.constant 0 : index
    %c0_6 = arith.constant 0 : index
    %c1 = arith.constant 1 : index
    %c0_7 = arith.constant 0 : index
    %2 = vector.load %arg2[%c0_4, %c0_5, %c0_6, %c1, %c0_7] : memref<1x1x18x18x4xf32, #tpu.memory_space<vmem>>, vector<1x1x16x16x4xf32>
    %3 = vector.shape_cast %2 : vector<1x1x16x16x4xf32> to vector<16x16x4xf32>
    %c0_8 = arith.constant 0 : index
    %c0_9 = arith.constant 0 : index
    %c0_10 = arith.constant 0 : index
    %c2 = arith.constant 2 : index
    %c0_11 = arith.constant 0 : index
    %4 = vector.load %arg2[%c0_8, %c0_9, %c0_10, %c2, %c0_11] : memref<1x1x18x18x4xf32, #tpu.memory_space<vmem>>, vector<1x1x16x16x4xf32>
    %5 = vector.shape_cast %4 : vector<1x1x16x16x4xf32> to vector<16x16x4xf32>
    %c0_12 = arith.constant 0 : index
    %c0_13 = arith.constant 0 : index
    %c1_14 = arith.constant 1 : index
    %c0_15 = arith.constant 0 : index
    %c0_16 = arith.constant 0 : index
    %6 = vector.load %arg2[%c0_12, %c0_13, %c1_14, %c0_15, %c0_16] : memref<1x1x18x18x4xf32, #tpu.memory_space<vmem>>, vector<1x1x16x16x4xf32>
    %7 = vector.shape_cast %6 : vector<1x1x16x16x4xf32> to vector<16x16x4xf32>
    %c0_17 = arith.constant 0 : index
    %c0_18 = arith.constant 0 : index
    %c1_19 = arith.constant 1 : index
    %c1_20 = arith.constant 1 : index
    %c0_21 = arith.constant 0 : index
    %8 = vector.load %arg2[%c0_17, %c0_18, %c1_19, %c1_20, %c0_21] : memref<1x1x18x18x4xf32, #tpu.memory_space<vmem>>, vector<1x1x16x16x4xf32>
    %9 = vector.shape_cast %8 : vector<1x1x16x16x4xf32> to vector<16x16x4xf32>
    %c0_22 = arith.constant 0 : index
    %c0_23 = arith.constant 0 : index
    %c1_24 = arith.constant 1 : index
    %c2_25 = arith.constant 2 : index
    %c0_26 = arith.constant 0 : index
    %10 = vector.load %arg2[%c0_22, %c0_23, %c1_24, %c2_25, %c0_26] : memref<1x1x18x18x4xf32, #tpu.memory_space<vmem>>, vector<1x1x16x16x4xf32>
    %11 = vector.shape_cast %10 : vector<1x1x16x16x4xf32> to vector<16x16x4xf32>
    %c0_27 = arith.constant 0 : index
    %c0_28 = arith.constant 0 : index
    %c2_29 = arith.constant 2 : index
    %c0_30 = arith.constant 0 : index
    %c0_31 = arith.constant 0 : index
    %12 = vector.load %arg2[%c0_27, %c0_28, %c2_29, %c0_30, %c0_31] : memref<1x1x18x18x4xf32, #tpu.memory_space<vmem>>, vector<1x1x16x16x4xf32>
    %13 = vector.shape_cast %12 : vector<1x1x16x16x4xf32> to vector<16x16x4xf32>
    %c0_32 = arith.constant 0 : index
    %c0_33 = arith.constant 0 : index
    %c2_34 = arith.constant 2 : index
    %c1_35 = arith.constant 1 : index
    %c0_36 = arith.constant 0 : index
    %14 = vector.load %arg2[%c0_32, %c0_33, %c2_34, %c1_35, %c0_36] : memref<1x1x18x18x4xf32, #tpu.memory_space<vmem>>, vector<1x1x16x16x4xf32>
    %15 = vector.shape_cast %14 : vector<1x1x16x16x4xf32> to vector<16x16x4xf32>
    %c0_37 = arith.constant 0 : index
    %c0_38 = arith.constant 0 : index
    %c2_39 = arith.constant 2 : index
    %c2_40 = arith.constant 2 : index
    %c0_41 = arith.constant 0 : index
    %16 = vector.load %arg2[%c0_37, %c0_38, %c2_39, %c2_40, %c0_41] : memref<1x1x18x18x4xf32, #tpu.memory_space<vmem>>, vector<1x1x16x16x4xf32>
    %17 = vector.shape_cast %16 : vector<1x1x16x16x4xf32> to vector<16x16x4xf32>
    %18 = tpu.concatenate %1, %3, %5, %7, %9, %11, %13, %15, %17 in 2 : vector<16x16x4xf32>, vector<16x16x4xf32>, vector<16x16x4xf32>, vector<16x16x4xf32>, vector<16x16x4xf32>, vector<16x16x4xf32>, vector<16x16x4xf32>, vector<16x16x4xf32>, vector<16x16x4xf32> -> vector<16x16x36xf32>
    %19 = vector.shape_cast %18 : vector<16x16x36xf32> to vector<256x36xf32>
    %c0_42 = arith.constant 0 : index
    %c0_43 = arith.constant 0 : index
    %20 = vector.load %arg3[%c0_42, %c0_43] : memref<36x128xf32, #tpu.memory_space<vmem>>, vector<36x128xf32>
    %cst = arith.constant dense<0.000000e+00> : vector<256x128xf32>
    %21 = tpu.matmul %19, %20, %cst {dimension_numbers = #tpu.dot_dimension_numbers<[1], [0], [0], [1], [0, 0, 1, 1], [], []>} : vector<256x36xf32>, vector<36x128xf32>, vector<256x128xf32> -> vector<256x128xf32>
    %c0_44 = arith.constant 0 : index
    %c0_45 = arith.constant 0 : index
    %22 = vector.load %arg4[%c0_44, %c0_45] : memref<1x128xf32, #tpu.memory_space<vmem>>, vector<1x128xf32>
    %23 = vector.broadcast %22 : vector<1x128xf32> to vector<256x128xf32>
    %24 = arith.addf %21, %23 : vector<256x128xf32>
    %c0_46 = arith.constant 0 : index
    %c0_47 = arith.constant 0 : index
    %c0_48 = arith.constant 0 : index
    %25 = vector.load %arg5[%c0_46, %c0_47, %c0_48] : memref<1x256x128xf32, #tpu.memory_space<vmem>>, vector<1x256x128xf32>
    %26 = vector.shape_cast %25 : vector<1x256x128xf32> to vector<256x128xf32>
    %27 = vector.shape_cast %24 : vector<256x128xf32> to vector<1x256x128xf32>
    tpu.vector_store %arg5[%c0_46, %c0_47, %c0_48], %27 {strides = array<i32>} : memref<1x256x128xf32, #tpu.memory_space<vmem>>, vector<1x256x128xf32>,
    return
  }
  func.func @transform_0(%arg0: i32, %arg1: i32) -> (i32, i32, i32, i32, i32) {
    %c0_i32 = arith.constant 0 : i32
    %c0_i32_0 = arith.constant 0 : i32
    %c0_i32_1 = arith.constant 0 : i32
    %c0_i32_2 = arith.constant 0 : i32
    return %arg0, %arg1, %c0_i32, %c0_i32_0, %c0_i32_1 : i32, i32, i32, i32, i32
  }
  func.func @transform_1(%arg0: i32, %arg1: i32) -> (i32, i32) {
    %c0_i32 = arith.constant 0 : i32
    %c0_i32_0 = arith.constant 0 : i32
    %c0_i32_1 = arith.constant 0 : i32
    return %c0_i32, %c0_i32_0 : i32, i32
  }
  func.func @transform_2(%arg0: i32, %arg1: i32) -> (i32, i32) {
    %c0_i32 = arith.constant 0 : i32
    %c0_i32_0 = arith.constant 0 : i32
    %c0_i32_1 = arith.constant 0 : i32
    return %c0_i32, %c0_i32_0 : i32, i32
  }
  func.func @transform_3(%arg0: i32, %arg1: i32) -> (i32, i32, i32) {
    %c0_i32 = arith.constant 0 : i32
    %c0_i32_0 = arith.constant 0 : i32
    return %arg0, %arg1, %c0_i32 : i32, i32, i32
  }
}

module attributes {stable_mosaic.version = 11 : i64} {
  func.func @_conv2d_same_kernel(%arg0: i32, %arg1: i32, %arg2: memref<1x1x18x18x4xf32, #tpu.memory_space<vmem>>, %arg3: memref<36x128xf32, #tpu.memory_space<vmem>>, %arg4: memref<1x128xf32, #tpu.memory_space<vmem>>, %arg5: memref<1x256x128xf32, #tpu.memory_space<vmem>>) attributes {dimension_semantics = [#tpu.dimension_semantics<parallel>, #tpu.dimension_semantics<parallel>], iteration_bounds = array<i64: 2, 1>, scalar_prefetch = 0 : i64, scratch_operands = 0 : i64, tpu.core_type = #tpu.core_type<tc>, window_params = [{transform_indices = @transform_0, window_bounds = array<i64: 1, 1, 18, 18, 4>}, {pipeline_mode = #tpu.pipeline_mode<synchronous>, transform_indices = @transform_1, window_bounds = array<i64: 36, 128>}, {pipeline_mode = #tpu.pipeline_mode<synchronous>, transform_indices = @transform_2, window_bounds = array<i64: 1, 128>}, {transform_indices = @transform_3, window_bounds = array<i64: 1, 256, 128>}]} {
    %c0 = arith.constant 0 : index
    %c0_0 = arith.constant 0 : index
    %c0_1 = arith.constant 0 : index
    %c0_2 = arith.constant 0 : index
    %c0_3 = arith.constant 0 : index
    %0 = vector.load %arg2[%c0, %c0_0, %c0_1, %c0_2, %c0_3] : memref<1x1x18x18x4xf32, #tpu.memory_space<vmem>>, vector<1x1x16x16x4xf32>
    %1 = vector.shape_cast %0 : vector<1x1x16x16x4xf32> to vector<16x16x4xf32>
    %c0_4 = arith.constant 0 : index
    %c0_5 = arith.constant 0 : index
    %c0_6 = arith.constant 0 : index
    %c1 = arith.constant 1 : index
    %c0_7 = arith.constant 0 : index
    %2 = vector.load %arg2[%c0_4, %c0_5, %c0_6, %c1, %c0_7] : memref<1x1x18x18x4xf32, #tpu.memory_space<vmem>>, vector<1x1x16x16x4xf32>
    %3 = vector.shape_cast %2 : vector<1x1x16x16x4xf32> to vector<16x16x4xf32>
    %c0_8 = arith.constant 0 : index
    %c0_9 = arith.constant 0 : index
    %c0_10 = arith.constant 0 : index
    %c2 = arith.constant 2 : index
    %c0_11 = arith.constant 0 : index
    %4 = vector.load %arg2[%c0_8, %c0_9, %c0_10, %c2, %c0_11] : memref<1x1x18x18x4xf32, #tpu.memory_space<vmem>>, vector<1x1x16x16x4xf32>
    %5 = vector.shape_cast %4 : vector<1x1x16x16x4xf32> to vector<16x16x4xf32>
    %c0_12 = arith.constant 0 : index
    %c0_13 = arith.constant 0 : index
    %c1_14 = arith.constant 1 : index
    %c0_15 = arith.constant 0 : index
    %c0_16 = arith.constant 0 : index
    %6 = vector.load %arg2[%c0_12, %c0_13, %c1_14, %c0_15, %c0_16] : memref<1x1x18x18x4xf32, #tpu.memory_space<vmem>>, vector<1x1x16x16x4xf32>
    %7 = vector.shape_cast %6 : vector<1x1x16x16x4xf32> to vector<16x16x4xf32>
    %c0_17 = arith.constant 0 : index
    %c0_18 = arith.constant 0 : index
    %c1_19 = arith.constant 1 : index
    %c1_20 = arith.constant 1 : index
    %c0_21 = arith.constant 0 : index
    %8 = vector.load %arg2[%c0_17, %c0_18, %c1_19, %c1_20, %c0_21] : memref<1x1x18x18x4xf32, #tpu.memory_space<vmem>>, vector<1x1x16x16x4xf32>
    %9 = vector.shape_cast %8 : vector<1x1x16x16x4xf32> to vector<16x16x4xf32>
    %c0_22 = arith.constant 0 : index
    %c0_23 = arith.constant 0 : index
    %c1_24 = arith.constant 1 : index
    %c2_25 = arith.constant 2 : index
    %c0_26 = arith.constant 0 : index
    %10 = vector.load %arg2[%c0_22, %c0_23, %c1_24, %c2_25, %c0_26] : memref<1x1x18x18x4xf32, #tpu.memory_space<vmem>>, vector<1x1x16x16x4xf32>
    %11 = vector.shape_cast %10 : vector<1x1x16x16x4xf32> to vector<16x16x4xf32>
    %c0_27 = arith.constant 0 : index
    %c0_28 = arith.constant 0 : index
    %c2_29 = arith.constant 2 : index
    %c0_30 = arith.constant 0 : index
    %c0_31 = arith.constant 0 : index
    %12 = vector.load %arg2[%c0_27, %c0_28, %c2_29, %c0_30, %c0_31] : memref<1x1x18x18x4xf32, #tpu.memory_space<vmem>>, vector<1x1x16x16x4xf32>
    %13 = vector.shape_cast %12 : vector<1x1x16x16x4xf32> to vector<16x16x4xf32>
    %c0_32 = arith.constant 0 : index
    %c0_33 = arith.constant 0 : index
    %c2_34 = arith.constant 2 : index
    %c1_35 = arith.constant 1 : index
    %c0_36 = arith.constant 0 : index
    %14 = vector.load %arg2[%c0_32, %c0_33, %c2_34, %c1_35, %c0_36] : memref<1x1x18x18x4xf32, #tpu.memory_space<vmem>>, vector<1x1x16x16x4xf32>
    %15 = vector.shape_cast %14 : vector<1x1x16x16x4xf32> to vector<16x16x4xf32>
    %c0_37 = arith.constant 0 : index
    %c0_38 = arith.constant 0 : index
    %c2_39 = arith.constant 2 : index
    %c2_40 = arith.constant 2 : index
    %c0_41 = arith.constant 0 : index
    %16 = vector.load %arg2[%c0_37, %c0_38, %c2_39, %c2_40, %c0_41] : memref<1x1x18x18x4xf32, #tpu.memory_space<vmem>>, vector<1x1x16x16x4xf32>
    %17 = vector.shape_cast %16 : vector<1x1x16x16x4xf32> to vector<16x16x4xf32>
    %18 = tpu.concatenate %1, %3, %5, %7, %9, %11, %13, %15, %17 in 2 : vector<16x16x4xf32>, vector<16x16x4xf32>, vector<16x16x4xf32>, vector<16x16x4xf32>, vector<16x16x4xf32>, vector<16x16x4xf32>, vector<16x16x4xf32>, vector<16x16x4xf32>, vector<16x16x4xf32> -> vector<16x16x36xf32>
    %19 = vector.shape_cast %18 : vector<16x16x36xf32> to vector<256x36xf32>
    %c0_42 = arith.constant 0 : index
    %c0_43 = arith.constant 0 : index
    %20 = vector.load %arg3[%c0_42, %c0_43] : memref<36x128xf32, #tpu.memory_space<vmem>>, vector<36x128xf32>
    %cst = arith.constant dense<0.000000e+00> : vector<256x128xf32>
    %21 = tpu.matmul %19, %20, %cst {dimension_numbers = #tpu.dot_dimension_numbers<[1], [0], [0], [1], [0, 0, 1, 1], [], []>} : vector<256x36xf32>, vector<36x128xf32>, vector<256x128xf32> -> vector<256x128xf32>
    %c0_44 = arith.constant 0 : index
    %c0_45 = arith.constant 0 : index
    %22 = vector.load %arg4[%c0_44, %c0_45] : memref<1x128xf32, #tpu.memory_space<vmem>>, vector<1x128xf32>
    %23 = vector.broadcast %22 : vector<1x128xf32> to vector<256x128xf32>
    %24 = arith.addf %21, %23 : vector<256x128xf32>
    %c0_46 = arith.constant 0 : index
    %c0_47 = arith.constant 0 : index
    %c0_48 = arith.constant 0 : index
    %25 = vector.load %arg5[%c0_46, %c0_47, %c0_48] : memref<1x256x128xf32, #tpu.memory_space<vmem>>, vector<1x256x128xf32>
    %26 = vector.shape_cast %25 : vector<1x256x128xf32> to vector<256x128xf32>
    %27 = vector.shape_cast %24 : vector<256x128xf32> to vector<1x256x128xf32>
    tpu.vector_store %arg5[%c0_46, %c0_47, %c0_48], %27 {strides = array<i32>} : memref<1x256x128xf32, #tpu.memory_space<vmem>>, vector<1x256x128xf32>,
    return
  }
  func.func @transform_0(%arg0: i32, %arg1: i32) -> (i32, i32, i32, i32, i32) {
    %c0_i32 = arith.constant 0 : i32
    %c0_i32_0 = arith.constant 0 : i32
    %c0_i32_1 = arith.constant 0 : i32
    %c0_i32_2 = arith.constant 0 : i32
    return %arg0, %arg1, %c0_i32, %c0_i32_0, %c0_i32_1 : i32, i32, i32, i32, i32
  }
  func.func @transform_1(%arg0: i32, %arg1: i32) -> (i32, i32) {
    %c0_i32 = arith.constant 0 : i32
    %c0_i32_0 = arith.constant 0 : i32
    %c0_i32_1 = arith.constant 0 : i32
    return %c0_i32, %c0_i32_0 : i32, i32
  }
  func.func @transform_2(%arg0: i32, %arg1: i32) -> (i32, i32) {
    %c0_i32 = arith.constant 0 : i32
    %c0_i32_0 = arith.constant 0 : i32
    %c0_i32_1 = arith.constant 0 : i32
    return %c0_i32, %c0_i32_0 : i32, i32
  }
  func.func @transform_3(%arg0: i32, %arg1: i32) -> (i32, i32, i32) {
    %c0_i32 = arith.constant 0 : i32
    %c0_i32_0 = arith.constant 0 : i32
    return %arg0, %arg1, %c0_i32 : i32, i32, i32
  }
}

</mosaic_0001>

<bundles_post_ra>
// kernel: tpu_custom_call.1
= control target key start
LH: loop header
LB: loop body
LE: loop exit
PB: predicated region body
PF: predicated region fallthrough
CT: control target
= control target key end

     0   :  { %8 = vsyncpa [#allocation3], 0  ;;  %s4334_s0 = inlined_call_operand.vmem [shape: f32[2,1,18,18,4], index: 0, kind: input, shape index: {}]   ;;  %s4335_s1 = inlined_call_operand.vmem [shape: f32[36,128], index: 1, kind: input, shape index: {}]   ;;  %s4336_s2 = inlined_call_operand.vmem [shape: f32[1,128], index: 2, kind: input, shape index: {}]   ;;  %s4337_s3 = inlined_call_operand.hbm [shape: f32[2,256,128], index: 3, kind: output, shape index: {}]  }
   0x1   :  { %10 = vsyncpa [#allocation3 + $0x1], 0  ;;  %s2761_s12 = smov 0   ;;  %s2763_s13 = smov 0  }
   0x2   :  { %s2765_s14 = smov 0   ;;  %s2767_s15 = smov 0  }
   0x3   :  { %s2769_s16 = smov 0   ;;  %s2771_s17 = smov 0  }
   0x4 LB: > { %s2244_s18 = sadd.s32 4294967295, %s2729_s17   ;;  %s2245_s19 = sadd.s32 4294967294, %s2729_s17   ;;  %s2729_s17 = sphi %s2771_s17, %s16_s17   ;;  %s2725_s16 = sphi %s2769_s16, %s4499_s16   ;;  %s2721_s15 = sphi %s2767_s15, %s4498_s15   ;;  %s2717_s14 = sphi %s2765_s14, %s4497_s14   ;;  %s2713_s13 = sphi %s2763_s13, %s4496_s13   ;;  %s2709_s12 = sphi %s2761_s12, %s4495_s12  }
   0x5   : > { %s28_s20 = sadd.s32 1, %s2725_s16  ;;  %s107_s21 = sadd.s32 1, %s2717_s14 }
   0x6   : > { %p30_p0 = scmp.ge.s32.totalorder %s28_s20, 2  ;;  %p117_p1 = scmp.ne.s32.totalorder %s2717_s14, %s2713_s13 }
   0x7   : > { %p118_p2 = scmp.eq.s32.totalorder %s2244_s18, 1  ;;  %p123_p3 = scmp.ne.s32.totalorder %s2713_s13, %s2709_s12 }
   0x8   : > { %s4501_s20 = smov (%p30_p0, %s28_s20), 0  ;;  %p124_p5 = scmp.eq.s32.totalorder %s2245_s19, 1 }
   0x9   : > { %p2801_p4 = por %p118_p2, %p117_p1  ;;  %s102_s23 = ssub.s32 %s2725_s16, %s4501_s20 }
   0xa   : > { %p2248_p6 = scmp.ge.s32.totalorder %s2729_s17, 1  ;;  %p105_p7 = scmp.eq.s32.totalorder %s102_s23, 0 }
   0xb   : > { %p2808_p8 = por %p124_p5, %p123_p3  ;;  %p160_p9 = scmp.lt.s32.totalorder %s2729_s17, 3 }
   0xc   : > { %s2814_s25 = scalar_select %p105_p7, %s2717_s14, %s107_s21  }
   0xd   : > { %p161_p10 = pnand %p2248_p6, %p160_p9 }
   0xf   : > { %164 = sbr.rel (%p161_p10) target bundleno = 863 (0x35f), region = 32 }
  0x14   : > { %p188_p11 = scmp.lt.s32.totalorder %s2721_s15, 1  ;;  %s2731_s4 = smov 4   ;;  %vm1512_vm0 = vcmask 31744   ;;  %vm1545_vm1 = vcmask 64512   ;;  %vm1885_vm2 = vcmask 1043456   ;;  %vm1578_vm3 = vcmask 97280  }
  0x15   : > { %s2732_s5 = smov 8   ;;  %s2733_s6 = smov 12   ;;  %vm1611_vm4 = vcmask 130048   ;;  %vm1644_vm5 = vcmask 162816   ;;  %vm1677_vm6 = vcmask 195584   ;;  %vm1710_vm7 = vcmask 228352  }
  0x16   : > { %s189_s26 = scalar_select %p188_p11, %s2721_s15, 1  ;;  %vm1743_vm8 = vcmask 261120   ;;  %vm1788_vm9 = vcmask 293888  }
  0x17   : > { %s2734_s7 = smov 16   ;;  %s2735_s8 = smov 20  }
  0x18   : > { %s2588_s27 = smul.u32 432, %s189_s26  ;;  %s2736_s9 = smov 24  }
  0x19   : > { %s2737_s21 = smov 28   ;;  %s2482_s11 = sshll.u32 %s2721_s15, 12 }
  0x1a   : > { %s2821_s30 = scalar_lea.vmem %s4334_s0, %s2588_s27  ;;  %s4276_s23 = scalar_lea.hbm %s4337_s3, %s2482_s11 }
  0x1b   : > { %v2824_v0 = vld [vmem:[%s2821_s30 + $0x19] sm:$0xff]  ;;  %v230_v1 = vld [vmem:[%s2821_s30 + $0x1] sm:$0xff]  ;;  %v231_v3 = vld [vmem:[%s2821_s30 + $0x9] sm:$0xff]  ;;  %s2739_s27 = smov [#allocation2]  }
  0x1c   : > { %524 = vrot.lane.b32.xlu1 %v2824_v0, %s2731_s4  ;;  %520 = vrot.lane.b32.xlu0 %v230_v1, %s2731_s4  ;;  %v2831_v2 = vld [vmem:[%s2821_s30 + $0x21] sm:$0xff]  ;;  %v2838_v4 = vld [vmem:[%s2821_s30 + $0x39] sm:$0xff]  ;;  %s2657_s28 = sshll.u32 %s2739_s27, 4  ;;  %s2658_s28 = int_to_ptr.vmem [resolvable:$false] %s2657_s28 }
  0x1d   : > { %v2841_v5 = vld [vmem:[%s2821_s30 + $0x31] sm:$0xff]  ;;  %v2851_v7 = vld [vmem:[%s2821_s30 + $0x49] sm:$0xff]  ;;  %v2861_v9 = vld [vmem:[%s2821_s30 + $0x61] sm:$0xff]  ;;  %s2659_s29 = scalar_lea.vmem %s2658_s28, 8192 }
  0x1e   : > { %v2848_v6 = vld [vmem:[%s2821_s30 + $0x51] sm:$0xff]  ;;  %v2858_v8 = vld [vmem:[%s2821_s30 + $0x69] sm:$0xff]  ;;  %v2868_v10 = vld [vmem:[%s2821_s30 + $0x81] sm:$0xff] }
  0x1f   : > { %v2871_v11 = vld [vmem:[%s2821_s30 + $0x79] sm:$0xff]  ;;  %v2881_v13 = vld [vmem:[%s2821_s30 + $0x91] sm:$0xff]  ;;  %v2891_v15 = vld [vmem:[%s2821_s30 + $0xa9] sm:$0xff] }
  0x20   : > { %526 = vrot.lane.b32.xlu1 %v2831_v2, %s2731_s4  ;;  %522 = vrot.lane.b32.xlu0 %v231_v3, %s2731_s4  ;;  %v2878_v12 = vld [vmem:[%s2821_s30 + $0x99] sm:$0xff]  ;;  %v2888_v14 = vld [vmem:[%s2821_s30 + $0xb1] sm:$0xff] }
  0x21   : > { %v247_v16 = vld [vmem:[%s2821_s30 + $0xc9] sm:$0xff]  ;;  %v2899_v17 = vld [vmem:[%s2821_s30 + $0xc1] sm:$0xff]  ;;  %v2908_v19 = vld [vmem:[%s2821_s30 + $0xd9] sm:$0xff] }
  0x22   : > { %v2905_v18 = vld [vmem:[%s2821_s30 + $0xe1] sm:$0xff]  ;;  %v2915_v20 = vld [vmem:[%s2821_s30 + $0xf9] sm:$0xff]  ;;  %v2918_v21 = vld [vmem:[%s2821_s30 + $0xf1] sm:$0xff] }
  0x23   : > { %4381 = vst [vmem:[#allocation5_spill] sm:$0xff] %v2915_v20  ;;  %4382 = vst [vmem:[#allocation6_spill] sm:$0xff] %v2918_v21  ;;  %v2925_v22 = vld [vmem:[%s2821_s30 + $0x111] sm:$0xff]  ;;  %v2928_v23 = vld [vmem:[%s2821_s30 + $0x109] sm:$0xff] }
  0x24   : > { %530 = vrot.lane.b32.xlu1 %v2838_v4, %s2731_s4  ;;  %528 = vrot.lane.b32.xlu0 %v2841_v5, %s2731_s4  ;;  %4383 = vst [vmem:[#allocation7_spill] sm:$0xff] %v2925_v22  ;;  %4384 = vst [vmem:[#allocation8_spill] sm:$0xff] %v2928_v23  ;;  %v255_v24 = vld [vmem:[%s2821_s30 + $0x129] sm:$0xff]  ;;  %v254_v25 = vld [vmem:[%s2821_s30 + $0x121] sm:$0xff] }
  0x25   : > { %v257_v26 = vld [vmem:[%s2821_s30 + $0x141] sm:$0xff]  ;;  %v256_v27 = vld [vmem:[%s2821_s30 + $0x139] sm:$0xff]  ;;  %v258_v29 = vld [vmem:[%s2821_s30 + $0x151] sm:$0xff] }
  0x26   : > { %v259_v28 = vld [vmem:[%s2821_s30 + $0x159] sm:$0xff]  ;;  %v261_v30 = vld [vmem:[%s2821_s30 + $0x171] sm:$0xff]  ;;  %v260_v31 = vld [vmem:[%s2821_s30 + $0x169] sm:$0xff] }
  0x27   : > { %v263_v32 = vld [vmem:[%s2821_s30 + $0xa] sm:$0xff]  ;;  %v262_v33 = vld [vmem:[%s2821_s30 + $0x2] sm:$0xff]  ;;  %v2958_v35 = vld [vmem:[%s2821_s30 + $0x1a] sm:$0xff] }
  0x28   : > { %534 = vrot.lane.b32.xlu1 %v2848_v6, %s2731_s4  ;;  %532 = vrot.lane.b32.xlu0 %v2851_v7, %s2731_s4  ;;  %v2955_v34 = vld [vmem:[%s2821_s30 + $0x22] sm:$0xff]  ;;  %v2965_v36 = vld [vmem:[%s2821_s30 + $0x3a] sm:$0xff] }
  0x29   : > { %4385 = vst [vmem:[#allocation9_spill] sm:$0xff] %v2965_v36  ;;  %v2968_v37 = vld [vmem:[%s2821_s30 + $0x32] sm:$0xff]  ;;  %v2978_v39 = vld [vmem:[%s2821_s30 + $0x4a] sm:$0xff]  ;;  %v2986_v41 = vld [vmem:[%s2821_s30 + $0x62] sm:$0xff] }
  0x2a   : > { %4386 = vst [vmem:[#allocation10_spill] sm:$0xff] %v2968_v37  ;;  %v2975_v38 = vld [vmem:[%s2821_s30 + $0x52] sm:$0xff]  ;;  %4388 = vst [vmem:[#allocation12_spill] sm:$0xff] %v2978_v39  ;;  %v271_v40 = vld [vmem:[%s2821_s30 + $0x6a] sm:$0xff] }
  0x2b   : > { %4387 = vst [vmem:[#allocation11_spill] sm:$0xff] %v2975_v38  ;;  %4389 = vst [vmem:[#allocation13_spill] sm:$0xff] %v2986_v41  ;;  %v273_v42 = vld [vmem:[%s2821_s30 + $0x82] sm:$0xff]  ;;  %v272_v43 = vld [vmem:[%s2821_s30 + $0x7a] sm:$0xff] }
  0x2c   : > { %538 = vrot.lane.b32.xlu1 %v2858_v8, %s2731_s4  ;;  %536 = vrot.lane.b32.xlu0 %v2861_v9, %s2731_s4  ;;  %v275_v44 = vld [vmem:[%s2821_s30 + $0x9a] sm:$0xff]  ;;  %v274_v45 = vld [vmem:[%s2821_s30 + $0x92] sm:$0xff] }
  0x2d   : > { %v277_v46 = vld [vmem:[%s2821_s30 + $0xb2] sm:$0xff]  ;;  %v276_v47 = vld [vmem:[%s2821_s30 + $0xaa] sm:$0xff]  ;;  %v278_v49 = vld [vmem:[%s2821_s30 + $0xc2] sm:$0xff] }
  0x2e   : > { %v279_v48 = vld [vmem:[%s2821_s30 + $0xca] sm:$0xff]  ;;  %v3008_v50 = vld [vmem:[%s2821_s30 + $0xe2] sm:$0xff]  ;;  %v3011_v51 = vld [vmem:[%s2821_s30 + $0xda] sm:$0xff] }
  0x2f   : > { %4390 = vst [vmem:[#allocation14_spill] sm:$0xff] %v3008_v50  ;;  %v3018_v52 = vld [vmem:[%s2821_s30 + $0xfa] sm:$0xff]  ;;  %v3021_v53 = vld [vmem:[%s2821_s30 + $0xf2] sm:$0xff]  ;;  %v3031_v55 = vld [vmem:[%s2821_s30 + $0x10a] sm:$0xff] }
  0x30   : > { %542 = vrot.lane.b32.xlu1 %v2868_v10, %s2731_s4  ;;  %540 = vrot.lane.b32.xlu0 %v2871_v11, %s2731_s4  ;;  %4391 = vst [vmem:[#allocation15_spill] sm:$0xff] %v3018_v52  ;;  %4392 = vst [vmem:[#allocation16_spill] sm:$0xff] %v3021_v53  ;;  %v3028_v54 = vld [vmem:[%s2821_s30 + $0x112] sm:$0xff]  ;;  %v3038_v56 = vld [vmem:[%s2821_s30 + $0x12a] sm:$0xff] }
  0x31   : > { %4393 = vst [vmem:[#allocation17_spill] sm:$0xff] %v3028_v54  ;;  %4394 = vst [vmem:[#allocation18_spill] sm:$0xff] %v3031_v55  ;;  %v3041_v57 = vld [vmem:[%s2821_s30 + $0x122] sm:$0xff]  ;;  %v288_v59 = vld [vmem:[%s2821_s30 + $0x13a] sm:$0xff] }
  0x32   : > { %4395 = vst [vmem:[#allocation19_spill] sm:$0xff] %v3038_v56  ;;  %4396 = vst [vmem:[#allocation20_spill] sm:$0xff] %v3041_v57  ;;  %v289_v58 = vld [vmem:[%s2821_s30 + $0x142] sm:$0xff]  ;;  %v291_v62 = vld [vmem:[%s2821_s30 + $0x15a] sm:$0xff] }
  0x33   : > { %v290_v63 = vld [vmem:[%s2821_s30 + $0x152] sm:$0xff] }
  0x34   : > { %546 = vrot.lane.b32.xlu1 %v2878_v12, %s2731_s4  ;;  %544 = vrot.lane.b32.xlu0 %v2881_v13, %s2731_s4 }
  0x38   : > { %550 = vrot.lane.b32.xlu1 %v2888_v14, %s2731_s4  ;;  %548 = vrot.lane.b32.xlu0 %v2891_v15, %s2731_s4 }
  0x3c   : > { %554 = vrot.lane.b32.xlu1 %v247_v16, %s2731_s4  ;;  %552 = vrot.lane.b32.xlu0 %v2899_v17, %s2731_s4  ;;  %v293_v16 = vld [vmem:[%s2821_s30 + $0x172] sm:$0xff] }
  0x40   : > { %558 = vrot.lane.b32.xlu1 %v2905_v18, %s2731_s4  ;;  %556 = vrot.lane.b32.xlu0 %v2908_v19, %s2731_s4 }
  0x44   : > { %562 = vrot.lane.b32.xlu1 %v2915_v20, %s2731_s4  ;;  %560 = vrot.lane.b32.xlu0 %v2918_v21, %s2731_s4  ;;  %v3237_v20 = vld [vmem:[%s2821_s30 + $0x138] sm:$0xff] }
  0x48   : > { %566 = vrot.lane.b32.xlu1 %v2925_v22, %s2731_s4  ;;  %564 = vrot.lane.b32.xlu0 %v2928_v23, %s2731_s4  ;;  %v3225_v22 = vld [vmem:[%s2821_s30 + $0x120] sm:$0xff]  ;;  %v229_v23 = vld [vmem:[%s2821_s30 + $0x170] sm:$0xff] }
  0x4c   : > { %570 = vrot.lane.b32.xlu1 %v255_v24, %s2731_s4  ;;  %568 = vrot.lane.b32.xlu0 %v254_v25, %s2731_s4  ;;  %v292_v24 = vld [vmem:[%s2821_s30 + $0x16a] sm:$0xff] }
  0x50   : > { %574 = vrot.lane.b32.xlu1 %v257_v26, %s2731_s4  ;;  %572 = vrot.lane.b32.xlu0 %v256_v27, %s2731_s4 }
  0x54   : > { %578 = vrot.lane.b32.xlu1 %v259_v28, %s2731_s4  ;;  %576 = vrot.lane.b32.xlu0 %v258_v29, %s2731_s4  ;;  %v3076_v29 = vld [vmem:[%s2821_s30 + $0x18] sm:$0xff] }
  0x55   : > { %4401 = vst [vmem:[#allocation25_spill] sm:$0xff] %v3076_v29 }
  0x58   : > { %582 = vrot.lane.b32.xlu1 %v261_v30, %s2731_s4  ;;  %580 = vrot.lane.b32.xlu0 %v260_v31, %s2731_s4  ;;  %v3079_v30 = vld [vmem:[%s2821_s30 + $0x20] sm:$0xff] }
  0x59   : > { %4402 = vst [vmem:[#allocation26_spill] sm:$0xff] %v3079_v30 }
  0x5c   : > { %650 = vrot.lane.b32.xlu1 %v263_v32, %s2732_s5  ;;  %648 = vrot.lane.b32.xlu0 %v262_v33, %s2732_s5  ;;  %v3090_v33 = vld [vmem:[%s2821_s30 + $0x38] sm:$0xff] }
  0x60   : > { %654 = vrot.lane.b32.xlu1 %v2955_v34, %s2732_s5  ;;  %652 = vrot.lane.b32.xlu0 %v2958_v35, %s2732_s5 }
  0x64   : > { %658 = vrot.lane.b32.xlu1 %v2965_v36, %s2732_s5  ;;  %656 = vrot.lane.b32.xlu0 %v2968_v37, %s2732_s5 }
  0x68   : > { %662 = vrot.lane.b32.xlu1 %v2975_v38, %s2732_s5  ;;  %660 = vrot.lane.b32.xlu0 %v2978_v39, %s2732_s5 }
  0x6c   : > { %666 = vrot.lane.b32.xlu1 %v271_v40, %s2732_s5  ;;  %664 = vrot.lane.b32.xlu0 %v2986_v41, %s2732_s5  ;;  %v3093_v40 = vld [vmem:[%s2821_s30 + $0x30] sm:$0xff]  ;;  %v3169_v41 = vld [vmem:[%s2821_s30 + $0xc0] sm:$0xff] }
  0x6d   : > { %4408 = vst [vmem:[#allocation32_spill] sm:$0xff] %v3169_v41 }
  0x70   : > { %670 = vrot.lane.b32.xlu1 %v273_v42, %s2732_s5  ;;  %668 = vrot.lane.b32.xlu0 %v272_v43, %s2732_s5 }
  0x74   : > { %674 = vrot.lane.b32.xlu1 %v275_v44, %s2732_s5  ;;  %672 = vrot.lane.b32.xlu0 %v274_v45, %s2732_s5  ;;  %v3104_v44 = vld [vmem:[%s2821_s30 + $0x50] sm:$0xff]  ;;  %v3107_v45 = vld [vmem:[%s2821_s30 + $0x48] sm:$0xff] }
  0x78   : > { %678 = vrot.lane.b32.xlu1 %v277_v46, %s2732_s5  ;;  %676 = vrot.lane.b32.xlu0 %v276_v47, %s2732_s5  ;;  %v211_v46 = vld [vmem:[%s2821_s30 + $0x98] sm:$0xff]  ;;  %v210_v47 = vld [vmem:[%s2821_s30 + $0x90] sm:$0xff] }
  0x7c   : > { %682 = vrot.lane.b32.xlu1 %v279_v48, %s2732_s5  ;;  %680 = vrot.lane.b32.xlu0 %v278_v49, %s2732_s5 }
  0x80   : > { %686 = vrot.lane.b32.xlu1 %v3008_v50, %s2732_s5  ;;  %684 = vrot.lane.b32.xlu0 %v3011_v51, %s2732_s5 }
  0x84   : > { %690 = vrot.lane.b32.xlu1 %v3018_v52, %s2732_s5  ;;  %688 = vrot.lane.b32.xlu0 %v3021_v53, %s2732_s5  ;;  %v228_v52 = vld [vmem:[%s2821_s30 + $0x168] sm:$0xff]  ;;  %v3234_v53 = vld [vmem:[%s2821_s30 + $0x140] sm:$0xff] }
  0x88   : > { %694 = vrot.lane.b32.xlu1 %v3028_v54, %s2732_s5  ;;  %692 = vrot.lane.b32.xlu0 %v3031_v55, %s2732_s5  ;;  %v3211_v54 = vld [vmem:[%s2821_s30 + $0x108] sm:$0xff] }
  0x89   : > { %v3222_v55 = vld [vmem:[%s2821_s30 + $0x128] sm:$0xff] }
  0x8c   : > { %698 = vrot.lane.b32.xlu1 %v3038_v56, %s2732_s5  ;;  %696 = vrot.lane.b32.xlu0 %v3041_v57, %s2732_s5  ;;  %v3208_v57 = vld [vmem:[%s2821_s30 + $0x110] sm:$0xff] }
  0x8e   : > { %v3049_v60 = vpop.permute.xlu1 %524  ;;  %v3051_v61 = vpop.permute.xlu0 %520 }
  0x8f   : > { %4397 = vst [vmem:[#allocation21_spill] sm:$0xff] %v3049_v60  ;;  %4398 = vst [vmem:[#allocation22_spill] sm:$0xff] %v3051_v61  ;;  %v3137_v60 = vld [vmem:[%s2821_s30 + $0x78] sm:$0xff] }
  0x90   : > { %702 = vrot.lane.b32.xlu1 %v289_v58, %s2732_s5  ;;  %700 = vrot.lane.b32.xlu0 %v288_v59, %s2732_s5  ;;  %v3116_v58 = vld [vmem:[%s2821_s30 + $0x68] sm:$0xff]  ;;  %v3119_v59 = vld [vmem:[%s2821_s30 + $0x60] sm:$0xff] }
  0x92   : > { %v3057_v1 = vpop.permute.xlu1 %526  ;;  %v3059_v3 = vpop.permute.xlu0 %522 }
  0x93   : > { %4399 = vst [vmem:[#allocation23_spill] sm:$0xff] %v3057_v1  ;;  %4400 = vst [vmem:[#allocation24_spill] sm:$0xff] %v3059_v3 }
  0x94   : > { %706 = vrot.lane.b32.xlu1 %v291_v62, %s2732_s5  ;;  %704 = vrot.lane.b32.xlu0 %v290_v63, %s2732_s5 }
  0x96   : > { %v3065_v25 = vpop.permute.xlu1 %530  ;;  %v3067_v26 = vpop.permute.xlu0 %528 }
  0x98   : > { %710 = vrot.lane.b32.xlu1 %v293_v16, %s2732_s5  ;;  %708 = vrot.lane.b32.xlu0 %v292_v24, %s2732_s5  ;;  %v213_v16 = vld [vmem:[%s2821_s30 + $0xb0] sm:$0xff]  ;;  %v212_v24 = vld [vmem:[%s2821_s30 + $0xa8] sm:$0xff] }
  0x9a   : > { %v3071_v27 = vpop.permute.xlu1 %534  ;;  %v3073_v28 = vpop.permute.xlu0 %532 }
  0x9c   : > { %778 = vrot.lane.b32.xlu1 %v3079_v30, %s2733_s6  ;;  %776 = vrot.lane.b32.xlu0 %v3076_v29, %s2733_s6  ;;  %v3134_v29 = vld [vmem:[%s2821_s30 + $0x80] sm:$0xff] }
  0x9e   : > { %v3085_v31 = vpop.permute.xlu1 %538  ;;  %v3087_v32 = vpop.permute.xlu0 %536 }
  0xa0   : > { %782 = vrot.lane.b32.xlu1 %v3090_v33, %s2733_s6  ;;  %780 = vrot.lane.b32.xlu0 %v3093_v40, %s2733_s6 }
  0xa2   : > { %v3099_v42 = vpop.permute.xlu1 %542  ;;  %v3101_v43 = vpop.permute.xlu0 %540 }
  0xa4   : > { %786 = vrot.lane.b32.xlu1 %v3104_v44, %s2733_s6  ;;  %784 = vrot.lane.b32.xlu0 %v3107_v45, %s2733_s6 }
  0xa6   : > { %v547_v48 = vpop.permute.xlu1 %546  ;;  %v545_v49 = vpop.permute.xlu0 %544 }
  0xa7   : > { %v3122_v62 = vsel %vm1512_vm0, %v211_v46, %v547_v48  ;;  %v3125_v63 = vsel %vm1512_vm0, %v210_v47, %v545_v49 }
  0xa8   : > { %790 = vrot.lane.b32.xlu1 %v3116_v58, %s2733_s6  ;;  %788 = vrot.lane.b32.xlu0 %v3119_v59, %s2733_s6 }
  0xaa   : > { %v551_v30 = vpop.permute.xlu1 %550  ;;  %v549_v1 = vpop.permute.xlu0 %548 }
  0xab   : > { %v3140_v48 = vsel %vm1512_vm0, %v213_v16, %v551_v30  ;;  %v3143_v49 = vsel %vm1512_vm0, %v212_v24, %v549_v1 }
  0xac   : > { %794 = vrot.lane.b32.xlu1 %v3134_v29, %s2733_s6  ;;  %792 = vrot.lane.b32.xlu0 %v3137_v60, %s2733_s6 }
  0xae   : > { %v3149_v3 = vpop.permute.xlu1 %554  ;;  %v3151_v61 = vpop.permute.xlu0 %552 }
  0xaf   : > { %4403 = vst [vmem:[#allocation27_spill] sm:$0xff] %v3149_v3  ;;  %4404 = vst [vmem:[#allocation28_spill] sm:$0xff] %v3151_v61  ;;  %v3166_v61 = vld [vmem:[%s2821_s30 + $0xc8] sm:$0xff] }
  0xb0   : > { %798 = vrot.lane.b32.xlu1 %v211_v46, %s2733_s6  ;;  %796 = vrot.lane.b32.xlu0 %v210_v47, %s2733_s6  ;;  %4407 = vst [vmem:[#allocation31_spill] sm:$0xff] %v3166_v61 }
  0xb2   : > { %v3155_v30 = vpop.permute.xlu1 %558  ;;  %v3157_v1 = vpop.permute.xlu0 %556 }
  0xb3   : > { %4405 = vst [vmem:[#allocation29_spill] sm:$0xff] %v3155_v30  ;;  %4406 = vst [vmem:[#allocation30_spill] sm:$0xff] %v3157_v1 }
  0xb4   : > { %802 = vrot.lane.b32.xlu1 %v213_v16, %s2733_s6  ;;  %800 = vrot.lane.b32.xlu0 %v212_v24, %s2733_s6  ;;  %v3180_v16 = vld [vmem:[%s2821_s30 + $0xe0] sm:$0xff]  ;;  %v3183_v24 = vld [vmem:[%s2821_s30 + $0xd8] sm:$0xff] }
  0xb5   : > { %4409 = vst [vmem:[#allocation33_spill] sm:$0xff] %v3180_v16  ;;  %4410 = vst [vmem:[#allocation34_spill] sm:$0xff] %v3183_v24 }
  0xb6   : > { %v3161_v56 = vpop.permute.xlu1 %562  ;;  %v3163_v3 = vpop.permute.xlu0 %560 }
  0xb8   : > { %806 = vrot.lane.b32.xlu1 %v3166_v61, %s2733_s6  ;;  %804 = vrot.lane.b32.xlu0 %v3169_v41, %s2733_s6  ;;  %v3194_v61 = vld [vmem:[%s2821_s30 + $0xf8] sm:$0xff]  ;;  %v3197_v41 = vld [vmem:[%s2821_s30 + $0xf0] sm:$0xff] }
  0xba   : > { %v3175_v46 = vpop.permute.xlu1 %566  ;;  %v3177_v47 = vpop.permute.xlu0 %564 }
  0xbc   : > { %810 = vrot.lane.b32.xlu1 %v3180_v16, %s2733_s6  ;;  %808 = vrot.lane.b32.xlu0 %v3183_v24, %s2733_s6 }
  0xbe   : > { %v3189_v30 = vpop.permute.xlu1 %570  ;;  %v3191_v1 = vpop.permute.xlu0 %568 }
  0xc0   : > { %814 = vrot.lane.b32.xlu1 %v3194_v61, %s2733_s6  ;;  %812 = vrot.lane.b32.xlu0 %v3197_v41, %s2733_s6 }
  0xc2   : > { %v3203_v16 = vpop.permute.xlu1 %574  ;;  %v3205_v24 = vpop.permute.xlu0 %572 }
  0xc3   : > { %4411 = vst [vmem:[#allocation35_spill] sm:$0xff] %v3203_v16  ;;  %4412 = vst [vmem:[#allocation36_spill] sm:$0xff] %v3205_v24  ;;  %v3254_v24 = vld [vmem:[%s2821_s30 + $0x158] sm:$0xff]  ;;  %v3257_v16 = vld [vmem:[%s2821_s30 + $0x150] sm:$0xff] }
  0xc4   : > { %818 = vrot.lane.b32.xlu1 %v3208_v57, %s2733_s6  ;;  %816 = vrot.lane.b32.xlu0 %v3211_v54, %s2733_s6  ;;  %4419 = vst [vmem:[#allocation43_spill] sm:$0xff] %v3254_v24  ;;  %4420 = vst [vmem:[#allocation44_spill] sm:$0xff] %v3257_v16 }
  0xc6   : > { %v3217_v38 = vpop.permute.xlu1 %578  ;;  %v3219_v39 = vpop.permute.xlu0 %576 }
  0xc7   : > { %4413 = vst [vmem:[#allocation37_spill] sm:$0xff] %v3217_v38  ;;  %4414 = vst [vmem:[#allocation38_spill] sm:$0xff] %v3219_v39 }
  0xc8   : > { %822 = vrot.lane.b32.xlu1 %v3222_v55, %s2733_s6  ;;  %820 = vrot.lane.b32.xlu0 %v3225_v22, %s2733_s6 }
  0xca   : > { %v583_v36 = vpop.permute.xlu1 %582  ;;  %v581_v37 = vpop.permute.xlu0 %580 }
  0xcb   : > { %v3240_v21 = vsel %vm1512_vm0, %v229_v23, %v583_v36  ;;  %v3243_v39 = vsel %vm1512_vm0, %v228_v52, %v581_v37 }
  0xcc   : > { %4415 = vst [vmem:[#allocation39_spill] sm:$0xff] %v3240_v21  ;;  %4416 = vst [vmem:[#allocation40_spill] sm:$0xff] %v3243_v39  ;;  %826 = vrot.lane.b32.xlu1 %v3234_v53, %s2733_s6  ;;  %824 = vrot.lane.b32.xlu0 %v3237_v20, %s2733_s6  ;;  %v1518_v39 = vsel %vm1512_vm0, %v3090_v33, %v3065_v25  ;;  %v1517_v21 = vsel %vm1512_vm0, %v3093_v40, %v3067_v26 }
  0xcd   : > { %v1519_v25 = vsel %vm1512_vm0, %v3107_v45, %v3073_v28 }
  0xce   : > { %v3249_v38 = vpop.permute.xlu1 %650  ;;  %v3251_v50 = vpop.permute.xlu0 %648 }
  0xcf   : > { %4417 = vst [vmem:[#allocation41_spill] sm:$0xff] %v3249_v38  ;;  %4418 = vst [vmem:[#allocation42_spill] sm:$0xff] %v3251_v50  ;;  %v2282_v38 = vld [vmem:[%s2821_s30 + $0x188] sm:$0xff]  ;;  %v2281_v50 = vld [vmem:[%s2821_s30 + $0x180] sm:$0xff] }
  0xd0   : > { %830 = vrot.lane.b32.xlu1 %v3254_v24, %s2733_s6  ;;  %828 = vrot.lane.b32.xlu0 %v3257_v16, %s2733_s6 }
  0xd2   : > { %v3263_v36 = vpop.permute.xlu1 %654  ;;  %v3265_v37 = vpop.permute.xlu0 %652 }
  0xd3   : > { %4421 = vst [vmem:[#allocation45_spill] sm:$0xff] %v3263_v36  ;;  %4422 = vst [vmem:[#allocation46_spill] sm:$0xff] %v3265_v37 }
  0xd4   : > { %834 = vrot.lane.b32.xlu1 %v229_v23, %s2733_s6  ;;  %832 = vrot.lane.b32.xlu0 %v228_v52, %s2733_s6  ;;  %v1520_v52 = vsel %vm1512_vm0, %v3104_v44, %v3071_v27 }
  0xd6   : > { %v659_v16 = vpop.permute.xlu1 %658  ;;  %v657_v24 = vpop.permute.xlu0 %656 }
  0xd7   : > { %v3278_v36 = vsel %vm1545_vm1, %v1518_v39, %v659_v16  ;;  %v3281_v23 = vsel %vm1545_vm1, %v1517_v21, %v657_v24 }
  0xd8   : > { %838 = vrot.lane.b32.xlu1 %v2282_v38, %s2733_s6  ;;  %836 = vrot.lane.b32.xlu0 %v2281_v50, %s2733_s6  ;;  %v1522_v38 = vsel %vm1512_vm0, %v3116_v58, %v3085_v31  ;;  %v1521_v50 = vsel %vm1512_vm0, %v3119_v59, %v3087_v32  ;;  %s2738_s6 = smov 32  }
  0xda   : > { %v663_v26 = vpop.permute.xlu1 %662  ;;  %v661_v37 = vpop.permute.xlu0 %660 }
  0xdb   : > { %v3292_v39 = vsel %vm1545_vm1, %v1520_v52, %v663_v26  ;;  %v3295_v21 = vsel %vm1545_vm1, %v1519_v25, %v661_v37 }
  0xdc   : > { %906 = vrot.lane.b32.xlu1 %v2831_v2, %s2734_s7  ;;  %904 = vrot.lane.b32.xlu0 %v2824_v0, %s2734_s7  ;;  %v1524_v0 = vsel %vm1512_vm0, %v3134_v29, %v3099_v42  ;;  %v1523_v2 = vsel %vm1512_vm0, %v3137_v60, %v3101_v43 }
  0xde   : > { %v667_v27 = vpop.permute.xlu1 %666  ;;  %v665_v28 = vpop.permute.xlu0 %664 }
  0xdf   : > { %v3308_v16 = vsel %vm1545_vm1, %v1522_v38, %v667_v27  ;;  %v3311_v24 = vsel %vm1545_vm1, %v1521_v50, %v665_v28 }
  0xe0   : > { %910 = vrot.lane.b32.xlu1 %v2838_v4, %s2734_s7  ;;  %908 = vrot.lane.b32.xlu0 %v2841_v5, %s2734_s7 }
  0xe2   : > { %v671_v31 = vpop.permute.xlu1 %670  ;;  %v669_v32 = vpop.permute.xlu0 %668 }
  0xe3   : > { %v3324_v37 = vsel %vm1545_vm1, %v1524_v0, %v671_v31  ;;  %v3327_v52 = vsel %vm1545_vm1, %v1523_v2, %v669_v32 }
  0xe4   : > { %914 = vrot.lane.b32.xlu1 %v2848_v6, %s2734_s7  ;;  %912 = vrot.lane.b32.xlu0 %v2851_v7, %s2734_s7 }
  0xe6   : > { %v675_v25 = vpop.permute.xlu1 %674  ;;  %v673_v42 = vpop.permute.xlu0 %672 }
  0xe7   : > { %v3335_v26 = vsel %vm1545_vm1, %v3122_v62, %v675_v25  ;;  %v3339_v43 = vsel %vm1545_vm1, %v3125_v63, %v673_v42 }
  0xe8   : > { %918 = vrot.lane.b32.xlu1 %v2858_v8, %s2734_s7  ;;  %916 = vrot.lane.b32.xlu0 %v2861_v9, %s2734_s7 }
  0xea   : > { %v679_v38 = vpop.permute.xlu1 %678  ;;  %v677_v50 = vpop.permute.xlu0 %676 }
  0xeb   : > { %v3347_v27 = vsel %vm1545_vm1, %v3140_v48, %v679_v38  ;;  %v3351_v62 = vsel %vm1545_vm1, %v3143_v49, %v677_v50 }
  0xec   : > { %922 = vrot.lane.b32.xlu1 %v2868_v10, %s2734_s7  ;;  %920 = vrot.lane.b32.xlu0 %v2871_v11, %s2734_s7  ;;  %v1534_v10 = vsel %vm1512_vm0, %v3194_v61, %v3161_v56  ;;  %v1533_v11 = vsel %vm1512_vm0, %v3197_v41, %v3163_v3 }
  0xee   : > { %v3357_v8 = vpop.permute.xlu1 %682  ;;  %v3359_v63 = vpop.permute.xlu0 %680 }
  0xf0   : > { %926 = vrot.lane.b32.xlu1 %v2878_v12, %s2734_s7  ;;  %924 = vrot.lane.b32.xlu0 %v2881_v13, %s2734_s7 }
  0xf2   : > { %v3365_v9 = vpop.permute.xlu1 %686  ;;  %v3367_v48 = vpop.permute.xlu0 %684 }
  0xf4   : > { %930 = vrot.lane.b32.xlu1 %v2888_v14, %s2734_s7  ;;  %928 = vrot.lane.b32.xlu0 %v2891_v15, %s2734_s7  ;;  %v1536_v14 = vsel %vm1512_vm0, %v3208_v57, %v3175_v46  ;;  %v1535_v15 = vsel %vm1512_vm0, %v3211_v54, %v3177_v47 }
  0xf6   : > { %v691_v12 = vpop.permute.xlu1 %690  ;;  %v689_v13 = vpop.permute.xlu0 %688 }
  0xf7   : > { %v3380_v49 = vsel %vm1545_vm1, %v1534_v10, %v691_v12  ;;  %v3383_v28 = vsel %vm1545_vm1, %v1533_v11, %v689_v13  ;;  %v4427_v10 = vld [vmem:[#allocation43_spill] sm:$0xff]  ;;  %v4428_v12 = vld [vmem:[#allocation38_spill] sm:$0xff]  ;;  %v4429_v13 = vld [vmem:[#allocation44_spill] sm:$0xff] }
  0xf8   : > { %936 = vrot.lane.b32.xlu1 %v2908_v19, %s2734_s7  ;;  %932 = vrot.lane.b32.xlu0 %v2899_v17, %s2734_s7  ;;  %v1538_v17 = vsel %vm1512_vm0, %v3222_v55, %v3189_v30  ;;  %v1537_v19 = vsel %vm1512_vm0, %v3225_v22, %v3191_v1  ;;  %v4424_v30 = vld [vmem:[#allocation36_spill] sm:$0xff] }
  0xf9   : > { %v1539_v1 = vsel %vm1512_vm0, %v3237_v20, %v4424_v30  ;;  %v1778_v30 = vld [vmem:[%s4335_s1 + $0x10] sm:$0xff] }
  0xfa   : > { %v695_v56 = vpop.permute.xlu1 %694  ;;  %v693_v3 = vpop.permute.xlu0 %692 }
  0xfb   : > { %v3396_v0 = vsel %vm1545_vm1, %v1536_v14, %v695_v56  ;;  %v3399_v2 = vsel %vm1545_vm1, %v1535_v15, %v693_v3  ;;  %v1541_v14 = vsel %vm1512_vm0, %v4429_v13, %v4428_v12 }
  0xfc   : > { %1032 = vrot.lane.b32.xlu1 %v2958_v35, %s2735_s8  ;;  %938 = vrot.lane.b32.xlu0 %v2905_v18, %s2734_s7  ;;  %v4423_v18 = vld [vmem:[#allocation35_spill] sm:$0xff] }
  0xfd   : > { %v1540_v35 = vsel %vm1512_vm0, %v3234_v53, %v4423_v18  ;;  %v4430_v18 = vld [vmem:[#allocation39_spill] sm:$0xff] }
  0xfe   : > { %v699_v46 = vpop.permute.xlu1 %698  ;;  %v697_v47 = vpop.permute.xlu0 %696 }
  0xff   : > { %v3412_v31 = vsel %vm1545_vm1, %v1538_v17, %v699_v46  ;;  %v3415_v32 = vsel %vm1545_vm1, %v1537_v19, %v697_v47  ;;  %v1779_v47 = vld [vmem:[%s4335_s1 + $0x18] sm:$0xff] }
 0x100   : > { %1034 = vrot.lane.b32.xlu1 %v2955_v34, %s2735_s8  ;;  %1064 = vrot.lane.b32.xlu0 %v3011_v51, %s2735_s8  ;;  %v4425_v34 = vld [vmem:[#allocation14_spill] sm:$0xff]  ;;  %v4426_v51 = vld [vmem:[#allocation37_spill] sm:$0xff] }
 0x101   : > { %v1542_v11 = vsel %vm1512_vm0, %v4427_v10, %v4426_v51 }
 0x102   : > { %v703_v25 = vpop.permute.xlu1 %702  ;;  %v701_v42 = vpop.permute.xlu0 %700 }
 0x103   : > { %v3428_v38 = vsel %vm1545_vm1, %v1540_v35, %v703_v25  ;;  %v3431_v50 = vsel %vm1545_vm1, %v1539_v1, %v701_v42  ;;  %v1776_v42 = vld [vmem:[%s4335_s1] sm:$0xff] }
 0x104   : > { %1160 = vrot.lane.b32.xlu1 %v3093_v40, %s2736_s9  ;;  %1066 = vrot.lane.b32.xlu0 %v4425_v34, %s2735_s8  ;;  %v1780_v40 = vld [vmem:[%s4335_s1 + $0x20] sm:$0xf] }
 0x105   : > { %2520 = vmatprep.subr.msk.mxu0 %vm1885_vm2, %v1780_v40  ;;  %2578 = vmatprep.subr.msk.mxu1 %vm1885_vm2, %v1780_v40 }
 0x106   : > { %v707_v15 = vpop.permute.xlu1 %706  ;;  %v705_v56 = vpop.permute.xlu0 %704  ;;  %2521 = vmatpush3.msk.msra.mxu0 %vm1885_vm2, %v1780_v40  ;;  %2583 = vmatpush3.msk.msra.mxu1 %vm1885_vm2, %v1780_v40  ;;  %v4434_v40 = vld [vmem:[#allocation16_spill] sm:$0xff] }
 0x107   : > { %v3444_v3 = vsel %vm1545_vm1, %v1542_v11, %v707_v15  ;;  %v3447_v17 = vsel %vm1545_vm1, %v1541_v14, %v705_v56  ;;  %2522 = vmatprep.subr.mxu0 %v1779_v47  ;;  %2579 = vmatprep.subr.mxu1 %v1779_v47  ;;  %v4433_v11 = vld [vmem:[#allocation5_spill] sm:$0xff] }
 0x108   : > { %1162 = vrot.lane.b32.xlu1 %v3090_v33, %s2736_s9  ;;  %1192 = vrot.lane.b32.xlu0 %v3197_v41, %s2736_s9  ;;  %v4431_v41 = vld [vmem:[#allocation40_spill] sm:$0xff] }
 0x109   : > { %2523 = vmatpush3.msra.mxu0 %v1779_v47  ;;  %2584 = vmatpush3.msra.mxu1 %v1779_v47 }
 0x10a   : > { %v711_v19 = vpop.permute.xlu1 %710  ;;  %v709_v46 = vpop.permute.xlu0 %708  ;;  %2524 = vmatprep.subr.mxu0 %v1778_v30  ;;  %2580 = vmatprep.subr.mxu1 %v1778_v30 }
 0x10b   : > { %v3461_v33 = vsel %vm1545_vm1, %v4430_v18, %v711_v19  ;;  %v3465_v35 = vsel %vm1545_vm1, %v4431_v41, %v709_v46  ;;  %2525 = vmatpush3.msra.mxu0 %v1778_v30  ;;  %2585 = vmatpush3.msra.mxu1 %v1778_v30  ;;  %v4435_v19 = vld [vmem:[#allocation10_spill] sm:$0xff]  ;;  %v4436_v30 = vld [vmem:[#allocation9_spill] sm:$0xff] }
 0x10c   : > { %1288 = vrot.lane.b32.xlu1 %v2841_v5, %s2737_s21  ;;  %1194 = vrot.lane.b32.xlu0 %v3194_v61, %s2736_s9  ;;  %v1777_v5 = vld [vmem:[%s4335_s1 + $0x8] sm:$0xff] }
 0x10d   : > { %v4432_v61 = vld [vmem:[#allocation6_spill] sm:$0xff]  ;;  %2526 = vmatprep.subr.mxu0 %v1777_v5  ;;  %2581 = vmatprep.subr.mxu1 %v1777_v5 }
 0x10e   : > { %v3474_v1 = vpop.permute.xlu1 %778  ;;  %v3476_v25 = vpop.permute.xlu0 %776  ;;  %2527 = vmatpush3.msra.mxu0 %v1777_v5  ;;  %2586 = vmatpush3.msra.mxu1 %v1777_v5 }
 0x10f   : > { %2528 = vmatprep.subr.mxu0 %v1776_v42  ;;  %2582 = vmatprep.subr.mxu1 %v1776_v42 }
 0x110   : > { %940 = vrot.lane.b32.xlu1 %v4432_v61, %s2734_s7  ;;  %1320 = vrot.lane.b32.xlu0 %v4432_v61, %s2737_s21 }
 0x111   : > { %2529 = vmatpush3.msra.mxu0 %v1776_v42  ;;  %2587 = vmatpush3.msra.mxu1 %v1776_v42 }
 0x112   : > { %v3488_v34 = vpop.permute.xlu1 %782  ;;  %v3490_v51 = vpop.permute.xlu0 %780 }
 0x114   : > { %1322 = vrot.lane.b32.xlu1 %v4433_v11, %s2737_s21  ;;  %1290 = vrot.lane.b32.xlu0 %v2838_v4, %s2737_s21 }
 0x116   : > { %v787_v12 = vpop.permute.xlu1 %786  ;;  %v785_v14 = vpop.permute.xlu0 %784 }
 0x117   : > { %v3498_v15 = vsel %vm1578_vm3, %v3278_v36, %v787_v12  ;;  %v3502_v56 = vsel %vm1578_vm3, %v3281_v23, %v785_v14 }
 0x118   : > { %1448 = vrot.lane.b32.xlu1 %v4434_v40, %s2738_s6  ;;  %1416 = vrot.lane.b32.xlu0 %v4435_v19, %s2738_s6 }
 0x11a   : > { %v791_v4 = vpop.permute.xlu1 %790  ;;  %v789_v46 = vpop.permute.xlu0 %788 }
 0x11b   : > { %v3510_v47 = vsel %vm1578_vm3, %v3292_v39, %v791_v4  ;;  %v3514_v36 = vsel %vm1578_vm3, %v3295_v21, %v789_v46 }
 0x11c   : > { %1036 = vrot.lane.b32.xlu1 %v4435_v19, %s2735_s8  ;;  %942 = vrot.lane.b32.xlu0 %v4433_v11, %s2734_s7  ;;  %v4443_v19 = vld [vmem:[#allocation8_spill] sm:$0xff] }
 0x11e   : > { %v795_v23 = vpop.permute.xlu1 %794  ;;  %v793_v18 = vpop.permute.xlu0 %792 }
 0x11f   : > { %v3522_v41 = vsel %vm1578_vm3, %v3308_v16, %v795_v23  ;;  %v3526_v39 = vsel %vm1578_vm3, %v3311_v24, %v793_v18  ;;  %v4438_v24 = vld [vmem:[#allocation15_spill] sm:$0xff] }
 0x120   : > { %1418 = vrot.lane.b32.xlu1 %v4436_v30, %s2738_s6  ;;  %1068 = vrot.lane.b32.xlu0 %v4434_v40, %s2735_s8 }
 0x122   : > { %v799_v21 = vpop.permute.xlu1 %798  ;;  %v797_v5 = vpop.permute.xlu0 %796 }
 0x123   : > { %v3534_v61 = vsel %vm1578_vm3, %v3324_v37, %v799_v21  ;;  %v3538_v16 = vsel %vm1578_vm3, %v3327_v52, %v797_v5 }
 0x124   : > { %4437 = vst [vmem:[#allocation35_spill] sm:$0xff] %v3534_v61  ;;  %1038 = vrot.lane.b32.xlu1 %v4436_v30, %s2735_s8  ;;  %1450 = vrot.lane.b32.xlu0 %v4438_v24, %s2738_s6  ;;  %v4445_v30 = vld [vmem:[#allocation18_spill] sm:$0xff] }
 0x125   : > { %v4465_v61 = vld [vmem:[#allocation42_spill] sm:$0xff] }
 0x126   : > { %v803_v42 = vpop.permute.xlu1 %802  ;;  %v801_v11 = vpop.permute.xlu0 %800 }
 0x127   : > { %v3546_v12 = vsel %vm1578_vm3, %v3335_v26, %v803_v42  ;;  %v3550_v37 = vsel %vm1578_vm3, %v3339_v43, %v801_v11  ;;  %v4449_v11 = vld [vmem:[#allocation11_spill] sm:$0xff] }
 0x128   : > { %4439 = vst [vmem:[#allocation36_spill] sm:$0xff] %v3546_v12  ;;  %4440 = vst [vmem:[#allocation14_spill] sm:$0xff] %v3550_v37  ;;  %1164 = vrot.lane.b32.xlu1 %v3107_v45, %s2736_s9  ;;  %1070 = vrot.lane.b32.xlu0 %v4438_v24, %s2735_s8 }
 0x12a   : > { %v807_v52 = vpop.permute.xlu1 %806  ;;  %v805_v14 = vpop.permute.xlu0 %804 }
 0x12b   : > { %v3558_v40 = vsel %vm1578_vm3, %v3347_v27, %v807_v52  ;;  %v3562_v26 = vsel %vm1578_vm3, %v3351_v62, %v805_v14 }
 0x12c   : > { %4441 = vst [vmem:[#allocation37_spill] sm:$0xff] %v3558_v40  ;;  %4442 = vst [vmem:[#allocation43_spill] sm:$0xff] %v3562_v26  ;;  %1166 = vrot.lane.b32.xlu1 %v3104_v44, %s2736_s9  ;;  %1196 = vrot.lane.b32.xlu0 %v3211_v54, %s2736_s9 }
 0x12e   : > { %v3568_v45 = vpop.permute.xlu1 %810  ;;  %v3570_v43 = vpop.permute.xlu0 %808 }
 0x130   : > { %1292 = vrot.lane.b32.xlu1 %v2851_v7, %s2737_s21  ;;  %1198 = vrot.lane.b32.xlu0 %v3208_v57, %s2736_s9  ;;  %v4444_v57 = vld [vmem:[#allocation7_spill] sm:$0xff] }
 0x132   : > { %v3576_v27 = vpop.permute.xlu1 %814  ;;  %v3578_v62 = vpop.permute.xlu0 %812 }
 0x134   : > { %944 = vrot.lane.b32.xlu1 %v4443_v19, %s2734_s7  ;;  %1324 = vrot.lane.b32.xlu0 %v4443_v19, %s2737_s21 }
 0x136   : > { %v819_v54 = vpop.permute.xlu1 %818  ;;  %v817_v44 = vpop.permute.xlu0 %816 }
 0x137   : > { %v3586_v4 = vsel %vm1578_vm3, %v3380_v49, %v819_v54  ;;  %v3590_v7 = vsel %vm1578_vm3, %v3383_v28, %v817_v44  ;;  %v4446_v28 = vld [vmem:[#allocation12_spill] sm:$0xff] }
 0x138   : > { %1326 = vrot.lane.b32.xlu1 %v4444_v57, %s2737_s21  ;;  %1294 = vrot.lane.b32.xlu0 %v2848_v6, %s2737_s21 }
 0x13a   : > { %v823_v46 = vpop.permute.xlu1 %822  ;;  %v821_v23 = vpop.permute.xlu0 %820 }
 0x13b   : > { %v3598_v18 = vsel %vm1578_vm3, %v3396_v0, %v823_v46  ;;  %v3602_v49 = vsel %vm1578_vm3, %v3399_v2, %v821_v23 }
 0x13c   : > { %1452 = vrot.lane.b32.xlu1 %v4445_v30, %s2738_s6  ;;  %1420 = vrot.lane.b32.xlu0 %v4446_v28, %s2738_s6 }
 0x13e   : > { %v827_v21 = vpop.permute.xlu1 %826  ;;  %v825_v5 = vpop.permute.xlu0 %824 }
 0x13f   : > { %v3610_v6 = vsel %vm1578_vm3, %v3412_v31, %v827_v21  ;;  %v3614_v0 = vsel %vm1578_vm3, %v3415_v32, %v825_v5 }
 0x140   : > { %1040 = vrot.lane.b32.xlu1 %v4446_v28, %s2735_s8  ;;  %946 = vrot.lane.b32.xlu0 %v4444_v57, %s2734_s7 }
 0x142   : > { %v831_v2 = vpop.permute.xlu1 %830  ;;  %v829_v24 = vpop.permute.xlu0 %828 }
 0x143   : > { %v3622_v42 = vsel %vm1578_vm3, %v3428_v38, %v831_v2  ;;  %v3626_v31 = vsel %vm1578_vm3, %v3431_v50, %v829_v24  ;;  %v4452_v50 = vld [vmem:[#allocation17_spill] sm:$0xff]  ;;  %v4455_v2 = vld [vmem:[#allocation20_spill] sm:$0xff] }
 0x144   : > { %4447 = vst [vmem:[#allocation38_spill] sm:$0xff] %v3622_v42  ;;  %4448 = vst [vmem:[#allocation44_spill] sm:$0xff] %v3626_v31  ;;  %1422 = vrot.lane.b32.xlu1 %v4449_v11, %s2738_s6  ;;  %1072 = vrot.lane.b32.xlu0 %v4445_v30, %s2735_s8  ;;  %v4456_v24 = vld [vmem:[#allocation13_spill] sm:$0xff] }
 0x146   : > { %v835_v32 = vpop.permute.xlu1 %834  ;;  %v833_v52 = vpop.permute.xlu0 %832 }
 0x147   : > { %v3634_v14 = vsel %vm1578_vm3, %v3444_v3, %v835_v32  ;;  %v3638_v38 = vsel %vm1578_vm3, %v3447_v17, %v833_v52  ;;  %v2416_v52 = vld [vmem:[%s2821_s30 + $0x6a] sm:$0xff] }
 0x148   : > { %4450 = vst [vmem:[#allocation39_spill] sm:$0xff] %v3634_v14  ;;  %4451 = vst [vmem:[#allocation40_spill] sm:$0xff] %v3638_v38  ;;  %1042 = vrot.lane.b32.xlu1 %v4449_v11, %s2735_s8  ;;  %1454 = vrot.lane.b32.xlu0 %v4452_v50, %s2738_s6  ;;  %v2433_v14 = vld [vmem:[%s2821_s30 + $0x13a] sm:$0xff]  ;;  %v4462_v38 = vld [vmem:[#allocation22_spill] sm:$0xff] }
 0x14a   : > { %v839_v19 = vpop.permute.xlu1 %838  ;;  %v837_v54 = vpop.permute.xlu0 %836 }
 0x14b   : > { %v3646_v44 = vsel %vm1578_vm3, %v3461_v33, %v839_v19  ;;  %v3650_v3 = vsel %vm1578_vm3, %v3465_v35, %v837_v54  ;;  %v2383_v33 = vld [vmem:[%s2821_s30 + $0x61] sm:$0xff] }
 0x14c   : > { %4453 = vst [vmem:[#allocation6_spill] sm:$0xff] %v3646_v44  ;;  %4454 = vst [vmem:[#allocation5_spill] sm:$0xff] %v3650_v3  ;;  %1168 = vrot.lane.b32.xlu1 %v3119_v59, %s2736_s9  ;;  %1074 = vrot.lane.b32.xlu0 %v4452_v50, %s2735_s8  ;;  %v2305_v59 = vld [vmem:[%s2821_s30 + $0x121] sm:$0xff] }
 0x14e   : > { %v3656_v17 = vpop.permute.xlu1 %906  ;;  %v3658_v57 = vpop.permute.xlu0 %904 }
 0x150   : > { %1170 = vrot.lane.b32.xlu1 %v3116_v58, %s2736_s9  ;;  %1200 = vrot.lane.b32.xlu0 %v3225_v22, %s2736_s9  ;;  %v2400_v22 = vld [vmem:[%s2821_s30 + $0x129] sm:$0xff] }
 0x151   : > { %v2384_v58 = vld [vmem:[%s2821_s30 + $0x69] sm:$0xff] }
 0x152   : > { %v3665_v35 = vpop.permute.xlu1 %910  ;;  %v3667_v46 = vpop.permute.xlu0 %908 }
 0x154   : > { %1296 = vrot.lane.b32.xlu1 %v2383_v33, %s2737_s21  ;;  %1202 = vrot.lane.b32.xlu0 %v3222_v55, %s2736_s9 }
 0x156   : > { %v3673_v23 = vpop.permute.xlu1 %914  ;;  %v3675_v30 = vpop.permute.xlu0 %912 }
 0x158   : > { %948 = vrot.lane.b32.xlu1 %v2305_v59, %s2734_s7  ;;  %1328 = vrot.lane.b32.xlu0 %v2305_v59, %s2737_s21  ;;  %v4461_v59 = vld [vmem:[#allocation19_spill] sm:$0xff] }
 0x15a   : > { %v3681_v28 = vpop.permute.xlu1 %918  ;;  %v3683_v21 = vpop.permute.xlu0 %916 }
 0x15c   : > { %1330 = vrot.lane.b32.xlu1 %v2400_v22, %s2737_s21  ;;  %1298 = vrot.lane.b32.xlu0 %v2384_v58, %s2737_s21 }
 0x15e   : > { %v3687_v55 = vpop.permute.xlu1 %922  ;;  %v3689_v5 = vpop.permute.xlu0 %920 }
 0x160   : > { %1456 = vrot.lane.b32.xlu1 %v4455_v2, %s2738_s6  ;;  %1424 = vrot.lane.b32.xlu0 %v4456_v24, %s2738_s6 }
 0x162   : > { %v3695_v11 = vpop.permute.xlu1 %926  ;;  %v3697_v32 = vpop.permute.xlu0 %924 }
 0x163   : > { %4457 = vst [vmem:[#allocation16_spill] sm:$0xff] %v3695_v11 }
 0x164   : > { %1044 = vrot.lane.b32.xlu1 %v4456_v24, %s2735_s8  ;;  %950 = vrot.lane.b32.xlu0 %v2400_v22, %s2734_s7 }
 0x166   : > { %v3703_v50 = vpop.permute.xlu1 %930  ;;  %v3705_v19 = vpop.permute.xlu0 %928 }
 0x167   : > { %4458 = vst [vmem:[#allocation10_spill] sm:$0xff] %v3703_v50  ;;  %4459 = vst [vmem:[#allocation9_spill] sm:$0xff] %v3705_v19  ;;  %v4463_v19 = vld [vmem:[#allocation28_spill] sm:$0xff] }
 0x168   : > { %1426 = vrot.lane.b32.xlu1 %v2416_v52, %s2738_s6  ;;  %1076 = vrot.lane.b32.xlu0 %v4455_v2, %s2735_s8 }
 0x16a   : > { %v937_v54 = vpop.permute.xlu1 %936  ;;  %v3710_v33 = vpop.permute.xlu0 %932 }
 0x16b   : > { %4460 = vst [vmem:[#allocation15_spill] sm:$0xff] %v3710_v33 }
 0x16c   : > { %1046 = vrot.lane.b32.xlu1 %v2416_v52, %s2735_s8  ;;  %1458 = vrot.lane.b32.xlu0 %v4461_v59, %s2738_s6  ;;  %v2385_v52 = vld [vmem:[%s2821_s30 + $0x79] sm:$0xff] }
 0x16e   : > { %v1033_v22 = vpop.permute.xlu1 %1032  ;;  %v3715_v58 = vpop.permute.xlu0 %938 }
 0x170   : > { %1172 = vrot.lane.b32.xlu1 %v3137_v60, %s2736_s9  ;;  %1078 = vrot.lane.b32.xlu0 %v4461_v59, %s2735_s8  ;;  %v2307_v60 = vld [vmem:[%s2821_s30 + $0x139] sm:$0xff] }
 0x172   : > { %v3721_v2 = vpop.permute.xlu1 %1034  ;;  %v1065_v24 = vpop.permute.xlu0 %1064 }
 0x174   : > { %1174 = vrot.lane.b32.xlu1 %v3134_v29, %s2736_s9  ;;  %1204 = vrot.lane.b32.xlu0 %v3237_v20, %s2736_s9  ;;  %v2402_v20 = vld [vmem:[%s2821_s30 + $0x141] sm:$0xff] }
 0x175   : > { %v2386_v29 = vld [vmem:[%s2821_s30 + $0x81] sm:$0xff] }
 0x176   : > { %v1161_v40 = vpop.permute.xlu1 %1160  ;;  %v3728_v44 = vpop.permute.xlu0 %1066 }
 0x178   : > { %1300 = vrot.lane.b32.xlu1 %v2385_v52, %s2737_s21  ;;  %1206 = vrot.lane.b32.xlu0 %v3234_v53, %s2736_s9  ;;  %v198_v52 = vld [vmem:[%s2821_s30] sm:$0xff] }
 0x179   : > { %v2417_v53 = vld [vmem:[%s2821_s30 + $0x7a] sm:$0xff]  ;;  %v1513_v37 = vsel %vm1512_vm0, %v198_v52, %v4462_v38 }
 0x17a   : > { %v3734_v59 = vpop.permute.xlu1 %1162  ;;  %v1193_v3 = vpop.permute.xlu0 %1192 }
 0x17c   : > { %952 = vrot.lane.b32.xlu1 %v2307_v60, %s2734_s7  ;;  %1332 = vrot.lane.b32.xlu0 %v2307_v60, %s2737_s21  ;;  %v4464_v60 = vld [vmem:[#allocation32_spill] sm:$0xff] }
 0x17d   : > { %v1529_v42 = vsel %vm1512_vm0, %v4464_v60, %v4463_v19 }
 0x17e   : > { %v1289_v26 = vpop.permute.xlu1 %1288  ;;  %v3740_v33 = vpop.permute.xlu0 %1194  ;;  %v1562_v11 = vsel %vm1545_vm1, %v1529_v42, %v3359_v63 }
 0x17f   : > { %v1595_v19 = vsel %vm1578_vm3, %v1562_v11, %v3570_v43  ;;  %v2418_v11 = vld [vmem:[%s2821_s30 + $0x82] sm:$0xff] }
 0x180   : > { %1334 = vrot.lane.b32.xlu1 %v2402_v20, %s2737_s21  ;;  %1302 = vrot.lane.b32.xlu0 %v2386_v29, %s2737_s21  ;;  %v1546_v29 = vsel %vm1545_vm1, %v1513_v37, %v4465_v61  ;;  %v1628_v61 = vsel %vm1611_vm4, %v1595_v19, %v937_v54 }
 0x181   : > { %v1579_v38 = vsel %vm1578_vm3, %v1546_v29, %v3476_v25  ;;  %v1661_v63 = vsel %vm1644_vm5, %v1628_v61, %v1065_v24  ;;  %v199_v25 = vld [vmem:[%s2821_s30 + $0x8] sm:$0xff] }
 0x182   : > { %v3747_v12 = vpop.permute.xlu1 %940  ;;  %v1321_v50 = vpop.permute.xlu0 %1320  ;;  %v1612_v31 = vsel %vm1611_vm4, %v1579_v38, %v3658_v57  ;;  %v1694_v42 = vsel %vm1677_vm6, %v1661_v63, %v1193_v3  ;;  %v2434_v3 = vld [vmem:[%s2821_s30 + $0x142] sm:$0xff]  ;;  %v4469_v63 = vld [vmem:[#allocation31_spill] sm:$0xff] }
 0x183   : > { %v1645_v37 = vsel %vm1644_vm5, %v1612_v31, %v1033_v22  ;;  %v1727_v54 = vsel %vm1710_vm7, %v1694_v42, %v1321_v50  ;;  %v2355_v42 = vld [vmem:[%s2821_s30 + $0x90] sm:$0xff] }
 0x184   : > { %1460 = vrot.lane.b32.xlu1 %v2433_v14, %s2738_s6  ;;  %1428 = vrot.lane.b32.xlu0 %v2417_v53, %s2738_s6  ;;  %v1678_v43 = vsel %vm1677_vm6, %v1645_v37, %v1161_v40  ;;  %v4467_v40 = vld [vmem:[#allocation41_spill] sm:$0xff]  ;;  %v4468_v37 = vld [vmem:[#allocation27_spill] sm:$0xff] }
 0x185   : > { %v1711_v57 = vsel %vm1710_vm7, %v1678_v43, %v1289_v26 }
 0x186   : > { %v1323_v52 = vpop.permute.xlu1 %1322  ;;  %v1291_v60 = vpop.permute.xlu0 %1290 }
 0x188   : > { %1048 = vrot.lane.b32.xlu1 %v2417_v53, %s2735_s8  ;;  %954 = vrot.lane.b32.xlu0 %v2402_v20, %s2734_s7  ;;  %v4466_v20 = vld [vmem:[#allocation24_spill] sm:$0xff] }
 0x189   : > { %v1514_v53 = vsel %vm1512_vm0, %v199_v25, %v4466_v20 }
 0x18a   : > { %v1449_v29 = vpop.permute.xlu1 %1448  ;;  %v1417_v31 = vpop.permute.xlu0 %1416  ;;  %v1547_v26 = vsel %vm1545_vm1, %v1514_v53, %v4467_v40  ;;  %v2388_v40 = vld [vmem:[%s2821_s30 + $0x99] sm:$0xff] }
 0x18b   : > { %v1744_v22 = vsel %vm1743_vm8, %v1711_v57, %v1417_v31  ;;  %v1760_v24 = vsel %vm1743_vm8, %v1727_v54, %v1449_v29  ;;  %v1580_v50 = vsel %vm1578_vm3, %v1547_v26, %v3474_v1 }
 0x18c   : > { %1430 = vrot.lane.b32.xlu1 %v2418_v11, %s2738_s6  ;;  %1080 = vrot.lane.b32.xlu0 %v2433_v14, %s2735_s8  ;;  %v1613_v61 = vsel %vm1611_vm4, %v1580_v50, %v3656_v17  ;;  %v1530_v14 = vsel %vm1512_vm0, %v4469_v63, %v4468_v37  ;;  %v2435_v50 = vld [vmem:[%s2821_s30 + $0x152] sm:$0xff]  ;;  %v4470_v63 = vld [vmem:[#allocation21_spill] sm:$0xff] }
 0x18d   : > { %2530 = vmatprep.mubr.msk.f32.mxu0 %vm1788_vm9, %v1744_v22  ;;  %2554 = vmatprep.mubr.msk.f32.mxu1 %vm1788_vm9, %v1760_v24  ;;  %v1646_v25 = vsel %vm1644_vm5, %v1613_v61, %v3721_v2  ;;  %v1563_v1 = vsel %vm1545_vm1, %v1530_v14, %v3357_v8  ;;  %v2419_v61 = vld [vmem:[%s2821_s30 + $0x92] sm:$0xff]  ;;  %v4471_v14 = vld [vmem:[#allocation25_spill] sm:$0xff] }
 0x18e   : > { %v1037_v38 = vpop.permute.xlu1 %1036  ;;  %v3790_v19 = vpop.permute.xlu0 %942  ;;  %v1679_v43 = vsel %vm1677_vm6, %v1646_v25, %v3734_v59  ;;  %v1596_v17 = vsel %vm1578_vm3, %v1563_v1, %v3568_v45  ;;  %v2356_v59 = vld [vmem:[%s2821_s30 + $0x98] sm:$0xff]  ;;  %v1515_v25 = vsel %vm1512_vm0, %v4471_v14, %v4470_v63  ;;  %v4472_v1 = vld [vmem:[#allocation30_spill] sm:$0xff] }
 0x18f   : > { %v1712_v57 = vsel %vm1710_vm7, %v1679_v43, %v1291_v60  ;;  %v1629_v2 = vsel %vm1611_vm4, %v1596_v17, %v3715_v58  ;;  %v4473_v43 = vld [vmem:[#allocation34_spill] sm:$0xff] }
 0x190   : > { %1050 = vrot.lane.b32.xlu1 %v2418_v11, %s2735_s8  ;;  %1462 = vrot.lane.b32.xlu0 %v2434_v3, %s2738_s6  ;;  %v1662_v8 = vsel %vm1644_vm5, %v1629_v2, %v3728_v44  ;;  %v4474_v17 = vld [vmem:[#allocation46_spill] sm:$0xff] }
 0x191   : > { %v1695_v45 = vsel %vm1677_vm6, %v1662_v8, %v3740_v33  ;;  %v2387_v33 = vld [vmem:[%s2821_s30 + $0x91] sm:$0xff] }
 0x192   : > { %v1419_v54 = vpop.permute.xlu1 %1418  ;;  %v1069_v29 = vpop.permute.xlu0 %1068  ;;  %v1728_v60 = vsel %vm1710_vm7, %v1695_v45, %v1323_v52  ;;  %v2309_v52 = vld [vmem:[%s2821_s30 + $0x151] sm:$0xff] }
 0x193   : > { %v1745_v11 = vsel %vm1743_vm8, %v1712_v57, %v1419_v54  ;;  %v1548_v57 = vsel %vm1545_vm1, %v1515_v25, %v4474_v17 }
 0x194   : > { %1176 = vrot.lane.b32.xlu1 %v2355_v42, %s2736_s9  ;;  %1082 = vrot.lane.b32.xlu0 %v2434_v3, %s2735_s8  ;;  %v1531_v42 = vsel %vm1512_vm0, %v4473_v43, %v4472_v1  ;;  %v1581_v2 = vsel %vm1578_vm3, %v1548_v57, %v3490_v51  ;;  %v4478_v1 = vld [vmem:[#allocation29_spill] sm:$0xff]  ;;  %v2357_v57 = vld [vmem:[%s2821_s30 + $0xa8] sm:$0xff] }
 0x195   : > { %2531 = vmatmul.mubr.msk.f32.vlgmr.msra.gmra.mxu0 %vm1788_vm9, %v1745_v11  ;;  %v1564_v54 = vsel %vm1545_vm1, %v1531_v42, %v3367_v48  ;;  %v4479_v43 = vld [vmem:[#allocation33_spill] sm:$0xff] }
 0x196   : > { %v3821_v31 = vpop.permute.xlu1 %1038  ;;  %v1451_v58 = vpop.permute.xlu0 %1450  ;;  %v1597_v11 = vsel %vm1578_vm3, %v1564_v54, %v3578_v62  ;;  %v2420_v62 = vld [vmem:[%s2821_s30 + $0x9a] sm:$0xff] }
 0x197   : > { %v1761_v44 = vsel %vm1743_vm8, %v1728_v60, %v1451_v58  ;;  %v1630_v60 = vsel %vm1611_vm4, %v1597_v11, %v3747_v12 }
 0x198   : > { %1178 = vrot.lane.b32.xlu1 %v2356_v59, %s2736_s9  ;;  %1208 = vrot.lane.b32.xlu0 %v4429_v13, %s2736_s9  ;;  %v2404_v13 = vld [vmem:[%s2821_s30 + $0x159] sm:$0xff]  ;;  %v1614_v59 = vsel %vm1611_vm4, %v1581_v2, %v3667_v46 }
 0x199   : > { %2555 = vmatmul.mubr.msk.f32.vlgmr.msra.gmra.mxu1 %vm1788_vm9, %v1761_v44  ;;  %v1647_v58 = vsel %vm1644_vm5, %v1614_v59, %v1037_v38  ;;  %v1663_v44 = vsel %vm1644_vm5, %v1630_v60, %v1069_v29 }
 0x19a   : > { %v1165_v22 = vpop.permute.xlu1 %1164  ;;  %v3829_v24 = vpop.permute.xlu0 %1070 }
 0x19b   : > { %v1680_v48 = vsel %vm1677_vm6, %v1647_v58, %v1165_v22  ;;  %v4477_v22 = vld [vmem:[#allocation45_spill] sm:$0xff] }
 0x19c   : > { %1304 = vrot.lane.b32.xlu1 %v2387_v33, %s2737_s21  ;;  %1210 = vrot.lane.b32.xlu0 %v4427_v10, %s2736_s9 }
 0x19e   : > { %v1167_v20 = vpop.permute.xlu1 %1166  ;;  %v1197_v53 = vpop.permute.xlu0 %1196 }
 0x19f   : > { %v1696_v51 = vsel %vm1677_vm6, %v1663_v44, %v1197_v53 }
 0x1a0   : > { %956 = vrot.lane.b32.xlu1 %v2309_v52, %s2734_s7  ;;  %1336 = vrot.lane.b32.xlu0 %v2309_v52, %s2737_s21 }
 0x1a2   : > { %v1293_v26 = vpop.permute.xlu1 %1292  ;;  %v1199_v3 = vpop.permute.xlu0 %1198 }
 0x1a3   : > { %v1713_v33 = vsel %vm1710_vm7, %v1680_v48, %v1293_v26  ;;  %v2436_v26 = vld [vmem:[%s2821_s30 + $0x15a] sm:$0xff] }
 0x1a4   : > { %1338 = vrot.lane.b32.xlu1 %v2404_v13, %s2737_s21  ;;  %1306 = vrot.lane.b32.xlu0 %v2388_v40, %s2737_s21  ;;  %v4475_v40 = vld [vmem:[#allocation23_spill] sm:$0xff] }
 0x1a6   : > { %v3843_v37 = vpop.permute.xlu1 %944  ;;  %v1325_v10 = vpop.permute.xlu0 %1324 }
 0x1a7   : > { %v1729_v46 = vsel %vm1710_vm7, %v1696_v51, %v1325_v10 }
 0x1a8   : > { %1464 = vrot.lane.b32.xlu1 %v2435_v50, %s2738_s6  ;;  %1432 = vrot.lane.b32.xlu0 %v2419_v61, %s2738_s6 }
 0x1aa   : > { %v1327_v8 = vpop.permute.xlu1 %1326  ;;  %v1295_v45 = vpop.permute.xlu0 %1294 }
 0x1ac   : > { %1052 = vrot.lane.b32.xlu1 %v2419_v61, %s2735_s8  ;;  %958 = vrot.lane.b32.xlu0 %v2404_v13, %s2734_s7  ;;  %v4476_v61 = vld [vmem:[#allocation26_spill] sm:$0xff] }
 0x1ad   : > { %v1516_v13 = vsel %vm1512_vm0, %v4476_v61, %v4475_v40  ;;  %v2421_v40 = vld [vmem:[%s2821_s30 + $0xaa] sm:$0xff] }
 0x1ae   : > { %v1453_v52 = vpop.permute.xlu1 %1452  ;;  %v1421_v12 = vpop.permute.xlu0 %1420  ;;  %v1549_v53 = vsel %vm1545_vm1, %v1516_v13, %v4477_v22 }
 0x1af   : > { %v1762_v38 = vsel %vm1743_vm8, %v1729_v46, %v1453_v52  ;;  %v1746_v29 = vsel %vm1743_vm8, %v1713_v33, %v1421_v12  ;;  %v1582_v10 = vsel %vm1578_vm3, %v1549_v53, %v3488_v34  ;;  %v2406_v46 = vld [vmem:[%s2821_s30 + $0x171] sm:$0xff] }
 0x1b0   : > { %1434 = vrot.lane.b32.xlu1 %v2420_v62, %s2738_s6  ;;  %1084 = vrot.lane.b32.xlu0 %v2435_v50, %s2735_s8  ;;  %v1615_v25 = vsel %vm1611_vm4, %v1582_v10, %v3665_v35  ;;  %v1532_v50 = vsel %vm1512_vm0, %v4479_v43, %v4478_v1  ;;  %v2390_v52 = vld [vmem:[%s2821_s30 + $0xb1] sm:$0xff]  ;;  %v1632_v10 = vsel %vm1611_vm4, %v3590_v7, %v3843_v37 }
 0x1b1   : > { %2533 = vmatprep.mubr.msk.f32.mxu0 %vm1788_vm9, %v1746_v29  ;;  %2557 = vmatprep.mubr.msk.f32.mxu1 %vm1788_vm9, %v1762_v38  ;;  %v1648_v42 = vsel %vm1644_vm5, %v1615_v25, %v3821_v31  ;;  %v1565_v34 = vsel %vm1545_vm1, %v1532_v50, %v3365_v9  ;;  %v2437_v29 = vld [vmem:[%s2821_s30 + $0x16a] sm:$0xff] }
 0x1b2   : > { %v1041_v63 = vpop.permute.xlu1 %1040  ;;  %v3888_v14 = vpop.permute.xlu0 %946  ;;  %v1681_v17 = vsel %vm1677_vm6, %v1648_v42, %v1167_v20  ;;  %v1598_v35 = vsel %vm1578_vm3, %v1565_v34, %v3576_v27  ;;  %v2358_v20 = vld [vmem:[%s2821_s30 + $0xb0] sm:$0xff] }
 0x1b3   : > { %v1714_v54 = vsel %vm1710_vm7, %v1681_v17, %v1295_v45  ;;  %v1631_v31 = vsel %vm1611_vm4, %v1598_v35, %v3790_v19  ;;  %v2373_v45 = vld [vmem:[%s2821_s30 + $0x168] sm:$0xff]  ;;  %v2422_v42 = vld [vmem:[%s2821_s30 + $0xb2] sm:$0xff] }
 0x1b4   : > { %1054 = vrot.lane.b32.xlu1 %v2420_v62, %s2735_s8  ;;  %1466 = vrot.lane.b32.xlu0 %v2436_v26, %s2738_s6  ;;  %v1664_v9 = vsel %vm1644_vm5, %v1631_v31, %v3829_v24  ;;  %v2389_v24 = vld [vmem:[%s2821_s30 + $0xa9] sm:$0xff]  ;;  %v2438_v17 = vld [vmem:[%s2821_s30 + $0x172] sm:$0xff] }
 0x1b5   : > { %v1697_v27 = vsel %vm1677_vm6, %v1664_v9, %v1199_v3  ;;  %v2374_v3 = vld [vmem:[%s2821_s30 + $0x170] sm:$0xff]  ;;  %v2359_v31 = vld [vmem:[%s2821_s30 + $0xc0] sm:$0xff] }
 0x1b6   : > { %v1423_v2 = vpop.permute.xlu1 %1422  ;;  %v1073_v11 = vpop.permute.xlu0 %1072  ;;  %v1730_v19 = vsel %vm1710_vm7, %v1697_v27, %v1327_v8  ;;  %v2311_v8 = vld [vmem:[%s2821_s30 + $0x169] sm:$0xff] }
 0x1b7   : > { %v1747_v59 = vsel %vm1743_vm8, %v1714_v54, %v1423_v2  ;;  %v1665_v1 = vsel %vm1644_vm5, %v1632_v10, %v1073_v11  ;;  %v1617_v54 = vsel %vm1611_vm4, %v3498_v15, %v3673_v23  ;;  %v1618_v10 = vsel %vm1611_vm4, %v3514_v36, %v3683_v21 }
 0x1b8   : > { %1180 = vrot.lane.b32.xlu1 %v2357_v57, %s2736_s9  ;;  %1086 = vrot.lane.b32.xlu0 %v2436_v26, %s2735_s8  ;;  %v1616_v26 = vsel %vm1611_vm4, %v3502_v56, %v3675_v30 }
 0x1b9   : > { %2534 = vmatmul.mubr.msk.f32.gmra.mxu0 %vm1788_vm9, %v1747_v59  ;;  %v1649_v25 = vsel %vm1644_vm5, %v1616_v26, %v1041_v63 }
 0x1ba   : > { %v1043_v60 = vpop.permute.xlu1 %1042  ;;  %v1455_v58 = vpop.permute.xlu0 %1454 }
 0x1bb   : > { %v1763_v44 = vsel %vm1743_vm8, %v1730_v19, %v1455_v58  ;;  %v1650_v2 = vsel %vm1644_vm5, %v1617_v54, %v1043_v60  ;;  %v2360_v19 = vld [vmem:[%s2821_s30 + $0xc8] sm:$0xff]  ;;  %v2375_v60 = vld [vmem:[%s2821_s30 + $0x180] sm:$0xff] }
 0x1bc   : > { %1182 = vrot.lane.b32.xlu1 %v2358_v20, %s2736_s9  ;;  %1212 = vrot.lane.b32.xlu0 %v2373_v45, %s2736_s9  ;;  %v1633_v20 = vsel %vm1611_vm4, %v3586_v4, %v3888_v14 }
 0x1bd   : > { %2558 = vmatmul.mubr.msk.f32.gmra.mxu1 %vm1788_vm9, %v1763_v44 }
 0x1be   : > { %v1169_v48 = vpop.permute.xlu1 %1168  ;;  %v1075_v51 = vpop.permute.xlu0 %1074 }
 0x1bf   : > { %v1682_v43 = vsel %vm1677_vm6, %v1649_v25, %v1169_v48  ;;  %v1666_v23 = vsel %vm1644_vm5, %v1633_v20, %v1075_v51  ;;  %v2361_v20 = vld [vmem:[%s2821_s30 + $0xd8] sm:$0xff] }
 0x1c0   : > { %1308 = vrot.lane.b32.xlu1 %v2389_v24, %s2737_s21  ;;  %1214 = vrot.lane.b32.xlu0 %v2374_v3, %s2736_s9  ;;  %v2391_v24 = vld [vmem:[%s2821_s30 + $0xc1] sm:$0xff] }
 0x1c1   : > { %v2376_v3 = vld [vmem:[%s2821_s30 + $0x188] sm:$0xff] }
 0x1c2   : > { %v1171_v62 = vpop.permute.xlu1 %1170  ;;  %v1201_v33 = vpop.permute.xlu0 %1200 }
 0x1c3   : > { %v1698_v50 = vsel %vm1677_vm6, %v1665_v1, %v1201_v33  ;;  %v1683_v11 = vsel %vm1677_vm6, %v1650_v2, %v1171_v62 }
 0x1c4   : > { %960 = vrot.lane.b32.xlu1 %v2311_v8, %s2734_s7  ;;  %1340 = vrot.lane.b32.xlu0 %v2311_v8, %s2737_s21  ;;  %v2313_v8 = vld [vmem:[%s2821_s30 + $0x181] sm:$0xff] }
 0x1c6   : > { %v1297_v12 = vpop.permute.xlu1 %1296  ;;  %v1203_v38 = vpop.permute.xlu0 %1202 }
 0x1c7   : > { %v1715_v56 = vsel %vm1710_vm7, %v1682_v43, %v1297_v12  ;;  %v1699_v45 = vsel %vm1677_vm6, %v1666_v23, %v1203_v38 }
 0x1c8   : > { %1342 = vrot.lane.b32.xlu1 %v2406_v46, %s2737_s21  ;;  %1310 = vrot.lane.b32.xlu0 %v2390_v52, %s2737_s21  ;;  %v2392_v52 = vld [vmem:[%s2821_s30 + $0xc9] sm:$0xff] }
 0x1ca   : > { %v3935_v61 = vpop.permute.xlu1 %948  ;;  %v1329_v13 = vpop.permute.xlu0 %1328 }
 0x1cb   : > { %v1731_v30 = vsel %vm1710_vm7, %v1698_v50, %v1329_v13  ;;  %v1634_v25 = vsel %vm1611_vm4, %v3602_v49, %v3935_v61 }
 0x1cc   : > { %1468 = vrot.lane.b32.xlu1 %v2437_v29, %s2738_s6  ;;  %1436 = vrot.lane.b32.xlu0 %v2421_v40, %s2738_s6 }
 0x1ce   : > { %v1331_v22 = vpop.permute.xlu1 %1330  ;;  %v1299_v53 = vpop.permute.xlu0 %1298 }
 0x1cf   : > { %v1716_v59 = vsel %vm1710_vm7, %v1683_v11, %v1299_v53  ;;  %v1732_v58 = vsel %vm1710_vm7, %v1699_v45, %v1331_v22  ;;  %v2378_v45 = vld [vmem:[%s2821_s30 + $0x1a0] sm:$0xff] }
 0x1d0   : > { %1056 = vrot.lane.b32.xlu1 %v2421_v40, %s2735_s8  ;;  %962 = vrot.lane.b32.xlu0 %v2406_v46, %s2734_s7  ;;  %v2408_v46 = vld [vmem:[%s2821_s30 + $0x189] sm:$0xff] }
 0x1d1   : > { %v2423_v40 = vld [vmem:[%s2821_s30 + $0xc2] sm:$0xff] }
 0x1d2   : > { %v1457_v34 = vpop.permute.xlu1 %1456  ;;  %v1425_v7 = vpop.permute.xlu0 %1424 }
 0x1d3   : > { %v1764_v37 = vsel %vm1743_vm8, %v1731_v30, %v1457_v34  ;;  %v1748_v63 = vsel %vm1743_vm8, %v1715_v56, %v1425_v7  ;;  %v2440_v34 = vld [vmem:[%s2821_s30 + $0x18a] sm:$0xff] }
 0x1d4   : > { %1438 = vrot.lane.b32.xlu1 %v2422_v42, %s2738_s6  ;;  %1088 = vrot.lane.b32.xlu0 %v2437_v29, %s2735_s8  ;;  %v2439_v29 = vld [vmem:[%s2821_s30 + $0x182] sm:$0xff]  ;;  %v2424_v7 = vld [vmem:[%s2821_s30 + $0xca] sm:$0xff] }
 0x1d5   : > { %2536 = vmatprep.mubr.msk.f32.mxu0 %vm1788_vm9, %v1748_v63  ;;  %2560 = vmatprep.mubr.msk.f32.mxu1 %vm1788_vm9, %v1764_v37 }
 0x1d6   : > { %v1045_v57 = vpop.permute.xlu1 %1044  ;;  %v3961_v35 = vpop.permute.xlu0 %950 }
 0x1d7   : > { %v1651_v1 = vsel %vm1644_vm5, %v1618_v10, %v1045_v57 }
 0x1d8   : > { %1058 = vrot.lane.b32.xlu1 %v2422_v42, %s2735_s8  ;;  %1470 = vrot.lane.b32.xlu0 %v2438_v17, %s2738_s6 }
 0x1da   : > { %v1427_v9 = vpop.permute.xlu1 %1426  ;;  %v1077_v27 = vpop.permute.xlu0 %1076 }
 0x1db   : > { %v1749_v15 = vsel %vm1743_vm8, %v1716_v59, %v1427_v9  ;;  %v1667_v43 = vsel %vm1644_vm5, %v1634_v25, %v1077_v27  ;;  %v1635_v59 = vsel %vm1611_vm4, %v3598_v18, %v3961_v35  ;;  %v2377_v27 = vld [vmem:[%s2821_s30 + $0x198] sm:$0xff] }
 0x1dc   : > { %1184 = vrot.lane.b32.xlu1 %v2359_v31, %s2736_s9  ;;  %1090 = vrot.lane.b32.xlu0 %v2438_v17, %s2735_s8  ;;  %v1619_v17 = vsel %vm1611_vm4, %v3510_v47, %v3681_v28 }
 0x1dd   : > { %2537 = vmatmul.mubr.msk.f32.gmra.mxu0 %vm1788_vm9, %v1749_v15 }
 0x1de   : > { %v1047_v4 = vpop.permute.xlu1 %1046  ;;  %v1459_v14 = vpop.permute.xlu0 %1458 }
 0x1df   : > { %v1765_v44 = vsel %vm1743_vm8, %v1732_v58, %v1459_v14  ;;  %v1652_v57 = vsel %vm1644_vm5, %v1619_v17, %v1047_v4  ;;  %v2409_v4 = vld [vmem:[%s2821_s30 + $0x199] sm:$0xff] }
 0x1e0   : > { %1186 = vrot.lane.b32.xlu1 %v2360_v19, %s2736_s9  ;;  %1216 = vrot.lane.b32.xlu0 %v2375_v60, %s2736_s9  ;;  %v2362_v19 = vld [vmem:[%s2821_s30 + $0xe0] sm:$0xff] }
 0x1e1   : > { %2561 = vmatmul.mubr.msk.f32.gmra.mxu1 %vm1788_vm9, %v1765_v44  ;;  %v2393_v14 = vld [vmem:[%s2821_s30 + $0xd9] sm:$0xff] }
 0x1e2   : > { %v1173_v48 = vpop.permute.xlu1 %1172  ;;  %v1079_v51 = vpop.permute.xlu0 %1078 }
 0x1e3   : > { %v1684_v50 = vsel %vm1677_vm6, %v1651_v1, %v1173_v48  ;;  %v1668_v28 = vsel %vm1644_vm5, %v1635_v59, %v1079_v51  ;;  %v2394_v48 = vld [vmem:[%s2821_s30 + $0xe1] sm:$0xff] }
 0x1e4   : > { %1312 = vrot.lane.b32.xlu1 %v2391_v24, %s2737_s21  ;;  %1218 = vrot.lane.b32.xlu0 %v2376_v3, %s2736_s9  ;;  %v2410_v3 = vld [vmem:[%s2821_s30 + $0x1a1] sm:$0xff] }
 0x1e6   : > { %v1175_v62 = vpop.permute.xlu1 %1174  ;;  %v1205_v33 = vpop.permute.xlu0 %1204 }
 0x1e7   : > { %v1700_v42 = vsel %vm1677_vm6, %v1667_v43, %v1205_v33  ;;  %v1685_v54 = vsel %vm1677_vm6, %v1652_v57, %v1175_v62  ;;  %v2441_v62 = vld [vmem:[%s2821_s30 + $0x19a] sm:$0xff] }
 0x1e8   : > { %964 = vrot.lane.b32.xlu1 %v2313_v8, %s2734_s7  ;;  %1344 = vrot.lane.b32.xlu0 %v2313_v8, %s2737_s21  ;;  %v2425_v33 = vld [vmem:[%s2821_s30 + $0xda] sm:$0xff] }
 0x1ea   : > { %v1301_v12 = vpop.permute.xlu1 %1300  ;;  %v1207_v38 = vpop.permute.xlu0 %1206 }
 0x1eb   : > { %v1717_v36 = vsel %vm1710_vm7, %v1684_v50, %v1301_v12  ;;  %v1701_v9 = vsel %vm1677_vm6, %v1668_v28, %v1207_v38  ;;  %v2442_v12 = vld [vmem:[%s2821_s30 + $0x1a2] sm:$0xff] }
 0x1ec   : > { %1346 = vrot.lane.b32.xlu1 %v2408_v46, %s2737_s21  ;;  %1314 = vrot.lane.b32.xlu0 %v2392_v52, %s2737_s21  ;;  %v2426_v38 = vld [vmem:[%s2821_s30 + $0xe2] sm:$0xff]  ;;  %s185_s30 = sand.u32 1, %s2713_s13  }
 0x1ed   : > { %s4288_s15 = scalar_lea.sflag [#allocation3], %s185_s30 }
 0x1ee   : > { %v4001_v13 = vpop.permute.xlu1 %952  ;;  %v1333_v22 = vpop.permute.xlu0 %1332 }
 0x1ef   : > { %v1733_v21 = vsel %vm1710_vm7, %v1700_v42, %v1333_v22  ;;  %v1620_v22 = vsel %vm1611_vm4, %v3526_v39, %v3689_v5 }
 0x1f0   : > { %1472 = vrot.lane.b32.xlu1 %v2439_v29, %s2738_s6  ;;  %1440 = vrot.lane.b32.xlu0 %v2423_v40, %s2738_s6 }
 0x1f2   : > { %v1335_v53 = vpop.permute.xlu1 %1334  ;;  %v1303_v26 = vpop.permute.xlu0 %1302 }
 0x1f3   : > { %v1718_v2 = vsel %vm1710_vm7, %v1685_v54, %v1303_v26  ;;  %v1734_v18 = vsel %vm1710_vm7, %v1701_v9, %v1335_v53  ;;  %v1636_v53 = vsel %vm1611_vm4, %v3614_v0, %v4001_v13 }
 0x1f4   : > { %966 = vrot.lane.b32.xlu1 %v2408_v46, %s2734_s7  ;;  %934 = vrot.lane.b32.xlu0 %v2392_v52, %s2734_s7  ;;  %s2249_s7 = sshll.u32 %s185_s30, 8 }
 0x1f5   : > { %s4148_s10 = scalar_lea.vmem [#allocation2], %s2249_s7 }
 0x1f6   : > { %v1461_v56 = vpop.permute.xlu1 %1460  ;;  %v1429_v49 = vpop.permute.xlu0 %1428  ;;  %s2162_s18 = sshll.u32 %s4148_s10, 4  ;;  %s4282_s18 = int_to_ptr.vmem [resolvable:$true] %s2162_s18 }
 0x1f7   : > { %v1766_v61 = vsel %vm1743_vm8, %v1733_v21, %v1461_v56  ;;  %v1750_v30 = vsel %vm1743_vm8, %v1717_v36, %v1429_v49  ;;  %v1621_v21 = vsel %vm1611_vm4, %v3522_v41, %v3687_v55  ;;  %s2653_s26 = scalar_lea.vmem %s4282_s18, 4096  ;;  %p2660_p1 = scmp.lt.s32.totalorder %s4282_s18, %s2658_s28 }
 0x1f8   : > { %1092 = vrot.lane.b32.xlu1 %v2439_v29, %s2735_s8  ;;  %1060 = vrot.lane.b32.xlu0 %v2423_v40, %s2735_s8  ;;  %p2654_p12 = scmp.ne.s32.totalorder %s4282_s18, %s2653_s26  ;;  %p2661_p2 = scmp.lt.s32.totalorder %s2659_s29, %s2653_s26 }
 0x1f9   : > { %2539 = vmatprep.mubr.msk.f32.mxu0 %vm1788_vm9, %v1750_v30  ;;  %2563 = vmatprep.mubr.msk.f32.mxu1 %vm1788_vm9, %v1766_v61 }
 0x1fa   : > { %v1049_v37 = vpop.permute.xlu1 %1048  ;;  %v4027_v63 = vpop.permute.xlu0 %954  ;;  %p2655_p13 = pnand %p2654_p12, %p2801_p4  ;;  %p2662_p3 = por %p2661_p2, %p2660_p1 }
 0x1fb   : > { %v1653_v26 = vsel %vm1644_vm5, %v1620_v22, %v1049_v37 }
 0x1fc   : > { %1474 = vrot.lane.b32.xlu1 %v2440_v34, %s2738_s6  ;;  %1442 = vrot.lane.b32.xlu0 %v2424_v7, %s2738_s6  ;;  %p2656_p0 = pneg %p2655_p13 }
 0x1fe   : > { %v1431_v11 = vpop.permute.xlu1 %1430  ;;  %v1081_v31 = vpop.permute.xlu0 %1080  ;;  %p2663_p5 = pnand %p2662_p3, %p2656_p0 }
 0x1ff   : > { %v1751_v47 = vsel %vm1743_vm8, %v1718_v2, %v1431_v11  ;;  %v1669_v10 = vsel %vm1644_vm5, %v1636_v53, %v1081_v31 }
 0x200   : > { %1094 = vrot.lane.b32.xlu1 %v2440_v34, %s2735_s8  ;;  %1062 = vrot.lane.b32.xlu0 %v2424_v7, %s2735_s8  ;;  %v1637_v7 = vsel %vm1611_vm4, %v3610_v6, %v4027_v63 }
 0x201   : > { %2540 = vmatmul.mubr.msk.f32.gmra.mxu0 %vm1788_vm9, %v1751_v47 }
 0x202   : > { %v1051_v35 = vpop.permute.xlu1 %1050  ;;  %v1463_v15 = vpop.permute.xlu0 %1462 }
 0x203   : > { %v1767_v23 = vsel %vm1743_vm8, %v1734_v18, %v1463_v15  ;;  %v1654_v56 = vsel %vm1644_vm5, %v1621_v21, %v1051_v35  ;;  %v1622_v18 = vsel %vm1611_vm4, %v3538_v16, %v3697_v32  ;;  %v4480_v35 = vld [vmem:[#allocation44_spill] sm:$0xff] }
 0x204   : > { %1220 = vrot.lane.b32.xlu1 %v2377_v27, %s2736_s9  ;;  %1188 = vrot.lane.b32.xlu0 %v2361_v20, %s2736_s9 }
 0x205   : > { %2564 = vmatmul.mubr.msk.f32.gmra.mxu1 %vm1788_vm9, %v1767_v23 }
 0x206   : > { %v1177_v60 = vpop.permute.xlu1 %1176  ;;  %v1083_v58 = vpop.permute.xlu0 %1082 }
 0x207   : > { %v1686_v25 = vsel %vm1677_vm6, %v1653_v26, %v1177_v60  ;;  %v1670_v17 = vsel %vm1644_vm5, %v1637_v7, %v1083_v58 }
 0x208   : > { %1222 = vrot.lane.b32.xlu1 %v2378_v45, %s2736_s9  ;;  %1190 = vrot.lane.b32.xlu0 %v2362_v19, %s2736_s9 }
 0x20a   : > { %v1179_v44 = vpop.permute.xlu1 %1178  ;;  %v1209_v24 = vpop.permute.xlu0 %1208 }
 0x20b   : > { %v1702_v1 = vsel %vm1677_vm6, %v1669_v10, %v1209_v24  ;;  %v1687_v49 = vsel %vm1677_vm6, %v1654_v56, %v1179_v44 }
 0x20c   : > { %1348 = vrot.lane.b32.xlu1 %v2409_v4, %s2737_s21  ;;  %1316 = vrot.lane.b32.xlu0 %v2393_v14, %s2737_s21 }
 0x20e   : > { %v1305_v51 = vpop.permute.xlu1 %1304  ;;  %v1211_v8 = vpop.permute.xlu0 %1210 }
 0x20f   : > { %v1719_v43 = vsel %vm1710_vm7, %v1686_v25, %v1305_v51  ;;  %v1703_v41 = vsel %vm1677_vm6, %v1670_v17, %v1211_v8  ;;  %v4482_v51 = vld [vmem:[#allocation35_spill] sm:$0xff] }
 0x210   : > { %1350 = vrot.lane.b32.xlu1 %v2410_v3, %s2737_s21  ;;  %1318 = vrot.lane.b32.xlu0 %v2394_v48, %s2737_s21  ;;  %v4481_v48 = vld [vmem:[#allocation16_spill] sm:$0xff] }
 0x211   : > { %v1623_v8 = vsel %vm1611_vm4, %v4482_v51, %v4481_v48 }
 0x212   : > { %v957_v46 = vpop.permute.xlu1 %956  ;;  %v1337_v52 = vpop.permute.xlu0 %1336 }
 0x213   : > { %v1735_v39 = vsel %vm1710_vm7, %v1702_v1, %v1337_v52  ;;  %v1638_v15 = vsel %vm1611_vm4, %v4480_v35, %v957_v46 }
 0x214   : > { %1476 = vrot.lane.b32.xlu1 %v2441_v62, %s2738_s6  ;;  %1444 = vrot.lane.b32.xlu0 %v2425_v33, %s2738_s6 }
 0x216   : > { %v1339_v29 = vpop.permute.xlu1 %1338  ;;  %v1307_v40 = vpop.permute.xlu0 %1306 }
 0x217   : > { %v1720_v61 = vsel %vm1710_vm7, %v1687_v49, %v1307_v40  ;;  %v1736_v55 = vsel %vm1710_vm7, %v1703_v41, %v1339_v29 }
 0x218   : > { %1478 = vrot.lane.b32.xlu1 %v2442_v12, %s2738_s6  ;;  %1446 = vrot.lane.b32.xlu0 %v2426_v38, %s2738_s6  ;;  %v4483_v38 = vld [vmem:[#allocation38_spill] sm:$0xff] }
 0x21a   : > { %v1465_v5 = vpop.permute.xlu1 %1464  ;;  %v1433_v50 = vpop.permute.xlu0 %1432 }
 0x21b   : > { %v1768_v0 = vsel %vm1743_vm8, %v1735_v39, %v1465_v5  ;;  %v1752_v13 = vsel %vm1743_vm8, %v1719_v43, %v1433_v50 }
 0x21c   : > { %2542 = vmatprep.mubr.msk.f32.mxu0 %vm1788_vm9, %v1752_v13  ;;  %2566 = vmatprep.mubr.msk.f32.mxu1 %vm1788_vm9, %v1768_v0  ;;  %v4145_v0 = vld [vmem:[%s4336_s2] ss:$0 sm:$0xff] }
 0x21e   : > { %v1053_v42 = vpop.permute.xlu1 %1052  ;;  %v959_v36 = vpop.permute.xlu0 %958 }
 0x21f   : > { %v1655_v23 = vsel %vm1644_vm5, %v1622_v18, %v1053_v42  ;;  %v1639_v29 = vsel %vm1611_vm4, %v4483_v38, %v959_v36 }
 0x222   : > { %v1435_v30 = vpop.permute.xlu1 %1434  ;;  %v1085_v34 = vpop.permute.xlu0 %1084 }
 0x223   : > { %v1753_v37 = vsel %vm1743_vm8, %v1720_v61, %v1435_v30  ;;  %v1671_v45 = vsel %vm1644_vm5, %v1638_v15, %v1085_v34 }
 0x224   : > { %2543 = vmatmul.mubr.msk.f32.gmra.mxu0 %vm1788_vm9, %v1753_v37 }
 0x226   : > { %v1055_v57 = vpop.permute.xlu1 %1054  ;;  %v1467_v54 = vpop.permute.xlu0 %1466 }
 0x227   : > { %v1769_v2 = vsel %vm1743_vm8, %v1736_v55, %v1467_v54  ;;  %v1656_v62 = vsel %vm1644_vm5, %v1623_v8, %v1055_v57  ;;  %v4484_v57 = vld [vmem:[#allocation9_spill] sm:$0xff]  ;;  %v4485_v54 = vld [vmem:[#allocation14_spill] sm:$0xff] }
 0x228   : > { %2567 = vmatmul.mubr.msk.f32.gmra.mxu1 %vm1788_vm9, %v1769_v2  ;;  %v1624_v2 = vsel %vm1611_vm4, %v4485_v54, %v4484_v57 }
 0x22a   : > { %v1181_v11 = vpop.permute.xlu1 %1180  ;;  %v1087_v31 = vpop.permute.xlu0 %1086 }
 0x22b   : > { %v1688_v19 = vsel %vm1677_vm6, %v1655_v23, %v1181_v11  ;;  %v1672_v22 = vsel %vm1644_vm5, %v1639_v29, %v1087_v31  ;;  %v4486_v11 = vld [vmem:[#allocation40_spill] sm:$0xff] }
 0x22e   : > { %v1183_v59 = vpop.permute.xlu1 %1182  ;;  %v1213_v6 = vpop.permute.xlu0 %1212 }
 0x22f   : > { %v1704_v60 = vsel %vm1677_vm6, %v1671_v45, %v1213_v6  ;;  %v1689_v33 = vsel %vm1677_vm6, %v1656_v62, %v1183_v59 }
 0x232   : > { %v1309_v63 = vpop.permute.xlu1 %1308  ;;  %v1215_v47 = vpop.permute.xlu0 %1214 }
 0x233   : > { %v1721_v58 = vsel %vm1710_vm7, %v1688_v19, %v1309_v63  ;;  %v1705_v53 = vsel %vm1677_vm6, %v1672_v22, %v1215_v47 }
 0x236   : > { %v4105_v28 = vpop.permute.xlu1 %960  ;;  %v1341_v9 = vpop.permute.xlu0 %1340 }
 0x237   : > { %v1737_v4 = vsel %vm1710_vm7, %v1704_v60, %v1341_v9  ;;  %v1640_v31 = vsel %vm1611_vm4, %v4486_v11, %v4105_v28  ;;  %v4487_v60 = vld [vmem:[#allocation10_spill] sm:$0xff] }
 0x238   : > { %v4493_v11 = vld [vmem:[#allocation6_spill] sm:$0xff] }
 0x23a   : > { %v1343_v27 = vpop.permute.xlu1 %1342  ;;  %v1311_v20 = vpop.permute.xlu0 %1310 }
 0x23b   : > { %v1722_v46 = vsel %vm1710_vm7, %v1689_v33, %v1311_v20  ;;  %v1738_v26 = vsel %vm1710_vm7, %v1705_v53, %v1343_v27 }
 0x23e   : > { %v1469_v14 = vpop.permute.xlu1 %1468  ;;  %v1437_v44 = vpop.permute.xlu0 %1436 }
 0x23f   : > { %v1770_v24 = vsel %vm1743_vm8, %v1737_v4, %v1469_v14  ;;  %v1754_v16 = vsel %vm1743_vm8, %v1721_v58, %v1437_v44  ;;  %v4488_v58 = vld [vmem:[#allocation36_spill] sm:$0xff]  ;;  %v4489_v14 = vld [vmem:[#allocation39_spill] sm:$0xff] }
 0x240   : > { %2545 = vmatprep.mubr.msk.f32.mxu0 %vm1788_vm9, %v1754_v16  ;;  %2569 = vmatprep.mubr.msk.f32.mxu1 %vm1788_vm9, %v1770_v24  ;;  %v1625_v4 = vsel %vm1611_vm4, %v4488_v58, %v4487_v60 }
 0x242   : > { %v1057_v32 = vpop.permute.xlu1 %1056  ;;  %v4122_v3 = vpop.permute.xlu0 %962 }
 0x243   : > { %v1657_v59 = vsel %vm1644_vm5, %v1624_v2, %v1057_v32  ;;  %v1641_v44 = vsel %vm1611_vm4, %v4489_v14, %v4122_v3 }
 0x246   : > { %v1439_v52 = vpop.permute.xlu1 %1438  ;;  %v1089_v12 = vpop.permute.xlu0 %1088 }
 0x247   : > { %v1755_v40 = vsel %vm1743_vm8, %v1722_v46, %v1439_v52  ;;  %v1673_v6 = vsel %vm1644_vm5, %v1640_v31, %v1089_v12 }
 0x248   : > { %2546 = vmatmul.mubr.msk.f32.gmra.mxu0 %vm1788_vm9, %v1755_v40 }
 0x24a   : > { %v1059_v10 = vpop.permute.xlu1 %1058  ;;  %v1471_v25 = vpop.permute.xlu0 %1470 }
 0x24b   : > { %v1771_v1 = vsel %vm1743_vm8, %v1738_v26, %v1471_v25  ;;  %v1658_v24 = vsel %vm1644_vm5, %v1625_v4, %v1059_v10 }
 0x24c   : > { %2570 = vmatmul.mubr.msk.f32.gmra.mxu1 %vm1788_vm9, %v1771_v1 }
 0x24e   : > { %v1185_v43 = vpop.permute.xlu1 %1184  ;;  %v1091_v39 = vpop.permute.xlu0 %1090 }
 0x24f   : > { %v1690_v63 = vsel %vm1677_vm6, %v1657_v59, %v1185_v43  ;;  %v1674_v16 = vsel %vm1644_vm5, %v1641_v44, %v1091_v39  ;;  %v4494_v59 = vld [vmem:[#allocation37_spill] sm:$0xff] }
 0x252   : > { %v1187_v5 = vpop.permute.xlu1 %1186  ;;  %v1217_v50 = vpop.permute.xlu0 %1216 }
 0x253   : > { %v1706_v47 = vsel %vm1677_vm6, %v1673_v6, %v1217_v50  ;;  %v1691_v32 = vsel %vm1677_vm6, %v1658_v24, %v1187_v5 }
 0x255   : > { %v2532_v13 = vpop.f32.mrf.mxu0 }
 0x256   : > { %v1961_v42 = vadd.f32 %v2532_v13, %v4145_v0  ;;  %v1313_v36 = vpop.permute.xlu1 %1312  ;;  %v1219_v21 = vpop.permute.xlu0 %1218 }
 0x257   : > { %v1955_v56 = vpop.f32.mrf.mxu0  ;;  %v1723_v9 = vsel %vm1710_vm7, %v1690_v63, %v1313_v36  ;;  %v1707_v48 = vsel %vm1677_vm6, %v1674_v16, %v1219_v21  ;;  %v4490_v21 = vld [vmem:[#allocation15_spill] sm:$0xff] }
 0x258   : > { %2115 = vst [vmem:[%s4148_s10 + $0x8] sm:$0xff] %v1961_v42  ;;  %v1956_v49 = vadd.f32 %v4145_v0, %v1955_v56  ;;  %v4491_v56 = vld [vmem:[#allocation43_spill] sm:$0xff] }
 0x259   : > { %v2556_v61 = vpop.f32.mrf.mxu1 }
 0x25a   : > { %2114 = vst [vmem:[%s4148_s10] sm:$0xff] %v1956_v49  ;;  %v2041_v30 = vadd.f32 %v2556_v61, %v4145_v0  ;;  %v4154_v34 = vpop.permute.xlu1 %964  ;;  %v1345_v7 = vpop.permute.xlu0 %1344  ;;  %v1626_v49 = vsel %vm1611_vm4, %v4491_v56, %v4490_v21  ;;  %v4492_v61 = vld [vmem:[#allocation5_spill] sm:$0xff] }
 0x25b   : > { %v2035_v37 = vpop.f32.mrf.mxu1  ;;  %v1739_v27 = vsel %vm1710_vm7, %v1706_v47, %v1345_v7 }
 0x25c   : > { %2131 = vst [vmem:[%s4148_s10 + $0x88] sm:$0xff] %v2041_v30  ;;  %v2036_v17 = vadd.f32 %v4145_v0, %v2035_v37  ;;  %v1642_v30 = vsel %vm1611_vm4, %v4492_v61, %v4154_v34 }
 0x25e   : > { %2130 = vst [vmem:[%s4148_s10 + $0x80] sm:$0xff] %v2036_v17  ;;  %v1347_v41 = vpop.permute.xlu1 %1346  ;;  %v1315_v55 = vpop.permute.xlu0 %1314 }
 0x25f   : > { %v1740_v51 = vsel %vm1710_vm7, %v1707_v48, %v1347_v41  ;;  %v1724_v8 = vsel %vm1710_vm7, %v1691_v32, %v1315_v55 }
 0x262   : > { %v1473_v20 = vpop.permute.xlu1 %1472  ;;  %v1441_v18 = vpop.permute.xlu0 %1440 }
 0x263   : > { %v1772_v35 = vsel %vm1743_vm8, %v1739_v27, %v1473_v20  ;;  %v1756_v15 = vsel %vm1743_vm8, %v1723_v9, %v1441_v18 }
 0x264   : > { %2548 = vmatprep.mubr.msk.f32.mxu0 %vm1788_vm9, %v1756_v15  ;;  %2572 = vmatprep.mubr.msk.f32.mxu1 %vm1788_vm9, %v1772_v35 }
 0x266   : > { %v967_v28 = vpop.permute.xlu1 %966  ;;  %v935_v23 = vpop.permute.xlu0 %934 }
 0x267   : > { %v1643_v31 = vsel %vm1611_vm4, %v4493_v11, %v967_v28  ;;  %v1627_v34 = vsel %vm1611_vm4, %v4494_v59, %v935_v23 }
 0x26a   : > { %v1093_v45 = vpop.permute.xlu1 %1092  ;;  %v1061_v19 = vpop.permute.xlu0 %1060 }
 0x26b   : > { %v1675_v7 = vsel %vm1644_vm5, %v1642_v30, %v1093_v45  ;;  %v1659_v37 = vsel %vm1644_vm5, %v1626_v49, %v1061_v19 }
 0x26e   : > { %v1475_v62 = vpop.permute.xlu1 %1474  ;;  %v1443_v33 = vpop.permute.xlu0 %1442 }
 0x26f   : > { %v1773_v46 = vsel %vm1743_vm8, %v1740_v51, %v1475_v62  ;;  %v1757_v3 = vsel %vm1743_vm8, %v1724_v8, %v1443_v33 }
 0x270   : > { %2549 = vmatmul.mubr.msk.f32.gmra.mxu0 %vm1788_vm9, %v1757_v3  ;;  %2573 = vmatmul.mubr.msk.f32.gmra.mxu1 %vm1788_vm9, %v1773_v46 }
 0x272   : > { %v1095_v52 = vpop.permute.xlu1 %1094  ;;  %v1063_v12 = vpop.permute.xlu0 %1062 }
 0x273   : > { %v1676_v47 = vsel %vm1644_vm5, %v1643_v31, %v1095_v52  ;;  %v1660_v9 = vsel %vm1644_vm5, %v1627_v34, %v1063_v12 }
 0x276   : > { %v1221_v38 = vpop.permute.xlu1 %1220  ;;  %v1189_v29 = vpop.permute.xlu0 %1188 }
 0x277   : > { %v1708_v17 = vsel %vm1677_vm6, %v1675_v7, %v1221_v38  ;;  %v1692_v41 = vsel %vm1677_vm6, %v1659_v37, %v1189_v29 }
 0x279   : > { %v2535_v40 = vpop.f32.mrf.mxu0 }
 0x27a   : > { %v1971_v22 = vadd.f32 %v2535_v40, %v4145_v0  ;;  %v1223_v53 = vpop.permute.xlu1 %1222  ;;  %v1191_v26 = vpop.permute.xlu0 %1190 }
 0x27b   : > { %v1965_v10 = vpop.f32.mrf.mxu0  ;;  %v1709_v27 = vsel %vm1677_vm6, %v1676_v47, %v1223_v53  ;;  %v1693_v20 = vsel %vm1677_vm6, %v1660_v9, %v1191_v26 }
 0x27c   : > { %2117 = vst [vmem:[%s4148_s10 + $0x18] sm:$0xff] %v1971_v22  ;;  %v1966_v25 = vadd.f32 %v4145_v0, %v1965_v10 }
 0x27d   : > { %v2559_v1 = vpop.f32.mrf.mxu1 }
 0x27e   : > { %2116 = vst [vmem:[%s4148_s10 + $0x10] sm:$0xff] %v1966_v25  ;;  %v2051_v43 = vadd.f32 %v2559_v1, %v4145_v0  ;;  %v1349_v39 = vpop.permute.xlu1 %1348  ;;  %v1317_v5 = vpop.permute.xlu0 %1316 }
 0x27f   : > { %v2045_v50 = vpop.f32.mrf.mxu1  ;;  %v1741_v55 = vsel %vm1710_vm7, %v1708_v17, %v1349_v39  ;;  %v1725_v57 = vsel %vm1710_vm7, %v1692_v41, %v1317_v5 }
 0x280   : > { %2133 = vst [vmem:[%s4148_s10 + $0x98] sm:$0xff] %v2051_v43  ;;  %v2046_v13 = vadd.f32 %v4145_v0, %v2045_v50 }
 0x282   : > { %2132 = vst [vmem:[%s4148_s10 + $0x90] sm:$0xff] %v2046_v13  ;;  %v1351_v42 = vpop.permute.xlu1 %1350  ;;  %v1319_v36 = vpop.permute.xlu0 %1318 }
 0x283   : > { %v1742_v18 = vsel %vm1710_vm7, %v1709_v27, %v1351_v42  ;;  %v1726_v35 = vsel %vm1710_vm7, %v1693_v20, %v1319_v36 }
 0x286   : > { %v1477_v54 = vpop.permute.xlu1 %1476  ;;  %v1445_v2 = vpop.permute.xlu0 %1444 }
 0x287   : > { %v1774_v6 = vsel %vm1743_vm8, %v1741_v55, %v1477_v54  ;;  %v1758_v63 = vsel %vm1743_vm8, %v1725_v57, %v1445_v2 }
 0x288   : > { %2551 = vmatprep.mubr.msk.f32.mxu0 %vm1788_vm9, %v1758_v63  ;;  %2575 = vmatprep.mubr.msk.f32.mxu1 %vm1788_vm9, %v1774_v6 }
 0x28a   : > { %v1479_v15 = vpop.permute.xlu1 %1478  ;;  %v1447_v28 = vpop.permute.xlu0 %1446 }
 0x28b   : > { %v1775_v23 = vsel %vm1743_vm8, %v1742_v18, %v1479_v15  ;;  %v1759_v45 = vsel %vm1743_vm8, %v1726_v35, %v1447_v28 }
 0x28c   : > { %2552 = vmatmul.mubr.msk.f32.gmra.mxu0 %vm1788_vm9, %v1759_v45  ;;  %2576 = vmatmul.mubr.msk.f32.gmra.mxu1 %vm1788_vm9, %v1775_v23 }
 0x29d   : > { %v2538_v19 = vpop.f32.mrf.mxu0 }
 0x29e   : > { %v1981_v60 = vadd.f32 %v2538_v19, %v4145_v0 }
 0x29f   : > { %v1975_v58 = vpop.f32.mrf.mxu0 }
 0x2a0   : > { %2119 = vst [vmem:[%s4148_s10 + $0x28] sm:$0xff] %v1981_v60  ;;  %v1976_v4 = vadd.f32 %v4145_v0, %v1975_v58 }
 0x2a1   : > { %v2562_v14 = vpop.f32.mrf.mxu1 }
 0x2a2   : > { %2118 = vst [vmem:[%s4148_s10 + $0x20] sm:$0xff] %v1976_v4  ;;  %v2061_v44 = vadd.f32 %v2562_v14, %v4145_v0 }
 0x2a3   : > { %v2055_v24 = vpop.f32.mrf.mxu1 }
 0x2a4   : > { %2135 = vst [vmem:[%s4148_s10 + $0xa8] sm:$0xff] %v2061_v44  ;;  %v2056_v16 = vadd.f32 %v4145_v0, %v2055_v24 }
 0x2a6   : > { %2134 = vst [vmem:[%s4148_s10 + $0xa0] sm:$0xff] %v2056_v16 }
 0x2c1   : > { %v2541_v32 = vpop.f32.mrf.mxu0 }
 0x2c2   : > { %v1991_v48 = vadd.f32 %v2541_v32, %v4145_v0 }
 0x2c3   : > { %v1985_v51 = vpop.f32.mrf.mxu0 }
 0x2c4   : > { %2121 = vst [vmem:[%s4148_s10 + $0x38] sm:$0xff] %v1991_v48  ;;  %v1986_v8 = vadd.f32 %v4145_v0, %v1985_v51 }
 0x2c5   : > { %v2565_v62 = vpop.f32.mrf.mxu1 }
 0x2c6   : > { %2120 = vst [vmem:[%s4148_s10 + $0x30] sm:$0xff] %v1986_v8  ;;  %v2071_v33 = vadd.f32 %v2565_v62, %v4145_v0 }
 0x2c7   : > { %v2065_v46 = vpop.f32.mrf.mxu1 }
 0x2c8   : > { %2137 = vst [vmem:[%s4148_s10 + $0xb8] sm:$0xff] %v2071_v33  ;;  %v2066_v3 = vadd.f32 %v4145_v0, %v2065_v46 }
 0x2ca   : > { %2136 = vst [vmem:[%s4148_s10 + $0xb0] sm:$0xff] %v2066_v3 }
 0x2e4   : > { %v2544_v52 = vpop.f32.mrf.mxu0 }
 0x2e5   : > { %v2001_v12 = vadd.f32 %v2544_v52, %v4145_v0 }
 0x2e6   : > { %v1995_v38 = vpop.f32.mrf.mxu0 }
 0x2e7   : > { %2123 = vst [vmem:[%s4148_s10 + $0x48] sm:$0xff] %v2001_v12  ;;  %v1996_v29 = vadd.f32 %v4145_v0, %v1995_v38 }
 0x2e8   : > { %v2568_v40 = vpop.f32.mrf.mxu1 }
 0x2e9   : > { %2122 = vst [vmem:[%s4148_s10 + $0x40] sm:$0xff] %v1996_v29  ;;  %v2081_v22 = vadd.f32 %v2568_v40, %v4145_v0 }
 0x2ea   : > { %v2075_v53 = vpop.f32.mrf.mxu1 }
 0x2eb   : > { %2139 = vst [vmem:[%s4148_s10 + $0xc8] sm:$0xff] %v2081_v22  ;;  %v2076_v26 = vadd.f32 %v4145_v0, %v2075_v53 }
 0x2ed   : > { %2138 = vst [vmem:[%s4148_s10 + $0xc0] sm:$0xff] %v2076_v26 }
 0x308   : > { %v2547_v10 = vpop.f32.mrf.mxu0 }
 0x309   : > { %v2011_v25 = vadd.f32 %v2547_v10, %v4145_v0 }
 0x30a   : > { %v2005_v1 = vpop.f32.mrf.mxu0 }
 0x30b   : > { %2125 = vst [vmem:[%s4148_s10 + $0x58] sm:$0xff] %v2011_v25  ;;  %v2006_v43 = vadd.f32 %v4145_v0, %v2005_v1 }
 0x30c   : > { %v2571_v39 = vpop.f32.mrf.mxu1 }
 0x30d   : > { %2124 = vst [vmem:[%s4148_s10 + $0x50] sm:$0xff] %v2006_v43  ;;  %v2091_v5 = vadd.f32 %v2571_v39, %v4145_v0 }
 0x30e   : > { %v2085_v50 = vpop.f32.mrf.mxu1 }
 0x30f   : > { %2141 = vst [vmem:[%s4148_s10 + $0xd8] sm:$0xff] %v2091_v5  ;;  %v2086_v13 = vadd.f32 %v4145_v0, %v2085_v50 }
 0x311   : > { %2140 = vst [vmem:[%s4148_s10 + $0xd0] sm:$0xff] %v2086_v13 }
 0x330   : > { %v2550_v42 = vpop.f32.mrf.mxu0  ;;  %v2574_v36 = vpop.f32.mrf.mxu1 }
 0x331   : > { %v2021_v21 = vadd.f32 %v2550_v42, %v4145_v0  ;;  %v2101_v56 = vadd.f32 %v2574_v36, %v4145_v0 }
 0x332   : > { %v2015_v49 = vpop.f32.mrf.mxu0  ;;  %v2095_v61 = vpop.f32.mrf.mxu1 }
 0x333   : > { %2127 = vst [vmem:[%s4148_s10 + $0x68] sm:$0xff] %v2021_v21  ;;  %2143 = vst [vmem:[%s4148_s10 + $0xe8] sm:$0xff] %v2101_v56  ;;  %v2016_v30 = vadd.f32 %v4145_v0, %v2015_v49  ;;  %v2096_v7 = vadd.f32 %v4145_v0, %v2095_v61 }
 0x335   : > { %2126 = vst [vmem:[%s4148_s10 + $0x60] sm:$0xff] %v2016_v30  ;;  %2142 = vst [vmem:[%s4148_s10 + $0xe0] sm:$0xff] %v2096_v7 }
 0x34c   : > { %v2553_v37 = vpop.f32.mrf.mxu0  ;;  %v2577_v17 = vpop.f32.mrf.mxu1 }
 0x34d   : > { %v2031_v41 = vadd.f32 %v2553_v37, %v4145_v0  ;;  %v2111_v55 = vadd.f32 %v2577_v17, %v4145_v0 }
 0x34e   : > { %v2025_v57 = vpop.f32.mrf.mxu0  ;;  %v2105_v54 = vpop.f32.mrf.mxu1 }
 0x34f   : > { %2129 = vst [vmem:[%s4148_s10 + $0x78] sm:$0xff] %v2031_v41  ;;  %2145 = vst [vmem:[%s4148_s10 + $0xf8] sm:$0xff] %v2111_v55  ;;  %v2026_v2 = vadd.f32 %v4145_v0, %v2025_v57  ;;  %v2106_v11 = vadd.f32 %v4145_v0, %v2105_v54 }
 0x351   : > { %2128 = vst [vmem:[%s4148_s10 + $0x70] sm:$0xff] %v2026_v2  ;;  %2144 = vst [vmem:[%s4148_s10 + $0xf0] sm:$0xff] %v2106_v11 }
 0x352   : > { %2666 = shalt.err (!%p2663_p5)
}
 0x353   : > { %s2667_s4 = scalar_lea.hbm %s4276_s23, 4096  ;;  %s2671_s7 = scalar_lea.hbm %s4337_s3, 8192 }
 0x354   : > { %p2668_p6 = scmp.ne.s32.totalorder %s4276_s23, %s2667_s4  ;;  %p2672_p10 = scmp.lt.s32.totalorder %s4276_s23, %s4337_s3 }
 0x355   : > { %p2673_p11 = scmp.lt.s32.totalorder %s2671_s7, %s2667_s4 }
 0x356   : > { %p2669_p7 = pnand %p2668_p6, %p2801_p4 }
 0x357   : > { %p2674_p12 = por %p2673_p11, %p2672_p10 }
 0x358   : > { %p2670_p9 = pneg %p2669_p7 }
 0x35a   : > { %p2675_p13 = pnand %p2674_p12, %p2670_p9 }
 0x35c   : > { %2678 = shalt.err (!%p2675_p13)
}
 0x35d   : > { %s2740_s10 = smov 128  }
 0x35e   : > { %2589 = dma.vmem_to_hbm [thread:$0]  (%p2801_p4), %s4282_s18, 4096, %s4276_s23, %s4288_s15, %s2740_s10, %s2740_s10, %s2732_s5  }
 0x35f PF: > { %p2595_p0 = scmp.ge.s32.totalorder %s2729_s17, 2  ;;  %s2177_s11 = sand.u32 1, %s2709_s12  }
 0x360   : > { %s2178_s19 = scalar_lea.sflag [#allocation3], %s2177_s11 }
 0x361   : > { %p2592_p1 = pnand %p2595_p0, %p2808_p8 }
 0x363   : > { %p2593_p2 = pneg %p2592_p1 }
 0x365   : > { %2704 = dma.done.wait (%p2593_p2), %s2178_s19, 4096  }
 0x366   : > { %2706 = vsyncadd (%p2593_p2), %s2178_s19, 4294963200  ;;  %s16_s17 = sadd.s32 1, %s2729_s17   ;;  %s4495_s12 = smov %s2713_s13 }
 0x367   : > { %p13_p3 = scmp.ge.s32.totalorder %s16_s17, 4   ;;  %s4496_s13 = smov %s2717_s14 }
 0x368   : > { %s4497_s14 = smov %s2814_s25  ;;  %s4498_s15 = smov %s2725_s16 }
 0x369   : > { %s4499_s16 = smov %s4501_s20  ;;  %15 = sbr.rel (!%p13_p3) target bundleno = 4 (0x4), region = 69 }
 0x36e   :  { %2183 = vsyncpa [#allocation3], 1 }
 0x36f   :  { %2185 = vsyncpa [#allocation3 + $0x1], 1 }

// kernel: tpu_custom_call.1
= control target key start
LH: loop header
LB: loop body
LE: loop exit
PB: predicated region body
PF: predicated region fallthrough
CT: control target
= control target key end

     0   :  { %8 = vsyncpa [#allocation3], 0  ;;  %s4334_s0 = inlined_call_operand.vmem [shape: f32[2,1,18,18,4], index: 0, kind: input, shape index: {}]   ;;  %s4335_s1 = inlined_call_operand.vmem [shape: f32[36,128], index: 1, kind: input, shape index: {}]   ;;  %s4336_s2 = inlined_call_operand.vmem [shape: f32[1,128], index: 2, kind: input, shape index: {}]   ;;  %s4337_s3 = inlined_call_operand.hbm [shape: f32[2,256,128], index: 3, kind: output, shape index: {}]  }
   0x1   :  { %10 = vsyncpa [#allocation3 + $0x1], 0  ;;  %s2761_s12 = smov 0   ;;  %s2763_s13 = smov 0  }
   0x2   :  { %s2765_s14 = smov 0   ;;  %s2767_s15 = smov 0  }
   0x3   :  { %s2769_s16 = smov 0   ;;  %s2771_s17 = smov 0  }
   0x4 LB: > { %s2244_s18 = sadd.s32 4294967295, %s2729_s17   ;;  %s2245_s19 = sadd.s32 4294967294, %s2729_s17   ;;  %s2729_s17 = sphi %s2771_s17, %s16_s17   ;;  %s2725_s16 = sphi %s2769_s16, %s4499_s16   ;;  %s2721_s15 = sphi %s2767_s15, %s4498_s15   ;;  %s2717_s14 = sphi %s2765_s14, %s4497_s14   ;;  %s2713_s13 = sphi %s2763_s13, %s4496_s13   ;;  %s2709_s12 = sphi %s2761_s12, %s4495_s12  }
   0x5   : > { %s28_s20 = sadd.s32 1, %s2725_s16  ;;  %s107_s21 = sadd.s32 1, %s2717_s14 }
   0x6   : > { %p30_p0 = scmp.ge.s32.totalorder %s28_s20, 2  ;;  %p117_p1 = scmp.ne.s32.totalorder %s2717_s14, %s2713_s13 }
   0x7   : > { %p118_p2 = scmp.eq.s32.totalorder %s2244_s18, 1  ;;  %p123_p3 = scmp.ne.s32.totalorder %s2713_s13, %s2709_s12 }
   0x8   : > { %s4501_s20 = smov (%p30_p0, %s28_s20), 0  ;;  %p124_p5 = scmp.eq.s32.totalorder %s2245_s19, 1 }
   0x9   : > { %p2801_p4 = por %p118_p2, %p117_p1  ;;  %s102_s23 = ssub.s32 %s2725_s16, %s4501_s20 }
   0xa   : > { %p2248_p6 = scmp.ge.s32.totalorder %s2729_s17, 1  ;;  %p105_p7 = scmp.eq.s32.totalorder %s102_s23, 0 }
   0xb   : > { %p2808_p8 = por %p124_p5, %p123_p3  ;;  %p160_p9 = scmp.lt.s32.totalorder %s2729_s17, 3 }
   0xc   : > { %s2814_s25 = scalar_select %p105_p7, %s2717_s14, %s107_s21  }
   0xd   : > { %p161_p10 = pnand %p2248_p6, %p160_p9 }
   0xf   : > { %164 = sbr.rel (%p161_p10) target bundleno = 863 (0x35f), region = 32 }
  0x14   : > { %p188_p11 = scmp.lt.s32.totalorder %s2721_s15, 1  ;;  %s2731_s4 = smov 4   ;;  %vm1512_vm0 = vcmask 31744   ;;  %vm1545_vm1 = vcmask 64512   ;;  %vm1885_vm2 = vcmask 1043456   ;;  %vm1578_vm3 = vcmask 97280  }
  0x15   : > { %s2732_s5 = smov 8   ;;  %s2733_s6 = smov 12   ;;  %vm1611_vm4 = vcmask 130048   ;;  %vm1644_vm5 = vcmask 162816   ;;  %vm1677_vm6 = vcmask 195584   ;;  %vm1710_vm7 = vcmask 228352  }
  0x16   : > { %s189_s26 = scalar_select %p188_p11, %s2721_s15, 1  ;;  %vm1743_vm8 = vcmask 261120   ;;  %vm1788_vm9 = vcmask 293888  }
  0x17   : > { %s2734_s7 = smov 16   ;;  %s2735_s8 = smov 20  }
  0x18   : > { %s2588_s27 = smul.u32 432, %s189_s26  ;;  %s2736_s9 = smov 24  }
  0x19   : > { %s2737_s21 = smov 28   ;;  %s2482_s11 = sshll.u32 %s2721_s15, 12 }
  0x1a   : > { %s2821_s30 = scalar_lea.vmem %s4334_s0, %s2588_s27  ;;  %s4276_s23 = scalar_lea.hbm %s4337_s3, %s2482_s11 }
  0x1b   : > { %v2824_v0 = vld [vmem:[%s2821_s30 + $0x19] sm:$0xff]  ;;  %v230_v1 = vld [vmem:[%s2821_s30 + $0x1] sm:$0xff]  ;;  %v231_v3 = vld [vmem:[%s2821_s30 + $0x9] sm:$0xff]  ;;  %s2739_s27 = smov [#allocation2]  }
  0x1c   : > { %524 = vrot.lane.b32.xlu1 %v2824_v0, %s2731_s4  ;;  %520 = vrot.lane.b32.xlu0 %v230_v1, %s2731_s4  ;;  %v2831_v2 = vld [vmem:[%s2821_s30 + $0x21] sm:$0xff]  ;;  %v2838_v4 = vld [vmem:[%s2821_s30 + $0x39] sm:$0xff]  ;;  %s2657_s28 = sshll.u32 %s2739_s27, 4  ;;  %s2658_s28 = int_to_ptr.vmem [resolvable:$false] %s2657_s28 }
  0x1d   : > { %v2841_v5 = vld [vmem:[%s2821_s30 + $0x31] sm:$0xff]  ;;  %v2851_v7 = vld [vmem:[%s2821_s30 + $0x49] sm:$0xff]  ;;  %v2861_v9 = vld [vmem:[%s2821_s30 + $0x61] sm:$0xff]  ;;  %s2659_s29 = scalar_lea.vmem %s2658_s28, 8192 }
  0x1e   : > { %v2848_v6 = vld [vmem:[%s2821_s30 + $0x51] sm:$0xff]  ;;  %v2858_v8 = vld [vmem:[%s2821_s30 + $0x69] sm:$0xff]  ;;  %v2868_v10 = vld [vmem:[%s2821_s30 + $0x81] sm:$0xff] }
  0x1f   : > { %v2871_v11 = vld [vmem:[%s2821_s30 + $0x79] sm:$0xff]  ;;  %v2881_v13 = vld [vmem:[%s2821_s30 + $0x91] sm:$0xff]  ;;  %v2891_v15 = vld [vmem:[%s2821_s30 + $0xa9] sm:$0xff] }
  0x20   : > { %526 = vrot.lane.b32.xlu1 %v2831_v2, %s2731_s4  ;;  %522 = vrot.lane.b32.xlu0 %v231_v3, %s2731_s4  ;;  %v2878_v12 = vld [vmem:[%s2821_s30 + $0x99] sm:$0xff]  ;;  %v2888_v14 = vld [vmem:[%s2821_s30 + $0xb1] sm:$0xff] }
  0x21   : > { %v247_v16 = vld [vmem:[%s2821_s30 + $0xc9] sm:$0xff]  ;;  %v2899_v17 = vld [vmem:[%s2821_s30 + $0xc1] sm:$0xff]  ;;  %v2908_v19 = vld [vmem:[%s2821_s30 + $0xd9] sm:$0xff] }
  0x22   : > { %v2905_v18 = vld [vmem:[%s2821_s30 + $0xe1] sm:$0xff]  ;;  %v2915_v20 = vld [vmem:[%s2821_s30 + $0xf9] sm:$0xff]  ;;  %v2918_v21 = vld [vmem:[%s2821_s30 + $0xf1] sm:$0xff] }
  0x23   : > { %4381 = vst [vmem:[#allocation5_spill] sm:$0xff] %v2915_v20  ;;  %4382 = vst [vmem:[#allocation6_spill] sm:$0xff] %v2918_v21  ;;  %v2925_v22 = vld [vmem:[%s2821_s30 + $0x111] sm:$0xff]  ;;  %v2928_v23 = vld [vmem:[%s2821_s30 + $0x109] sm:$0xff] }
  0x24   : > { %530 = vrot.lane.b32.xlu1 %v2838_v4, %s2731_s4  ;;  %528 = vrot.lane.b32.xlu0 %v2841_v5, %s2731_s4  ;;  %4383 = vst [vmem:[#allocation7_spill] sm:$0xff] %v2925_v22  ;;  %4384 = vst [vmem:[#allocation8_spill] sm:$0xff] %v2928_v23  ;;  %v255_v24 = vld [vmem:[%s2821_s30 + $0x129] sm:$0xff]  ;;  %v254_v25 = vld [vmem:[%s2821_s30 + $0x121] sm:$0xff] }
  0x25   : > { %v257_v26 = vld [vmem:[%s2821_s30 + $0x141] sm:$0xff]  ;;  %v256_v27 = vld [vmem:[%s2821_s30 + $0x139] sm:$0xff]  ;;  %v258_v29 = vld [vmem:[%s2821_s30 + $0x151] sm:$0xff] }
  0x26   : > { %v259_v28 = vld [vmem:[%s2821_s30 + $0x159] sm:$0xff]  ;;  %v261_v30 = vld [vmem:[%s2821_s30 + $0x171] sm:$0xff]  ;;  %v260_v31 = vld [vmem:[%s2821_s30 + $0x169] sm:$0xff] }
  0x27   : > { %v263_v32 = vld [vmem:[%s2821_s30 + $0xa] sm:$0xff]  ;;  %v262_v33 = vld [vmem:[%s2821_s30 + $0x2] sm:$0xff]  ;;  %v2958_v35 = vld [vmem:[%s2821_s30 + $0x1a] sm:$0xff] }
  0x28   : > { %534 = vrot.lane.b32.xlu1 %v2848_v6, %s2731_s4  ;;  %532 = vrot.lane.b32.xlu0 %v2851_v7, %s2731_s4  ;;  %v2955_v34 = vld [vmem:[%s2821_s30 + $0x22] sm:$0xff]  ;;  %v2965_v36 = vld [vmem:[%s2821_s30 + $0x3a] sm:$0xff] }
  0x29   : > { %4385 = vst [vmem:[#allocation9_spill] sm:$0xff] %v2965_v36  ;;  %v2968_v37 = vld [vmem:[%s2821_s30 + $0x32] sm:$0xff]  ;;  %v2978_v39 = vld [vmem:[%s2821_s30 + $0x4a] sm:$0xff]  ;;  %v2986_v41 = vld [vmem:[%s2821_s30 + $0x62] sm:$0xff] }
  0x2a   : > { %4386 = vst [vmem:[#allocation10_spill] sm:$0xff] %v2968_v37  ;;  %v2975_v38 = vld [vmem:[%s2821_s30 + $0x52] sm:$0xff]  ;;  %4388 = vst [vmem:[#allocation12_spill] sm:$0xff] %v2978_v39  ;;  %v271_v40 = vld [vmem:[%s2821_s30 + $0x6a] sm:$0xff] }
  0x2b   : > { %4387 = vst [vmem:[#allocation11_spill] sm:$0xff] %v2975_v38  ;;  %4389 = vst [vmem:[#allocation13_spill] sm:$0xff] %v2986_v41  ;;  %v273_v42 = vld [vmem:[%s2821_s30 + $0x82] sm:$0xff]  ;;  %v272_v43 = vld [vmem:[%s2821_s30 + $0x7a] sm:$0xff] }
  0x2c   : > { %538 = vrot.lane.b32.xlu1 %v2858_v8, %s2731_s4  ;;  %536 = vrot.lane.b32.xlu0 %v2861_v9, %s2731_s4  ;;  %v275_v44 = vld [vmem:[%s2821_s30 + $0x9a] sm:$0xff]  ;;  %v274_v45 = vld [vmem:[%s2821_s30 + $0x92] sm:$0xff] }
  0x2d   : > { %v277_v46 = vld [vmem:[%s2821_s30 + $0xb2] sm:$0xff]  ;;  %v276_v47 = vld [vmem:[%s2821_s30 + $0xaa] sm:$0xff]  ;;  %v278_v49 = vld [vmem:[%s2821_s30 + $0xc2] sm:$0xff] }
  0x2e   : > { %v279_v48 = vld [vmem:[%s2821_s30 + $0xca] sm:$0xff]  ;;  %v3008_v50 = vld [vmem:[%s2821_s30 + $0xe2] sm:$0xff]  ;;  %v3011_v51 = vld [vmem:[%s2821_s30 + $0xda] sm:$0xff] }
  0x2f   : > { %4390 = vst [vmem:[#allocation14_spill] sm:$0xff] %v3008_v50  ;;  %v3018_v52 = vld [vmem:[%s2821_s30 + $0xfa] sm:$0xff]  ;;  %v3021_v53 = vld [vmem:[%s2821_s30 + $0xf2] sm:$0xff]  ;;  %v3031_v55 = vld [vmem:[%s2821_s30 + $0x10a] sm:$0xff] }
  0x30   : > { %542 = vrot.lane.b32.xlu1 %v2868_v10, %s2731_s4  ;;  %540 = vrot.lane.b32.xlu0 %v2871_v11, %s2731_s4  ;;  %4391 = vst [vmem:[#allocation15_spill] sm:$0xff] %v3018_v52  ;;  %4392 = vst [vmem:[#allocation16_spill] sm:$0xff] %v3021_v53  ;;  %v3028_v54 = vld [vmem:[%s2821_s30 + $0x112] sm:$0xff]  ;;  %v3038_v56 = vld [vmem:[%s2821_s30 + $0x12a] sm:$0xff] }
  0x31   : > { %4393 = vst [vmem:[#allocation17_spill] sm:$0xff] %v3028_v54  ;;  %4394 = vst [vmem:[#allocation18_spill] sm:$0xff] %v3031_v55  ;;  %v3041_v57 = vld [vmem:[%s2821_s30 + $0x122] sm:$0xff]  ;;  %v288_v59 = vld [vmem:[%s2821_s30 + $0x13a] sm:$0xff] }
  0x32   : > { %4395 = vst [vmem:[#allocation19_spill] sm:$0xff] %v3038_v56  ;;  %4396 = vst [vmem:[#allocation20_spill] sm:$0xff] %v3041_v57  ;;  %v289_v58 = vld [vmem:[%s2821_s30 + $0x142] sm:$0xff]  ;;  %v291_v62 = vld [vmem:[%s2821_s30 + $0x15a] sm:$0xff] }
  0x33   : > { %v290_v63 = vld [vmem:[%s2821_s30 + $0x152] sm:$0xff] }
  0x34   : > { %546 = vrot.lane.b32.xlu1 %v2878_v12, %s2731_s4  ;;  %544 = vrot.lane.b32.xlu0 %v2881_v13, %s2731_s4 }
  0x38   : > { %550 = vrot.lane.b32.xlu1 %v2888_v14, %s2731_s4  ;;  %548 = vrot.lane.b32.xlu0 %v2891_v15, %s2731_s4 }
  0x3c   : > { %554 = vrot.lane.b32.xlu1 %v247_v16, %s2731_s4  ;;  %552 = vrot.lane.b32.xlu0 %v2899_v17, %s2731_s4  ;;  %v293_v16 = vld [vmem:[%s2821_s30 + $0x172] sm:$0xff] }
  0x40   : > { %558 = vrot.lane.b32.xlu1 %v2905_v18, %s2731_s4  ;;  %556 = vrot.lane.b32.xlu0 %v2908_v19, %s2731_s4 }
  0x44   : > { %562 = vrot.lane.b32.xlu1 %v2915_v20, %s2731_s4  ;;  %560 = vrot.lane.b32.xlu0 %v2918_v21, %s2731_s4  ;;  %v3237_v20 = vld [vmem:[%s2821_s30 + $0x138] sm:$0xff] }
  0x48   : > { %566 = vrot.lane.b32.xlu1 %v2925_v22, %s2731_s4  ;;  %564 = vrot.lane.b32.xlu0 %v2928_v23, %s2731_s4  ;;  %v3225_v22 = vld [vmem:[%s2821_s30 + $0x120] sm:$0xff]  ;;  %v229_v23 = vld [vmem:[%s2821_s30 + $0x170] sm:$0xff] }
  0x4c   : > { %570 = vrot.lane.b32.xlu1 %v255_v24, %s2731_s4  ;;  %568 = vrot.lane.b32.xlu0 %v254_v25, %s2731_s4  ;;  %v292_v24 = vld [vmem:[%s2821_s30 + $0x16a] sm:$0xff] }
  0x50   : > { %574 = vrot.lane.b32.xlu1 %v257_v26, %s2731_s4  ;;  %572 = vrot.lane.b32.xlu0 %v256_v27, %s2731_s4 }
  0x54   : > { %578 = vrot.lane.b32.xlu1 %v259_v28, %s2731_s4  ;;  %576 = vrot.lane.b32.xlu0 %v258_v29, %s2731_s4  ;;  %v3076_v29 = vld [vmem:[%s2821_s30 + $0x18] sm:$0xff] }
  0x55   : > { %4401 = vst [vmem:[#allocation25_spill] sm:$0xff] %v3076_v29 }
  0x58   : > { %582 = vrot.lane.b32.xlu1 %v261_v30, %s2731_s4  ;;  %580 = vrot.lane.b32.xlu0 %v260_v31, %s2731_s4  ;;  %v3079_v30 = vld [vmem:[%s2821_s30 + $0x20] sm:$0xff] }
  0x59   : > { %4402 = vst [vmem:[#allocation26_spill] sm:$0xff] %v3079_v30 }
  0x5c   : > { %650 = vrot.lane.b32.xlu1 %v263_v32, %s2732_s5  ;;  %648 = vrot.lane.b32.xlu0 %v262_v33, %s2732_s5  ;;  %v3090_v33 = vld [vmem:[%s2821_s30 + $0x38] sm:$0xff] }
  0x60   : > { %654 = vrot.lane.b32.xlu1 %v2955_v34, %s2732_s5  ;;  %652 = vrot.lane.b32.xlu0 %v2958_v35, %s2732_s5 }
  0x64   : > { %658 = vrot.lane.b32.xlu1 %v2965_v36, %s2732_s5  ;;  %656 = vrot.lane.b32.xlu0 %v2968_v37, %s2732_s5 }
  0x68   : > { %662 = vrot.lane.b32.xlu1 %v2975_v38, %s2732_s5  ;;  %660 = vrot.lane.b32.xlu0 %v2978_v39, %s2732_s5 }
  0x6c   : > { %666 = vrot.lane.b32.xlu1 %v271_v40, %s2732_s5  ;;  %664 = vrot.lane.b32.xlu0 %v2986_v41, %s2732_s5  ;;  %v3093_v40 = vld [vmem:[%s2821_s30 + $0x30] sm:$0xff]  ;;  %v3169_v41 = vld [vmem:[%s2821_s30 + $0xc0] sm:$0xff] }
  0x6d   : > { %4408 = vst [vmem:[#allocation32_spill] sm:$0xff] %v3169_v41 }
  0x70   : > { %670 = vrot.lane.b32.xlu1 %v273_v42, %s2732_s5  ;;  %668 = vrot.lane.b32.xlu0 %v272_v43, %s2732_s5 }
  0x74   : > { %674 = vrot.lane.b32.xlu1 %v275_v44, %s2732_s5  ;;  %672 = vrot.lane.b32.xlu0 %v274_v45, %s2732_s5  ;;  %v3104_v44 = vld [vmem:[%s2821_s30 + $0x50] sm:$0xff]  ;;  %v3107_v45 = vld [vmem:[%s2821_s30 + $0x48] sm:$0xff] }
  0x78   : > { %678 = vrot.lane.b32.xlu1 %v277_v46, %s2732_s5  ;;  %676 = vrot.lane.b32.xlu0 %v276_v47, %s2732_s5  ;;  %v211_v46 = vld [vmem:[%s2821_s30 + $0x98] sm:$0xff]  ;;  %v210_v47 = vld [vmem:[%s2821_s30 + $0x90] sm:$0xff] }
  0x7c   : > { %682 = vrot.lane.b32.xlu1 %v279_v48, %s2732_s5  ;;  %680 = vrot.lane.b32.xlu0 %v278_v49, %s2732_s5 }
  0x80   : > { %686 = vrot.lane.b32.xlu1 %v3008_v50, %s2732_s5  ;;  %684 = vrot.lane.b32.xlu0 %v3011_v51, %s2732_s5 }
  0x84   : > { %690 = vrot.lane.b32.xlu1 %v3018_v52, %s2732_s5  ;;  %688 = vrot.lane.b32.xlu0 %v3021_v53, %s2732_s5  ;;  %v228_v52 = vld [vmem:[%s2821_s30 + $0x168] sm:$0xff]  ;;  %v3234_v53 = vld [vmem:[%s2821_s30 + $0x140] sm:$0xff] }
  0x88   : > { %694 = vrot.lane.b32.xlu1 %v3028_v54, %s2732_s5  ;;  %692 = vrot.lane.b32.xlu0 %v3031_v55, %s2732_s5  ;;  %v3211_v54 = vld [vmem:[%s2821_s30 + $0x108] sm:$0xff] }
  0x89   : > { %v3222_v55 = vld [vmem:[%s2821_s30 + $0x128] sm:$0xff] }
  0x8c   : > { %698 = vrot.lane.b32.xlu1 %v3038_v56, %s2732_s5  ;;  %696 = vrot.lane.b32.xlu0 %v3041_v57, %s2732_s5  ;;  %v3208_v57 = vld [vmem:[%s2821_s30 + $0x110] sm:$0xff] }
  0x8e   : > { %v3049_v60 = vpop.permute.xlu1 %524  ;;  %v3051_v61 = vpop.permute.xlu0 %520 }
  0x8f   : > { %4397 = vst [vmem:[#allocation21_spill] sm:$0xff] %v3049_v60  ;;  %4398 = vst [vmem:[#allocation22_spill] sm:$0xff] %v3051_v61  ;;  %v3137_v60 = vld [vmem:[%s2821_s30 + $0x78] sm:$0xff] }
  0x90   : > { %702 = vrot.lane.b32.xlu1 %v289_v58, %s2732_s5  ;;  %700 = vrot.lane.b32.xlu0 %v288_v59, %s2732_s5  ;;  %v3116_v58 = vld [vmem:[%s2821_s30 + $0x68] sm:$0xff]  ;;  %v3119_v59 = vld [vmem:[%s2821_s30 + $0x60] sm:$0xff] }
  0x92   : > { %v3057_v1 = vpop.permute.xlu1 %526  ;;  %v3059_v3 = vpop.permute.xlu0 %522 }
  0x93   : > { %4399 = vst [vmem:[#allocation23_spill] sm:$0xff] %v3057_v1  ;;  %4400 = vst [vmem:[#allocation24_spill] sm:$0xff] %v3059_v3 }
  0x94   : > { %706 = vrot.lane.b32.xlu1 %v291_v62, %s2732_s5  ;;  %704 = vrot.lane.b32.xlu0 %v290_v63, %s2732_s5 }
  0x96   : > { %v3065_v25 = vpop.permute.xlu1 %530  ;;  %v3067_v26 = vpop.permute.xlu0 %528 }
  0x98   : > { %710 = vrot.lane.b32.xlu1 %v293_v16, %s2732_s5  ;;  %708 = vrot.lane.b32.xlu0 %v292_v24, %s2732_s5  ;;  %v213_v16 = vld [vmem:[%s2821_s30 + $0xb0] sm:$0xff]  ;;  %v212_v24 = vld [vmem:[%s2821_s30 + $0xa8] sm:$0xff] }
  0x9a   : > { %v3071_v27 = vpop.permute.xlu1 %534  ;;  %v3073_v28 = vpop.permute.xlu0 %532 }
  0x9c   : > { %778 = vrot.lane.b32.xlu1 %v3079_v30, %s2733_s6  ;;  %776 = vrot.lane.b32.xlu0 %v3076_v29, %s2733_s6  ;;  %v3134_v29 = vld [vmem:[%s2821_s30 + $0x80] sm:$0xff] }
  0x9e   : > { %v3085_v31 = vpop.permute.xlu1 %538  ;;  %v3087_v32 = vpop.permute.xlu0 %536 }
  0xa0   : > { %782 = vrot.lane.b32.xlu1 %v3090_v33, %s2733_s6  ;;  %780 = vrot.lane.b32.xlu0 %v3093_v40, %s2733_s6 }
  0xa2   : > { %v3099_v42 = vpop.permute.xlu1 %542  ;;  %v3101_v43 = vpop.permute.xlu0 %540 }
  0xa4   : > { %786 = vrot.lane.b32.xlu1 %v3104_v44, %s2733_s6  ;;  %784 = vrot.lane.b32.xlu0 %v3107_v45, %s2733_s6 }
  0xa6   : > { %v547_v48 = vpop.permute.xlu1 %546  ;;  %v545_v49 = vpop.permute.xlu0 %544 }
  0xa7   : > { %v3122_v62 = vsel %vm1512_vm0, %v211_v46, %v547_v48  ;;  %v3125_v63 = vsel %vm1512_vm0, %v210_v47, %v545_v49 }
  0xa8   : > { %790 = vrot.lane.b32.xlu1 %v3116_v58, %s2733_s6  ;;  %788 = vrot.lane.b32.xlu0 %v3119_v59, %s2733_s6 }
  0xaa   : > { %v551_v30 = vpop.permute.xlu1 %550  ;;  %v549_v1 = vpop.permute.xlu0 %548 }
  0xab   : > { %v3140_v48 = vsel %vm1512_vm0, %v213_v16, %v551_v30  ;;  %v3143_v49 = vsel %vm1512_vm0, %v212_v24, %v549_v1 }
  0xac   : > { %794 = vrot.lane.b32.xlu1 %v3134_v29, %s2733_s6  ;;  %792 = vrot.lane.b32.xlu0 %v3137_v60, %s2733_s6 }
  0xae   : > { %v3149_v3 = vpop.permute.xlu1 %554  ;;  %v3151_v61 = vpop.permute.xlu0 %552 }
  0xaf   : > { %4403 = vst [vmem:[#allocation27_spill] sm:$0xff] %v3149_v3  ;;  %4404 = vst [vmem:[#allocation28_spill] sm:$0xff] %v3151_v61  ;;  %v3166_v61 = vld [vmem:[%s2821_s30 + $0xc8] sm:$0xff] }
  0xb0   : > { %798 = vrot.lane.b32.xlu1 %v211_v46, %s2733_s6  ;;  %796 = vrot.lane.b32.xlu0 %v210_v47, %s2733_s6  ;;  %4407 = vst [vmem:[#allocation31_spill] sm:$0xff] %v3166_v61 }
  0xb2   : > { %v3155_v30 = vpop.permute.xlu1 %558  ;;  %v3157_v1 = vpop.permute.xlu0 %556 }
  0xb3   : > { %4405 = vst [vmem:[#allocation29_spill] sm:$0xff] %v3155_v30  ;;  %4406 = vst [vmem:[#allocation30_spill] sm:$0xff] %v3157_v1 }
  0xb4   : > { %802 = vrot.lane.b32.xlu1 %v213_v16, %s2733_s6  ;;  %800 = vrot.lane.b32.xlu0 %v212_v24, %s2733_s6  ;;  %v3180_v16 = vld [vmem:[%s2821_s30 + $0xe0] sm:$0xff]  ;;  %v3183_v24 = vld [vmem:[%s2821_s30 + $0xd8] sm:$0xff] }
  0xb5   : > { %4409 = vst [vmem:[#allocation33_spill] sm:$0xff] %v3180_v16  ;;  %4410 = vst [vmem:[#allocation34_spill] sm:$0xff] %v3183_v24 }
  0xb6   : > { %v3161_v56 = vpop.permute.xlu1 %562  ;;  %v3163_v3 = vpop.permute.xlu0 %560 }
  0xb8   : > { %806 = vrot.lane.b32.xlu1 %v3166_v61, %s2733_s6  ;;  %804 = vrot.lane.b32.xlu0 %v3169_v41, %s2733_s6  ;;  %v3194_v61 = vld [vmem:[%s2821_s30 + $0xf8] sm:$0xff]  ;;  %v3197_v41 = vld [vmem:[%s2821_s30 + $0xf0] sm:$0xff] }
  0xba   : > { %v3175_v46 = vpop.permute.xlu1 %566  ;;  %v3177_v47 = vpop.permute.xlu0 %564 }
  0xbc   : > { %810 = vrot.lane.b32.xlu1 %v3180_v16, %s2733_s6  ;;  %808 = vrot.lane.b32.xlu0 %v3183_v24, %s2733_s6 }
  0xbe   : > { %v3189_v30 = vpop.permute.xlu1 %570  ;;  %v3191_v1 = vpop.permute.xlu0 %568 }
  0xc0   : > { %814 = vrot.lane.b32.xlu1 %v3194_v61, %s2733_s6  ;;  %812 = vrot.lane.b32.xlu0 %v3197_v41, %s2733_s6 }
  0xc2   : > { %v3203_v16 = vpop.permute.xlu1 %574  ;;  %v3205_v24 = vpop.permute.xlu0 %572 }
  0xc3   : > { %4411 = vst [vmem:[#allocation35_spill] sm:$0xff] %v3203_v16  ;;  %4412 = vst [vmem:[#allocation36_spill] sm:$0xff] %v3205_v24  ;;  %v3254_v24 = vld [vmem:[%s2821_s30 + $0x158] sm:$0xff]  ;;  %v3257_v16 = vld [vmem:[%s2821_s30 + $0x150] sm:$0xff] }
  0xc4   : > { %818 = vrot.lane.b32.xlu1 %v3208_v57, %s2733_s6  ;;  %816 = vrot.lane.b32.xlu0 %v3211_v54, %s2733_s6  ;;  %4419 = vst [vmem:[#allocation43_spill] sm:$0xff] %v3254_v24  ;;  %4420 = vst [vmem:[#allocation44_spill] sm:$0xff] %v3257_v16 }
  0xc6   : > { %v3217_v38 = vpop.permute.xlu1 %578  ;;  %v3219_v39 = vpop.permute.xlu0 %576 }
  0xc7   : > { %4413 = vst [vmem:[#allocation37_spill] sm:$0xff] %v3217_v38  ;;  %4414 = vst [vmem:[#allocation38_spill] sm:$0xff] %v3219_v39 }
  0xc8   : > { %822 = vrot.lane.b32.xlu1 %v3222_v55, %s2733_s6  ;;  %820 = vrot.lane.b32.xlu0 %v3225_v22, %s2733_s6 }
  0xca   : > { %v583_v36 = vpop.permute.xlu1 %582  ;;  %v581_v37 = vpop.permute.xlu0 %580 }
  0xcb   : > { %v3240_v21 = vsel %vm1512_vm0, %v229_v23, %v583_v36  ;;  %v3243_v39 = vsel %vm1512_vm0, %v228_v52, %v581_v37 }
  0xcc   : > { %4415 = vst [vmem:[#allocation39_spill] sm:$0xff] %v3240_v21  ;;  %4416 = vst [vmem:[#allocation40_spill] sm:$0xff] %v3243_v39  ;;  %826 = vrot.lane.b32.xlu1 %v3234_v53, %s2733_s6  ;;  %824 = vrot.lane.b32.xlu0 %v3237_v20, %s2733_s6  ;;  %v1518_v39 = vsel %vm1512_vm0, %v3090_v33, %v3065_v25  ;;  %v1517_v21 = vsel %vm1512_vm0, %v3093_v40, %v3067_v26 }
  0xcd   : > { %v1519_v25 = vsel %vm1512_vm0, %v3107_v45, %v3073_v28 }
  0xce   : > { %v3249_v38 = vpop.permute.xlu1 %650  ;;  %v3251_v50 = vpop.permute.xlu0 %648 }
  0xcf   : > { %4417 = vst [vmem:[#allocation41_spill] sm:$0xff] %v3249_v38  ;;  %4418 = vst [vmem:[#allocation42_spill] sm:$0xff] %v3251_v50  ;;  %v2282_v38 = vld [vmem:[%s2821_s30 + $0x188] sm:$0xff]  ;;  %v2281_v50 = vld [vmem:[%s2821_s30 + $0x180] sm:$0xff] }
  0xd0   : > { %830 = vrot.lane.b32.xlu1 %v3254_v24, %s2733_s6  ;;  %828 = vrot.lane.b32.xlu0 %v3257_v16, %s2733_s6 }
  0xd2   : > { %v3263_v36 = vpop.permute.xlu1 %654  ;;  %v3265_v37 = vpop.permute.xlu0 %652 }
  0xd3   : > { %4421 = vst [vmem:[#allocation45_spill] sm:$0xff] %v3263_v36  ;;  %4422 = vst [vmem:[#allocation46_spill] sm:$0xff] %v3265_v37 }
  0xd4   : > { %834 = vrot.lane.b32.xlu1 %v229_v23, %s2733_s6  ;;  %832 = vrot.lane.b32.xlu0 %v228_v52, %s2733_s6  ;;  %v1520_v52 = vsel %vm1512_vm0, %v3104_v44, %v3071_v27 }
  0xd6   : > { %v659_v16 = vpop.permute.xlu1 %658  ;;  %v657_v24 = vpop.permute.xlu0 %656 }
  0xd7   : > { %v3278_v36 = vsel %vm1545_vm1, %v1518_v39, %v659_v16  ;;  %v3281_v23 = vsel %vm1545_vm1, %v1517_v21, %v657_v24 }
  0xd8   : > { %838 = vrot.lane.b32.xlu1 %v2282_v38, %s2733_s6  ;;  %836 = vrot.lane.b32.xlu0 %v2281_v50, %s2733_s6  ;;  %v1522_v38 = vsel %vm1512_vm0, %v3116_v58, %v3085_v31  ;;  %v1521_v50 = vsel %vm1512_vm0, %v3119_v59, %v3087_v32  ;;  %s2738_s6 = smov 32  }
  0xda   : > { %v663_v26 = vpop.permute.xlu1 %662  ;;  %v661_v37 = vpop.permute.xlu0 %660 }
  0xdb   : > { %v3292_v39 = vsel %vm1545_vm1, %v1520_v52, %v663_v26  ;;  %v3295_v21 = vsel %vm1545_vm1, %v1519_v25, %v661_v37 }
  0xdc   : > { %906 = vrot.lane.b32.xlu1 %v2831_v2, %s2734_s7  ;;  %904 = vrot.lane.b32.xlu0 %v2824_v0, %s2734_s7  ;;  %v1524_v0 = vsel %vm1512_vm0, %v3134_v29, %v3099_v42  ;;  %v1523_v2 = vsel %vm1512_vm0, %v3137_v60, %v3101_v43 }
  0xde   : > { %v667_v27 = vpop.permute.xlu1 %666  ;;  %v665_v28 = vpop.permute.xlu0 %664 }
  0xdf   : > { %v3308_v16 = vsel %vm1545_vm1, %v1522_v38, %v667_v27  ;;  %v3311_v24 = vsel %vm1545_vm1, %v1521_v50, %v665_v28 }
  0xe0   : > { %910 = vrot.lane.b32.xlu1 %v2838_v4, %s2734_s7  ;;  %908 = vrot.lane.b32.xlu0 %v2841_v5, %s2734_s7 }
  0xe2   : > { %v671_v31 = vpop.permute.xlu1 %670  ;;  %v669_v32 = vpop.permute.xlu0 %668 }
  0xe3   : > { %v3324_v37 = vsel %vm1545_vm1, %v1524_v0, %v671_v31  ;;  %v3327_v52 = vsel %vm1545_vm1, %v1523_v2, %v669_v32 }
  0xe4   : > { %914 = vrot.lane.b32.xlu1 %v2848_v6, %s2734_s7  ;;  %912 = vrot.lane.b32.xlu0 %v2851_v7, %s2734_s7 }
  0xe6   : > { %v675_v25 = vpop.permute.xlu1 %674  ;;  %v673_v42 = vpop.permute.xlu0 %672 }
  0xe7   : > { %v3335_v26 = vsel %vm1545_vm1, %v3122_v62, %v675_v25  ;;  %v3339_v43 = vsel %vm1545_vm1, %v3125_v63, %v673_v42 }
  0xe8   : > { %918 = vrot.lane.b32.xlu1 %v2858_v8, %s2734_s7  ;;  %916 = vrot.lane.b32.xlu0 %v2861_v9, %s2734_s7 }
  0xea   : > { %v679_v38 = vpop.permute.xlu1 %678  ;;  %v677_v50 = vpop.permute.xlu0 %676 }
  0xeb   : > { %v3347_v27 = vsel %vm1545_vm1, %v3140_v48, %v679_v38  ;;  %v3351_v62 = vsel %vm1545_vm1, %v3143_v49, %v677_v50 }
  0xec   : > { %922 = vrot.lane.b32.xlu1 %v2868_v10, %s2734_s7  ;;  %920 = vrot.lane.b32.xlu0 %v2871_v11, %s2734_s7  ;;  %v1534_v10 = vsel %vm1512_vm0, %v3194_v61, %v3161_v56  ;;  %v1533_v11 = vsel %vm1512_vm0, %v3197_v41, %v3163_v3 }
  0xee   : > { %v3357_v8 = vpop.permute.xlu1 %682  ;;  %v3359_v63 = vpop.permute.xlu0 %680 }
  0xf0   : > { %926 = vrot.lane.b32.xlu1 %v2878_v12, %s2734_s7  ;;  %924 = vrot.lane.b32.xlu0 %v2881_v13, %s2734_s7 }
  0xf2   : > { %v3365_v9 = vpop.permute.xlu1 %686  ;;  %v3367_v48 = vpop.permute.xlu0 %684 }
  0xf4   : > { %930 = vrot.lane.b32.xlu1 %v2888_v14, %s2734_s7  ;;  %928 = vrot.lane.b32.xlu0 %v2891_v15, %s2734_s7  ;;  %v1536_v14 = vsel %vm1512_vm0, %v3208_v57, %v3175_v46  ;;  %v1535_v15 = vsel %vm1512_vm0, %v3211_v54, %v3177_v47 }
  0xf6   : > { %v691_v12 = vpop.permute.xlu1 %690  ;;  %v689_v13 = vpop.permute.xlu0 %688 }
  0xf7   : > { %v3380_v49 = vsel %vm1545_vm1, %v1534_v10, %v691_v12  ;;  %v3383_v28 = vsel %vm1545_vm1, %v1533_v11, %v689_v13  ;;  %v4427_v10 = vld [vmem:[#allocation43_spill] sm:$0xff]  ;;  %v4428_v12 = vld [vmem:[#allocation38_spill] sm:$0xff]  ;;  %v4429_v13 = vld [vmem:[#allocation44_spill] sm:$0xff] }
  0xf8   : > { %936 = vrot.lane.b32.xlu1 %v2908_v19, %s2734_s7  ;;  %932 = vrot.lane.b32.xlu0 %v2899_v17, %s2734_s7  ;;  %v1538_v17 = vsel %vm1512_vm0, %v3222_v55, %v3189_v30  ;;  %v1537_v19 = vsel %vm1512_vm0, %v3225_v22, %v3191_v1  ;;  %v4424_v30 = vld [vmem:[#allocation36_spill] sm:$0xff] }
  0xf9   : > { %v1539_v1 = vsel %vm1512_vm0, %v3237_v20, %v4424_v30  ;;  %v1778_v30 = vld [vmem:[%s4335_s1 + $0x10] sm:$0xff] }
  0xfa   : > { %v695_v56 = vpop.permute.xlu1 %694  ;;  %v693_v3 = vpop.permute.xlu0 %692 }
  0xfb   : > { %v3396_v0 = vsel %vm1545_vm1, %v1536_v14, %v695_v56  ;;  %v3399_v2 = vsel %vm1545_vm1, %v1535_v15, %v693_v3  ;;  %v1541_v14 = vsel %vm1512_vm0, %v4429_v13, %v4428_v12 }
  0xfc   : > { %1032 = vrot.lane.b32.xlu1 %v2958_v35, %s2735_s8  ;;  %938 = vrot.lane.b32.xlu0 %v2905_v18, %s2734_s7  ;;  %v4423_v18 = vld [vmem:[#allocation35_spill] sm:$0xff] }
  0xfd   : > { %v1540_v35 = vsel %vm1512_vm0, %v3234_v53, %v4423_v18  ;;  %v4430_v18 = vld [vmem:[#allocation39_spill] sm:$0xff] }
  0xfe   : > { %v699_v46 = vpop.permute.xlu1 %698  ;;  %v697_v47 = vpop.permute.xlu0 %696 }
  0xff   : > { %v3412_v31 = vsel %vm1545_vm1, %v1538_v17, %v699_v46  ;;  %v3415_v32 = vsel %vm1545_vm1, %v1537_v19, %v697_v47  ;;  %v1779_v47 = vld [vmem:[%s4335_s1 + $0x18] sm:$0xff] }
 0x100   : > { %1034 = vrot.lane.b32.xlu1 %v2955_v34, %s2735_s8  ;;  %1064 = vrot.lane.b32.xlu0 %v3011_v51, %s2735_s8  ;;  %v4425_v34 = vld [vmem:[#allocation14_spill] sm:$0xff]  ;;  %v4426_v51 = vld [vmem:[#allocation37_spill] sm:$0xff] }
 0x101   : > { %v1542_v11 = vsel %vm1512_vm0, %v4427_v10, %v4426_v51 }
 0x102   : > { %v703_v25 = vpop.permute.xlu1 %702  ;;  %v701_v42 = vpop.permute.xlu0 %700 }
 0x103   : > { %v3428_v38 = vsel %vm1545_vm1, %v1540_v35, %v703_v25  ;;  %v3431_v50 = vsel %vm1545_vm1, %v1539_v1, %v701_v42  ;;  %v1776_v42 = vld [vmem:[%s4335_s1] sm:$0xff] }
 0x104   : > { %1160 = vrot.lane.b32.xlu1 %v3093_v40, %s2736_s9  ;;  %1066 = vrot.lane.b32.xlu0 %v4425_v34, %s2735_s8  ;;  %v1780_v40 = vld [vmem:[%s4335_s1 + $0x20] sm:$0xf] }
 0x105   : > { %2520 = vmatprep.subr.msk.mxu0 %vm1885_vm2, %v1780_v40  ;;  %2578 = vmatprep.subr.msk.mxu1 %vm1885_vm2, %v1780_v40 }
 0x106   : > { %v707_v15 = vpop.permute.xlu1 %706  ;;  %v705_v56 = vpop.permute.xlu0 %704  ;;  %2521 = vmatpush3.msk.msra.mxu0 %vm1885_vm2, %v1780_v40  ;;  %2583 = vmatpush3.msk.msra.mxu1 %vm1885_vm2, %v1780_v40  ;;  %v4434_v40 = vld [vmem:[#allocation16_spill] sm:$0xff] }
 0x107   : > { %v3444_v3 = vsel %vm1545_vm1, %v1542_v11, %v707_v15  ;;  %v3447_v17 = vsel %vm1545_vm1, %v1541_v14, %v705_v56  ;;  %2522 = vmatprep.subr.mxu0 %v1779_v47  ;;  %2579 = vmatprep.subr.mxu1 %v1779_v47  ;;  %v4433_v11 = vld [vmem:[#allocation5_spill] sm:$0xff] }
 0x108   : > { %1162 = vrot.lane.b32.xlu1 %v3090_v33, %s2736_s9  ;;  %1192 = vrot.lane.b32.xlu0 %v3197_v41, %s2736_s9  ;;  %v4431_v41 = vld [vmem:[#allocation40_spill] sm:$0xff] }
 0x109   : > { %2523 = vmatpush3.msra.mxu0 %v1779_v47  ;;  %2584 = vmatpush3.msra.mxu1 %v1779_v47 }
 0x10a   : > { %v711_v19 = vpop.permute.xlu1 %710  ;;  %v709_v46 = vpop.permute.xlu0 %708  ;;  %2524 = vmatprep.subr.mxu0 %v1778_v30  ;;  %2580 = vmatprep.subr.mxu1 %v1778_v30 }
 0x10b   : > { %v3461_v33 = vsel %vm1545_vm1, %v4430_v18, %v711_v19  ;;  %v3465_v35 = vsel %vm1545_vm1, %v4431_v41, %v709_v46  ;;  %2525 = vmatpush3.msra.mxu0 %v1778_v30  ;;  %2585 = vmatpush3.msra.mxu1 %v1778_v30  ;;  %v4435_v19 = vld [vmem:[#allocation10_spill] sm:$0xff]  ;;  %v4436_v30 = vld [vmem:[#allocation9_spill] sm:$0xff] }
 0x10c   : > { %1288 = vrot.lane.b32.xlu1 %v2841_v5, %s2737_s21  ;;  %1194 = vrot.lane.b32.xlu0 %v3194_v61, %s2736_s9  ;;  %v1777_v5 = vld [vmem:[%s4335_s1 + $0x8] sm:$0xff] }
 0x10d   : > { %v4432_v61 = vld [vmem:[#allocation6_spill] sm:$0xff]  ;;  %2526 = vmatprep.subr.mxu0 %v1777_v5  ;;  %2581 = vmatprep.subr.mxu1 %v1777_v5 }
 0x10e   : > { %v3474_v1 = vpop.permute.xlu1 %778  ;;  %v3476_v25 = vpop.permute.xlu0 %776  ;;  %2527 = vmatpush3.msra.mxu0 %v1777_v5  ;;  %2586 = vmatpush3.msra.mxu1 %v1777_v5 }
 0x10f   : > { %2528 = vmatprep.subr.mxu0 %v1776_v42  ;;  %2582 = vmatprep.subr.mxu1 %v1776_v42 }
 0x110   : > { %940 = vrot.lane.b32.xlu1 %v4432_v61, %s2734_s7  ;;  %1320 = vrot.lane.b32.xlu0 %v4432_v61, %s2737_s21 }
 0x111   : > { %2529 = vmatpush3.msra.mxu0 %v1776_v42  ;;  %2587 = vmatpush3.msra.mxu1 %v1776_v42 }
 0x112   : > { %v3488_v34 = vpop.permute.xlu1 %782  ;;  %v3490_v51 = vpop.permute.xlu0 %780 }
 0x114   : > { %1322 = vrot.lane.b32.xlu1 %v4433_v11, %s2737_s21  ;;  %1290 = vrot.lane.b32.xlu0 %v2838_v4, %s2737_s21 }
 0x116   : > { %v787_v12 = vpop.permute.xlu1 %786  ;;  %v785_v14 = vpop.permute.xlu0 %784 }
 0x117   : > { %v3498_v15 = vsel %vm1578_vm3, %v3278_v36, %v787_v12  ;;  %v3502_v56 = vsel %vm1578_vm3, %v3281_v23, %v785_v14 }
 0x118   : > { %1448 = vrot.lane.b32.xlu1 %v4434_v40, %s2738_s6  ;;  %1416 = vrot.lane.b32.xlu0 %v4435_v19, %s2738_s6 }
 0x11a   : > { %v791_v4 = vpop.permute.xlu1 %790  ;;  %v789_v46 = vpop.permute.xlu0 %788 }
 0x11b   : > { %v3510_v47 = vsel %vm1578_vm3, %v3292_v39, %v791_v4  ;;  %v3514_v36 = vsel %vm1578_vm3, %v3295_v21, %v789_v46 }
 0x11c   : > { %1036 = vrot.lane.b32.xlu1 %v4435_v19, %s2735_s8  ;;  %942 = vrot.lane.b32.xlu0 %v4433_v11, %s2734_s7  ;;  %v4443_v19 = vld [vmem:[#allocation8_spill] sm:$0xff] }
 0x11e   : > { %v795_v23 = vpop.permute.xlu1 %794  ;;  %v793_v18 = vpop.permute.xlu0 %792 }
 0x11f   : > { %v3522_v41 = vsel %vm1578_vm3, %v3308_v16, %v795_v23  ;;  %v3526_v39 = vsel %vm1578_vm3, %v3311_v24, %v793_v18  ;;  %v4438_v24 = vld [vmem:[#allocation15_spill] sm:$0xff] }
 0x120   : > { %1418 = vrot.lane.b32.xlu1 %v4436_v30, %s2738_s6  ;;  %1068 = vrot.lane.b32.xlu0 %v4434_v40, %s2735_s8 }
 0x122   : > { %v799_v21 = vpop.permute.xlu1 %798  ;;  %v797_v5 = vpop.permute.xlu0 %796 }
 0x123   : > { %v3534_v61 = vsel %vm1578_vm3, %v3324_v37, %v799_v21  ;;  %v3538_v16 = vsel %vm1578_vm3, %v3327_v52, %v797_v5 }
 0x124   : > { %4437 = vst [vmem:[#allocation35_spill] sm:$0xff] %v3534_v61  ;;  %1038 = vrot.lane.b32.xlu1 %v4436_v30, %s2735_s8  ;;  %1450 = vrot.lane.b32.xlu0 %v4438_v24, %s2738_s6  ;;  %v4445_v30 = vld [vmem:[#allocation18_spill] sm:$0xff] }
 0x125   : > { %v4465_v61 = vld [vmem:[#allocation42_spill] sm:$0xff] }
 0x126   : > { %v803_v42 = vpop.permute.xlu1 %802  ;;  %v801_v11 = vpop.permute.xlu0 %800 }
 0x127   : > { %v3546_v12 = vsel %vm1578_vm3, %v3335_v26, %v803_v42  ;;  %v3550_v37 = vsel %vm1578_vm3, %v3339_v43, %v801_v11  ;;  %v4449_v11 = vld [vmem:[#allocation11_spill] sm:$0xff] }
 0x128   : > { %4439 = vst [vmem:[#allocation36_spill] sm:$0xff] %v3546_v12  ;;  %4440 = vst [vmem:[#allocation14_spill] sm:$0xff] %v3550_v37  ;;  %1164 = vrot.lane.b32.xlu1 %v3107_v45, %s2736_s9  ;;  %1070 = vrot.lane.b32.xlu0 %v4438_v24, %s2735_s8 }
 0x12a   : > { %v807_v52 = vpop.permute.xlu1 %806  ;;  %v805_v14 = vpop.permute.xlu0 %804 }
 0x12b   : > { %v3558_v40 = vsel %vm1578_vm3, %v3347_v27, %v807_v52  ;;  %v3562_v26 = vsel %vm1578_vm3, %v3351_v62, %v805_v14 }
 0x12c   : > { %4441 = vst [vmem:[#allocation37_spill] sm:$0xff] %v3558_v40  ;;  %4442 = vst [vmem:[#allocation43_spill] sm:$0xff] %v3562_v26  ;;  %1166 = vrot.lane.b32.xlu1 %v3104_v44, %s2736_s9  ;;  %1196 = vrot.lane.b32.xlu0 %v3211_v54, %s2736_s9 }
 0x12e   : > { %v3568_v45 = vpop.permute.xlu1 %810  ;;  %v3570_v43 = vpop.permute.xlu0 %808 }
 0x130   : > { %1292 = vrot.lane.b32.xlu1 %v2851_v7, %s2737_s21  ;;  %1198 = vrot.lane.b32.xlu0 %v3208_v57, %s2736_s9  ;;  %v4444_v57 = vld [vmem:[#allocation7_spill] sm:$0xff] }
 0x132   : > { %v3576_v27 = vpop.permute.xlu1 %814  ;;  %v3578_v62 = vpop.permute.xlu0 %812 }
 0x134   : > { %944 = vrot.lane.b32.xlu1 %v4443_v19, %s2734_s7  ;;  %1324 = vrot.lane.b32.xlu0 %v4443_v19, %s2737_s21 }
 0x136   : > { %v819_v54 = vpop.permute.xlu1 %818  ;;  %v817_v44 = vpop.permute.xlu0 %816 }
 0x137   : > { %v3586_v4 = vsel %vm1578_vm3, %v3380_v49, %v819_v54  ;;  %v3590_v7 = vsel %vm1578_vm3, %v3383_v28, %v817_v44  ;;  %v4446_v28 = vld [vmem:[#allocation12_spill] sm:$0xff] }
 0x138   : > { %1326 = vrot.lane.b32.xlu1 %v4444_v57, %s2737_s21  ;;  %1294 = vrot.lane.b32.xlu0 %v2848_v6, %s2737_s21 }
 0x13a   : > { %v823_v46 = vpop.permute.xlu1 %822  ;;  %v821_v23 = vpop.permute.xlu0 %820 }
 0x13b   : > { %v3598_v18 = vsel %vm1578_vm3, %v3396_v0, %v823_v46  ;;  %v3602_v49 = vsel %vm1578_vm3, %v3399_v2, %v821_v23 }
 0x13c   : > { %1452 = vrot.lane.b32.xlu1 %v4445_v30, %s2738_s6  ;;  %1420 = vrot.lane.b32.xlu0 %v4446_v28, %s2738_s6 }
 0x13e   : > { %v827_v21 = vpop.permute.xlu1 %826  ;;  %v825_v5 = vpop.permute.xlu0 %824 }
 0x13f   : > { %v3610_v6 = vsel %vm1578_vm3, %v3412_v31, %v827_v21  ;;  %v3614_v0 = vsel %vm1578_vm3, %v3415_v32, %v825_v5 }
 0x140   : > { %1040 = vrot.lane.b32.xlu1 %v4446_v28, %s2735_s8  ;;  %946 = vrot.lane.b32.xlu0 %v4444_v57, %s2734_s7 }
 0x142   : > { %v831_v2 = vpop.permute.xlu1 %830  ;;  %v829_v24 = vpop.permute.xlu0 %828 }
 0x143   : > { %v3622_v42 = vsel %vm1578_vm3, %v3428_v38, %v831_v2  ;;  %v3626_v31 = vsel %vm1578_vm3, %v3431_v50, %v829_v24  ;;  %v4452_v50 = vld [vmem:[#allocation17_spill] sm:$0xff]  ;;  %v4455_v2 = vld [vmem:[#allocation20_spill] sm:$0xff] }
 0x144   : > { %4447 = vst [vmem:[#allocation38_spill] sm:$0xff] %v3622_v42  ;;  %4448 = vst [vmem:[#allocation44_spill] sm:$0xff] %v3626_v31  ;;  %1422 = vrot.lane.b32.xlu1 %v4449_v11, %s2738_s6  ;;  %1072 = vrot.lane.b32.xlu0 %v4445_v30, %s2735_s8  ;;  %v4456_v24 = vld [vmem:[#allocation13_spill] sm:$0xff] }
 0x146   : > { %v835_v32 = vpop.permute.xlu1 %834  ;;  %v833_v52 = vpop.permute.xlu0 %832 }
 0x147   : > { %v3634_v14 = vsel %vm1578_vm3, %v3444_v3, %v835_v32  ;;  %v3638_v38 = vsel %vm1578_vm3, %v3447_v17, %v833_v52  ;;  %v2416_v52 = vld [vmem:[%s2821_s30 + $0x6a] sm:$0xff] }
 0x148   : > { %4450 = vst [vmem:[#allocation39_spill] sm:$0xff] %v3634_v14  ;;  %4451 = vst [vmem:[#allocation40_spill] sm:$0xff] %v3638_v38  ;;  %1042 = vrot.lane.b32.xlu1 %v4449_v11, %s2735_s8  ;;  %1454 = vrot.lane.b32.xlu0 %v4452_v50, %s2738_s6  ;;  %v2433_v14 = vld [vmem:[%s2821_s30 + $0x13a] sm:$0xff]  ;;  %v4462_v38 = vld [vmem:[#allocation22_spill] sm:$0xff] }
 0x14a   : > { %v839_v19 = vpop.permute.xlu1 %838  ;;  %v837_v54 = vpop.permute.xlu0 %836 }
 0x14b   : > { %v3646_v44 = vsel %vm1578_vm3, %v3461_v33, %v839_v19  ;;  %v3650_v3 = vsel %vm1578_vm3, %v3465_v35, %v837_v54  ;;  %v2383_v33 = vld [vmem:[%s2821_s30 + $0x61] sm:$0xff] }
 0x14c   : > { %4453 = vst [vmem:[#allocation6_spill] sm:$0xff] %v3646_v44  ;;  %4454 = vst [vmem:[#allocation5_spill] sm:$0xff] %v3650_v3  ;;  %1168 = vrot.lane.b32.xlu1 %v3119_v59, %s2736_s9  ;;  %1074 = vrot.lane.b32.xlu0 %v4452_v50, %s2735_s8  ;;  %v2305_v59 = vld [vmem:[%s2821_s30 + $0x121] sm:$0xff] }
 0x14e   : > { %v3656_v17 = vpop.permute.xlu1 %906  ;;  %v3658_v57 = vpop.permute.xlu0 %904 }
 0x150   : > { %1170 = vrot.lane.b32.xlu1 %v3116_v58, %s2736_s9  ;;  %1200 = vrot.lane.b32.xlu0 %v3225_v22, %s2736_s9  ;;  %v2400_v22 = vld [vmem:[%s2821_s30 + $0x129] sm:$0xff] }
 0x151   : > { %v2384_v58 = vld [vmem:[%s2821_s30 + $0x69] sm:$0xff] }
 0x152   : > { %v3665_v35 = vpop.permute.xlu1 %910  ;;  %v3667_v46 = vpop.permute.xlu0 %908 }
 0x154   : > { %1296 = vrot.lane.b32.xlu1 %v2383_v33, %s2737_s21  ;;  %1202 = vrot.lane.b32.xlu0 %v3222_v55, %s2736_s9 }
 0x156   : > { %v3673_v23 = vpop.permute.xlu1 %914  ;;  %v3675_v30 = vpop.permute.xlu0 %912 }
 0x158   : > { %948 = vrot.lane.b32.xlu1 %v2305_v59, %s2734_s7  ;;  %1328 = vrot.lane.b32.xlu0 %v2305_v59, %s2737_s21  ;;  %v4461_v59 = vld [vmem:[#allocation19_spill] sm:$0xff] }
 0x15a   : > { %v3681_v28 = vpop.permute.xlu1 %918  ;;  %v3683_v21 = vpop.permute.xlu0 %916 }
 0x15c   : > { %1330 = vrot.lane.b32.xlu1 %v2400_v22, %s2737_s21  ;;  %1298 = vrot.lane.b32.xlu0 %v2384_v58, %s2737_s21 }
 0x15e   : > { %v3687_v55 = vpop.permute.xlu1 %922  ;;  %v3689_v5 = vpop.permute.xlu0 %920 }
 0x160   : > { %1456 = vrot.lane.b32.xlu1 %v4455_v2, %s2738_s6  ;;  %1424 = vrot.lane.b32.xlu0 %v4456_v24, %s2738_s6 }
 0x162   : > { %v3695_v11 = vpop.permute.xlu1 %926  ;;  %v3697_v32 = vpop.permute.xlu0 %924 }
 0x163   : > { %4457 = vst [vmem:[#allocation16_spill] sm:$0xff] %v3695_v11 }
 0x164   : > { %1044 = vrot.lane.b32.xlu1 %v4456_v24, %s2735_s8  ;;  %950 = vrot.lane.b32.xlu0 %v2400_v22, %s2734_s7 }
 0x166   : > { %v3703_v50 = vpop.permute.xlu1 %930  ;;  %v3705_v19 = vpop.permute.xlu0 %928 }
 0x167   : > { %4458 = vst [vmem:[#allocation10_spill] sm:$0xff] %v3703_v50  ;;  %4459 = vst [vmem:[#allocation9_spill] sm:$0xff] %v3705_v19  ;;  %v4463_v19 = vld [vmem:[#allocation28_spill] sm:$0xff] }
 0x168   : > { %1426 = vrot.lane.b32.xlu1 %v2416_v52, %s2738_s6  ;;  %1076 = vrot.lane.b32.xlu0 %v4455_v2, %s2735_s8 }
 0x16a   : > { %v937_v54 = vpop.permute.xlu1 %936  ;;  %v3710_v33 = vpop.permute.xlu0 %932 }
 0x16b   : > { %4460 = vst [vmem:[#allocation15_spill] sm:$0xff] %v3710_v33 }
 0x16c   : > { %1046 = vrot.lane.b32.xlu1 %v2416_v52, %s2735_s8  ;;  %1458 = vrot.lane.b32.xlu0 %v4461_v59, %s2738_s6  ;;  %v2385_v52 = vld [vmem:[%s2821_s30 + $0x79] sm:$0xff] }
 0x16e   : > { %v1033_v22 = vpop.permute.xlu1 %1032  ;;  %v3715_v58 = vpop.permute.xlu0 %938 }
 0x170   : > { %1172 = vrot.lane.b32.xlu1 %v3137_v60, %s2736_s9  ;;  %1078 = vrot.lane.b32.xlu0 %v4461_v59, %s2735_s8  ;;  %v2307_v60 = vld [vmem:[%s2821_s30 + $0x139] sm:$0xff] }
 0x172   : > { %v3721_v2 = vpop.permute.xlu1 %1034  ;;  %v1065_v24 = vpop.permute.xlu0 %1064 }
 0x174   : > { %1174 = vrot.lane.b32.xlu1 %v3134_v29, %s2736_s9  ;;  %1204 = vrot.lane.b32.xlu0 %v3237_v20, %s2736_s9  ;;  %v2402_v20 = vld [vmem:[%s2821_s30 + $0x141] sm:$0xff] }
 0x175   : > { %v2386_v29 = vld [vmem:[%s2821_s30 + $0x81] sm:$0xff] }
 0x176   : > { %v1161_v40 = vpop.permute.xlu1 %1160  ;;  %v3728_v44 = vpop.permute.xlu0 %1066 }
 0x178   : > { %1300 = vrot.lane.b32.xlu1 %v2385_v52, %s2737_s21  ;;  %1206 = vrot.lane.b32.xlu0 %v3234_v53, %s2736_s9  ;;  %v198_v52 = vld [vmem:[%s2821_s30] sm:$0xff] }
 0x179   : > { %v2417_v53 = vld [vmem:[%s2821_s30 + $0x7a] sm:$0xff]  ;;  %v1513_v37 = vsel %vm1512_vm0, %v198_v52, %v4462_v38 }
 0x17a   : > { %v3734_v59 = vpop.permute.xlu1 %1162  ;;  %v1193_v3 = vpop.permute.xlu0 %1192 }
 0x17c   : > { %952 = vrot.lane.b32.xlu1 %v2307_v60, %s2734_s7  ;;  %1332 = vrot.lane.b32.xlu0 %v2307_v60, %s2737_s21  ;;  %v4464_v60 = vld [vmem:[#allocation32_spill] sm:$0xff] }
 0x17d   : > { %v1529_v42 = vsel %vm1512_vm0, %v4464_v60, %v4463_v19 }
 0x17e   : > { %v1289_v26 = vpop.permute.xlu1 %1288  ;;  %v3740_v33 = vpop.permute.xlu0 %1194  ;;  %v1562_v11 = vsel %vm1545_vm1, %v1529_v42, %v3359_v63 }
 0x17f   : > { %v1595_v19 = vsel %vm1578_vm3, %v1562_v11, %v3570_v43  ;;  %v2418_v11 = vld [vmem:[%s2821_s30 + $0x82] sm:$0xff] }
 0x180   : > { %1334 = vrot.lane.b32.xlu1 %v2402_v20, %s2737_s21  ;;  %1302 = vrot.lane.b32.xlu0 %v2386_v29, %s2737_s21  ;;  %v1546_v29 = vsel %vm1545_vm1, %v1513_v37, %v4465_v61  ;;  %v1628_v61 = vsel %vm1611_vm4, %v1595_v19, %v937_v54 }
 0x181   : > { %v1579_v38 = vsel %vm1578_vm3, %v1546_v29, %v3476_v25  ;;  %v1661_v63 = vsel %vm1644_vm5, %v1628_v61, %v1065_v24  ;;  %v199_v25 = vld [vmem:[%s2821_s30 + $0x8] sm:$0xff] }
 0x182   : > { %v3747_v12 = vpop.permute.xlu1 %940  ;;  %v1321_v50 = vpop.permute.xlu0 %1320  ;;  %v1612_v31 = vsel %vm1611_vm4, %v1579_v38, %v3658_v57  ;;  %v1694_v42 = vsel %vm1677_vm6, %v1661_v63, %v1193_v3  ;;  %v2434_v3 = vld [vmem:[%s2821_s30 + $0x142] sm:$0xff]  ;;  %v4469_v63 = vld [vmem:[#allocation31_spill] sm:$0xff] }
 0x183   : > { %v1645_v37 = vsel %vm1644_vm5, %v1612_v31, %v1033_v22  ;;  %v1727_v54 = vsel %vm1710_vm7, %v1694_v42, %v1321_v50  ;;  %v2355_v42 = vld [vmem:[%s2821_s30 + $0x90] sm:$0xff] }
 0x184   : > { %1460 = vrot.lane.b32.xlu1 %v2433_v14, %s2738_s6  ;;  %1428 = vrot.lane.b32.xlu0 %v2417_v53, %s2738_s6  ;;  %v1678_v43 = vsel %vm1677_vm6, %v1645_v37, %v1161_v40  ;;  %v4467_v40 = vld [vmem:[#allocation41_spill] sm:$0xff]  ;;  %v4468_v37 = vld [vmem:[#allocation27_spill] sm:$0xff] }
 0x185   : > { %v1711_v57 = vsel %vm1710_vm7, %v1678_v43, %v1289_v26 }
 0x186   : > { %v1323_v52 = vpop.permute.xlu1 %1322  ;;  %v1291_v60 = vpop.permute.xlu0 %1290 }
 0x188   : > { %1048 = vrot.lane.b32.xlu1 %v2417_v53, %s2735_s8  ;;  %954 = vrot.lane.b32.xlu0 %v2402_v20, %s2734_s7  ;;  %v4466_v20 = vld [vmem:[#allocation24_spill] sm:$0xff] }
 0x189   : > { %v1514_v53 = vsel %vm1512_vm0, %v199_v25, %v4466_v20 }
 0x18a   : > { %v1449_v29 = vpop.permute.xlu1 %1448  ;;  %v1417_v31 = vpop.permute.xlu0 %1416  ;;  %v1547_v26 = vsel %vm1545_vm1, %v1514_v53, %v4467_v40  ;;  %v2388_v40 = vld [vmem:[%s2821_s30 + $0x99] sm:$0xff] }
 0x18b   : > { %v1744_v22 = vsel %vm1743_vm8, %v1711_v57, %v1417_v31  ;;  %v1760_v24 = vsel %vm1743_vm8, %v1727_v54, %v1449_v29  ;;  %v1580_v50 = vsel %vm1578_vm3, %v1547_v26, %v3474_v1 }
 0x18c   : > { %1430 = vrot.lane.b32.xlu1 %v2418_v11, %s2738_s6  ;;  %1080 = vrot.lane.b32.xlu0 %v2433_v14, %s2735_s8  ;;  %v1613_v61 = vsel %vm1611_vm4, %v1580_v50, %v3656_v17  ;;  %v1530_v14 = vsel %vm1512_vm0, %v4469_v63, %v4468_v37  ;;  %v2435_v50 = vld [vmem:[%s2821_s30 + $0x152] sm:$0xff]  ;;  %v4470_v63 = vld [vmem:[#allocation21_spill] sm:$0xff] }
 0x18d   : > { %2530 = vmatprep.mubr.msk.f32.mxu0 %vm1788_vm9, %v1744_v22  ;;  %2554 = vmatprep.mubr.msk.f32.mxu1 %vm1788_vm9, %v1760_v24  ;;  %v1646_v25 = vsel %vm1644_vm5, %v1613_v61, %v3721_v2  ;;  %v1563_v1 = vsel %vm1545_vm1, %v1530_v14, %v3357_v8  ;;  %v2419_v61 = vld [vmem:[%s2821_s30 + $0x92] sm:$0xff]  ;;  %v4471_v14 = vld [vmem:[#allocation25_spill] sm:$0xff] }
 0x18e   : > { %v1037_v38 = vpop.permute.xlu1 %1036  ;;  %v3790_v19 = vpop.permute.xlu0 %942  ;;  %v1679_v43 = vsel %vm1677_vm6, %v1646_v25, %v3734_v59  ;;  %v1596_v17 = vsel %vm1578_vm3, %v1563_v1, %v3568_v45  ;;  %v2356_v59 = vld [vmem:[%s2821_s30 + $0x98] sm:$0xff]  ;;  %v1515_v25 = vsel %vm1512_vm0, %v4471_v14, %v4470_v63  ;;  %v4472_v1 = vld [vmem:[#allocation30_spill] sm:$0xff] }
 0x18f   : > { %v1712_v57 = vsel %vm1710_vm7, %v1679_v43, %v1291_v60  ;;  %v1629_v2 = vsel %vm1611_vm4, %v1596_v17, %v3715_v58  ;;  %v4473_v43 = vld [vmem:[#allocation34_spill] sm:$0xff] }
 0x190   : > { %1050 = vrot.lane.b32.xlu1 %v2418_v11, %s2735_s8  ;;  %1462 = vrot.lane.b32.xlu0 %v2434_v3, %s2738_s6  ;;  %v1662_v8 = vsel %vm1644_vm5, %v1629_v2, %v3728_v44  ;;  %v4474_v17 = vld [vmem:[#allocation46_spill] sm:$0xff] }
 0x191   : > { %v1695_v45 = vsel %vm1677_vm6, %v1662_v8, %v3740_v33  ;;  %v2387_v33 = vld [vmem:[%s2821_s30 + $0x91] sm:$0xff] }
 0x192   : > { %v1419_v54 = vpop.permute.xlu1 %1418  ;;  %v1069_v29 = vpop.permute.xlu0 %1068  ;;  %v1728_v60 = vsel %vm1710_vm7, %v1695_v45, %v1323_v52  ;;  %v2309_v52 = vld [vmem:[%s2821_s30 + $0x151] sm:$0xff] }
 0x193   : > { %v1745_v11 = vsel %vm1743_vm8, %v1712_v57, %v1419_v54  ;;  %v1548_v57 = vsel %vm1545_vm1, %v1515_v25, %v4474_v17 }
 0x194   : > { %1176 = vrot.lane.b32.xlu1 %v2355_v42, %s2736_s9  ;;  %1082 = vrot.lane.b32.xlu0 %v2434_v3, %s2735_s8  ;;  %v1531_v42 = vsel %vm1512_vm0, %v4473_v43, %v4472_v1  ;;  %v1581_v2 = vsel %vm1578_vm3, %v1548_v57, %v3490_v51  ;;  %v4478_v1 = vld [vmem:[#allocation29_spill] sm:$0xff]  ;;  %v2357_v57 = vld [vmem:[%s2821_s30 + $0xa8] sm:$0xff] }
 0x195   : > { %2531 = vmatmul.mubr.msk.f32.vlgmr.msra.gmra.mxu0 %vm1788_vm9, %v1745_v11  ;;  %v1564_v54 = vsel %vm1545_vm1, %v1531_v42, %v3367_v48  ;;  %v4479_v43 = vld [vmem:[#allocation33_spill] sm:$0xff] }
 0x196   : > { %v3821_v31 = vpop.permute.xlu1 %1038  ;;  %v1451_v58 = vpop.permute.xlu0 %1450  ;;  %v1597_v11 = vsel %vm1578_vm3, %v1564_v54, %v3578_v62  ;;  %v2420_v62 = vld [vmem:[%s2821_s30 + $0x9a] sm:$0xff] }
 0x197   : > { %v1761_v44 = vsel %vm1743_vm8, %v1728_v60, %v1451_v58  ;;  %v1630_v60 = vsel %vm1611_vm4, %v1597_v11, %v3747_v12 }
 0x198   : > { %1178 = vrot.lane.b32.xlu1 %v2356_v59, %s2736_s9  ;;  %1208 = vrot.lane.b32.xlu0 %v4429_v13, %s2736_s9  ;;  %v2404_v13 = vld [vmem:[%s2821_s30 + $0x159] sm:$0xff]  ;;  %v1614_v59 = vsel %vm1611_vm4, %v1581_v2, %v3667_v46 }
 0x199   : > { %2555 = vmatmul.mubr.msk.f32.vlgmr.msra.gmra.mxu1 %vm1788_vm9, %v1761_v44  ;;  %v1647_v58 = vsel %vm1644_vm5, %v1614_v59, %v1037_v38  ;;  %v1663_v44 = vsel %vm1644_vm5, %v1630_v60, %v1069_v29 }
 0x19a   : > { %v1165_v22 = vpop.permute.xlu1 %1164  ;;  %v3829_v24 = vpop.permute.xlu0 %1070 }
 0x19b   : > { %v1680_v48 = vsel %vm1677_vm6, %v1647_v58, %v1165_v22  ;;  %v4477_v22 = vld [vmem:[#allocation45_spill] sm:$0xff] }
 0x19c   : > { %1304 = vrot.lane.b32.xlu1 %v2387_v33, %s2737_s21  ;;  %1210 = vrot.lane.b32.xlu0 %v4427_v10, %s2736_s9 }
 0x19e   : > { %v1167_v20 = vpop.permute.xlu1 %1166  ;;  %v1197_v53 = vpop.permute.xlu0 %1196 }
 0x19f   : > { %v1696_v51 = vsel %vm1677_vm6, %v1663_v44, %v1197_v53 }
 0x1a0   : > { %956 = vrot.lane.b32.xlu1 %v2309_v52, %s2734_s7  ;;  %1336 = vrot.lane.b32.xlu0 %v2309_v52, %s2737_s21 }
 0x1a2   : > { %v1293_v26 = vpop.permute.xlu1 %1292  ;;  %v1199_v3 = vpop.permute.xlu0 %1198 }
 0x1a3   : > { %v1713_v33 = vsel %vm1710_vm7, %v1680_v48, %v1293_v26  ;;  %v2436_v26 = vld [vmem:[%s2821_s30 + $0x15a] sm:$0xff] }
 0x1a4   : > { %1338 = vrot.lane.b32.xlu1 %v2404_v13, %s2737_s21  ;;  %1306 = vrot.lane.b32.xlu0 %v2388_v40, %s2737_s21  ;;  %v4475_v40 = vld [vmem:[#allocation23_spill] sm:$0xff] }
 0x1a6   : > { %v3843_v37 = vpop.permute.xlu1 %944  ;;  %v1325_v10 = vpop.permute.xlu0 %1324 }
 0x1a7   : > { %v1729_v46 = vsel %vm1710_vm7, %v1696_v51, %v1325_v10 }
 0x1a8   : > { %1464 = vrot.lane.b32.xlu1 %v2435_v50, %s2738_s6  ;;  %1432 = vrot.lane.b32.xlu0 %v2419_v61, %s2738_s6 }
 0x1aa   : > { %v1327_v8 = vpop.permute.xlu1 %1326  ;;  %v1295_v45 = vpop.permute.xlu0 %1294 }
 0x1ac   : > { %1052 = vrot.lane.b32.xlu1 %v2419_v61, %s2735_s8  ;;  %958 = vrot.lane.b32.xlu0 %v2404_v13, %s2734_s7  ;;  %v4476_v61 = vld [vmem:[#allocation26_spill] sm:$0xff] }
 0x1ad   : > { %v1516_v13 = vsel %vm1512_vm0, %v4476_v61, %v4475_v40  ;;  %v2421_v40 = vld [vmem:[%s2821_s30 + $0xaa] sm:$0xff] }
 0x1ae   : > { %v1453_v52 = vpop.permute.xlu1 %1452  ;;  %v1421_v12 = vpop.permute.xlu0 %1420  ;;  %v1549_v53 = vsel %vm1545_vm1, %v1516_v13, %v4477_v22 }
 0x1af   : > { %v1762_v38 = vsel %vm1743_vm8, %v1729_v46, %v1453_v52  ;;  %v1746_v29 = vsel %vm1743_vm8, %v1713_v33, %v1421_v12  ;;  %v1582_v10 = vsel %vm1578_vm3, %v1549_v53, %v3488_v34  ;;  %v2406_v46 = vld [vmem:[%s2821_s30 + $0x171] sm:$0xff] }
 0x1b0   : > { %1434 = vrot.lane.b32.xlu1 %v2420_v62, %s2738_s6  ;;  %1084 = vrot.lane.b32.xlu0 %v2435_v50, %s2735_s8  ;;  %v1615_v25 = vsel %vm1611_vm4, %v1582_v10, %v3665_v35  ;;  %v1532_v50 = vsel %vm1512_vm0, %v4479_v43, %v4478_v1  ;;  %v2390_v52 = vld [vmem:[%s2821_s30 + $0xb1] sm:$0xff]  ;;  %v1632_v10 = vsel %vm1611_vm4, %v3590_v7, %v3843_v37 }
 0x1b1   : > { %2533 = vmatprep.mubr.msk.f32.mxu0 %vm1788_vm9, %v1746_v29  ;;  %2557 = vmatprep.mubr.msk.f32.mxu1 %vm1788_vm9, %v1762_v38  ;;  %v1648_v42 = vsel %vm1644_vm5, %v1615_v25, %v3821_v31  ;;  %v1565_v34 = vsel %vm1545_vm1, %v1532_v50, %v3365_v9  ;;  %v2437_v29 = vld [vmem:[%s2821_s30 + $0x16a] sm:$0xff] }
 0x1b2   : > { %v1041_v63 = vpop.permute.xlu1 %1040  ;;  %v3888_v14 = vpop.permute.xlu0 %946  ;;  %v1681_v17 = vsel %vm1677_vm6, %v1648_v42, %v1167_v20  ;;  %v1598_v35 = vsel %vm1578_vm3, %v1565_v34, %v3576_v27  ;;  %v2358_v20 = vld [vmem:[%s2821_s30 + $0xb0] sm:$0xff] }
 0x1b3   : > { %v1714_v54 = vsel %vm1710_vm7, %v1681_v17, %v1295_v45  ;;  %v1631_v31 = vsel %vm1611_vm4, %v1598_v35, %v3790_v19  ;;  %v2373_v45 = vld [vmem:[%s2821_s30 + $0x168] sm:$0xff]  ;;  %v2422_v42 = vld [vmem:[%s2821_s30 + $0xb2] sm:$0xff] }
 0x1b4   : > { %1054 = vrot.lane.b32.xlu1 %v2420_v62, %s2735_s8  ;;  %1466 = vrot.lane.b32.xlu0 %v2436_v26, %s2738_s6  ;;  %v1664_v9 = vsel %vm1644_vm5, %v1631_v31, %v3829_v24  ;;  %v2389_v24 = vld [vmem:[%s2821_s30 + $0xa9] sm:$0xff]  ;;  %v2438_v17 = vld [vmem:[%s2821_s30 + $0x172] sm:$0xff] }
 0x1b5   : > { %v1697_v27 = vsel %vm1677_vm6, %v1664_v9, %v1199_v3  ;;  %v2374_v3 = vld [vmem:[%s2821_s30 + $0x170] sm:$0xff]  ;;  %v2359_v31 = vld [vmem:[%s2821_s30 + $0xc0] sm:$0xff] }
 0x1b6   : > { %v1423_v2 = vpop.permute.xlu1 %1422  ;;  %v1073_v11 = vpop.permute.xlu0 %1072  ;;  %v1730_v19 = vsel %vm1710_vm7, %v1697_v27, %v1327_v8  ;;  %v2311_v8 = vld [vmem:[%s2821_s30 + $0x169] sm:$0xff] }
 0x1b7   : > { %v1747_v59 = vsel %vm1743_vm8, %v1714_v54, %v1423_v2  ;;  %v1665_v1 = vsel %vm1644_vm5, %v1632_v10, %v1073_v11  ;;  %v1617_v54 = vsel %vm1611_vm4, %v3498_v15, %v3673_v23  ;;  %v1618_v10 = vsel %vm1611_vm4, %v3514_v36, %v3683_v21 }
 0x1b8   : > { %1180 = vrot.lane.b32.xlu1 %v2357_v57, %s2736_s9  ;;  %1086 = vrot.lane.b32.xlu0 %v2436_v26, %s2735_s8  ;;  %v1616_v26 = vsel %vm1611_vm4, %v3502_v56, %v3675_v30 }
 0x1b9   : > { %2534 = vmatmul.mubr.msk.f32.gmra.mxu0 %vm1788_vm9, %v1747_v59  ;;  %v1649_v25 = vsel %vm1644_vm5, %v1616_v26, %v1041_v63 }
 0x1ba   : > { %v1043_v60 = vpop.permute.xlu1 %1042  ;;  %v1455_v58 = vpop.permute.xlu0 %1454 }
 0x1bb   : > { %v1763_v44 = vsel %vm1743_vm8, %v1730_v19, %v1455_v58  ;;  %v1650_v2 = vsel %vm1644_vm5, %v1617_v54, %v1043_v60  ;;  %v2360_v19 = vld [vmem:[%s2821_s30 + $0xc8] sm:$0xff]  ;;  %v2375_v60 = vld [vmem:[%s2821_s30 + $0x180] sm:$0xff] }
 0x1bc   : > { %1182 = vrot.lane.b32.xlu1 %v2358_v20, %s2736_s9  ;;  %1212 = vrot.lane.b32.xlu0 %v2373_v45, %s2736_s9  ;;  %v1633_v20 = vsel %vm1611_vm4, %v3586_v4, %v3888_v14 }
 0x1bd   : > { %2558 = vmatmul.mubr.msk.f32.gmra.mxu1 %vm1788_vm9, %v1763_v44 }
 0x1be   : > { %v1169_v48 = vpop.permute.xlu1 %1168  ;;  %v1075_v51 = vpop.permute.xlu0 %1074 }
 0x1bf   : > { %v1682_v43 = vsel %vm1677_vm6, %v1649_v25, %v1169_v48  ;;  %v1666_v23 = vsel %vm1644_vm5, %v1633_v20, %v1075_v51  ;;  %v2361_v20 = vld [vmem:[%s2821_s30 + $0xd8] sm:$0xff] }
 0x1c0   : > { %1308 = vrot.lane.b32.xlu1 %v2389_v24, %s2737_s21  ;;  %1214 = vrot.lane.b32.xlu0 %v2374_v3, %s2736_s9  ;;  %v2391_v24 = vld [vmem:[%s2821_s30 + $0xc1] sm:$0xff] }
 0x1c1   : > { %v2376_v3 = vld [vmem:[%s2821_s30 + $0x188] sm:$0xff] }
 0x1c2   : > { %v1171_v62 = vpop.permute.xlu1 %1170  ;;  %v1201_v33 = vpop.permute.xlu0 %1200 }
 0x1c3   : > { %v1698_v50 = vsel %vm1677_vm6, %v1665_v1, %v1201_v33  ;;  %v1683_v11 = vsel %vm1677_vm6, %v1650_v2, %v1171_v62 }
 0x1c4   : > { %960 = vrot.lane.b32.xlu1 %v2311_v8, %s2734_s7  ;;  %1340 = vrot.lane.b32.xlu0 %v2311_v8, %s2737_s21  ;;  %v2313_v8 = vld [vmem:[%s2821_s30 + $0x181] sm:$0xff] }
 0x1c6   : > { %v1297_v12 = vpop.permute.xlu1 %1296  ;;  %v1203_v38 = vpop.permute.xlu0 %1202 }
 0x1c7   : > { %v1715_v56 = vsel %vm1710_vm7, %v1682_v43, %v1297_v12  ;;  %v1699_v45 = vsel %vm1677_vm6, %v1666_v23, %v1203_v38 }
 0x1c8   : > { %1342 = vrot.lane.b32.xlu1 %v2406_v46, %s2737_s21  ;;  %1310 = vrot.lane.b32.xlu0 %v2390_v52, %s2737_s21  ;;  %v2392_v52 = vld [vmem:[%s2821_s30 + $0xc9] sm:$0xff] }
 0x1ca   : > { %v3935_v61 = vpop.permute.xlu1 %948  ;;  %v1329_v13 = vpop.permute.xlu0 %1328 }
 0x1cb   : > { %v1731_v30 = vsel %vm1710_vm7, %v1698_v50, %v1329_v13  ;;  %v1634_v25 = vsel %vm1611_vm4, %v3602_v49, %v3935_v61 }
 0x1cc   : > { %1468 = vrot.lane.b32.xlu1 %v2437_v29, %s2738_s6  ;;  %1436 = vrot.lane.b32.xlu0 %v2421_v40, %s2738_s6 }
 0x1ce   : > { %v1331_v22 = vpop.permute.xlu1 %1330  ;;  %v1299_v53 = vpop.permute.xlu0 %1298 }
 0x1cf   : > { %v1716_v59 = vsel %vm1710_vm7, %v1683_v11, %v1299_v53  ;;  %v1732_v58 = vsel %vm1710_vm7, %v1699_v45, %v1331_v22  ;;  %v2378_v45 = vld [vmem:[%s2821_s30 + $0x1a0] sm:$0xff] }
 0x1d0   : > { %1056 = vrot.lane.b32.xlu1 %v2421_v40, %s2735_s8  ;;  %962 = vrot.lane.b32.xlu0 %v2406_v46, %s2734_s7  ;;  %v2408_v46 = vld [vmem:[%s2821_s30 + $0x189] sm:$0xff] }
 0x1d1   : > { %v2423_v40 = vld [vmem:[%s2821_s30 + $0xc2] sm:$0xff] }
 0x1d2   : > { %v1457_v34 = vpop.permute.xlu1 %1456  ;;  %v1425_v7 = vpop.permute.xlu0 %1424 }
 0x1d3   : > { %v1764_v37 = vsel %vm1743_vm8, %v1731_v30, %v1457_v34  ;;  %v1748_v63 = vsel %vm1743_vm8, %v1715_v56, %v1425_v7  ;;  %v2440_v34 = vld [vmem:[%s2821_s30 + $0x18a] sm:$0xff] }
 0x1d4   : > { %1438 = vrot.lane.b32.xlu1 %v2422_v42, %s2738_s6  ;;  %1088 = vrot.lane.b32.xlu0 %v2437_v29, %s2735_s8  ;;  %v2439_v29 = vld [vmem:[%s2821_s30 + $0x182] sm:$0xff]  ;;  %v2424_v7 = vld [vmem:[%s2821_s30 + $0xca] sm:$0xff] }
 0x1d5   : > { %2536 = vmatprep.mubr.msk.f32.mxu0 %vm1788_vm9, %v1748_v63  ;;  %2560 = vmatprep.mubr.msk.f32.mxu1 %vm1788_vm9, %v1764_v37 }
 0x1d6   : > { %v1045_v57 = vpop.permute.xlu1 %1044  ;;  %v3961_v35 = vpop.permute.xlu0 %950 }
 0x1d7   : > { %v1651_v1 = vsel %vm1644_vm5, %v1618_v10, %v1045_v57 }
 0x1d8   : > { %1058 = vrot.lane.b32.xlu1 %v2422_v42, %s2735_s8  ;;  %1470 = vrot.lane.b32.xlu0 %v2438_v17, %s2738_s6 }
 0x1da   : > { %v1427_v9 = vpop.permute.xlu1 %1426  ;;  %v1077_v27 = vpop.permute.xlu0 %1076 }
 0x1db   : > { %v1749_v15 = vsel %vm1743_vm8, %v1716_v59, %v1427_v9  ;;  %v1667_v43 = vsel %vm1644_vm5, %v1634_v25, %v1077_v27  ;;  %v1635_v59 = vsel %vm1611_vm4, %v3598_v18, %v3961_v35  ;;  %v2377_v27 = vld [vmem:[%s2821_s30 + $0x198] sm:$0xff] }
 0x1dc   : > { %1184 = vrot.lane.b32.xlu1 %v2359_v31, %s2736_s9  ;;  %1090 = vrot.lane.b32.xlu0 %v2438_v17, %s2735_s8  ;;  %v1619_v17 = vsel %vm1611_vm4, %v3510_v47, %v3681_v28 }
 0x1dd   : > { %2537 = vmatmul.mubr.msk.f32.gmra.mxu0 %vm1788_vm9, %v1749_v15 }
 0x1de   : > { %v1047_v4 = vpop.permute.xlu1 %1046  ;;  %v1459_v14 = vpop.permute.xlu0 %1458 }
 0x1df   : > { %v1765_v44 = vsel %vm1743_vm8, %v1732_v58, %v1459_v14  ;;  %v1652_v57 = vsel %vm1644_vm5, %v1619_v17, %v1047_v4  ;;  %v2409_v4 = vld [vmem:[%s2821_s30 + $0x199] sm:$0xff] }
 0x1e0   : > { %1186 = vrot.lane.b32.xlu1 %v2360_v19, %s2736_s9  ;;  %1216 = vrot.lane.b32.xlu0 %v2375_v60, %s2736_s9  ;;  %v2362_v19 = vld [vmem:[%s2821_s30 + $0xe0] sm:$0xff] }
 0x1e1   : > { %2561 = vmatmul.mubr.msk.f32.gmra.mxu1 %vm1788_vm9, %v1765_v44  ;;  %v2393_v14 = vld [vmem:[%s2821_s30 + $0xd9] sm:$0xff] }
 0x1e2   : > { %v1173_v48 = vpop.permute.xlu1 %1172  ;;  %v1079_v51 = vpop.permute.xlu0 %1078 }
 0x1e3   : > { %v1684_v50 = vsel %vm1677_vm6, %v1651_v1, %v1173_v48  ;;  %v1668_v28 = vsel %vm1644_vm5, %v1635_v59, %v1079_v51  ;;  %v2394_v48 = vld [vmem:[%s2821_s30 + $0xe1] sm:$0xff] }
 0x1e4   : > { %1312 = vrot.lane.b32.xlu1 %v2391_v24, %s2737_s21  ;;  %1218 = vrot.lane.b32.xlu0 %v2376_v3, %s2736_s9  ;;  %v2410_v3 = vld [vmem:[%s2821_s30 + $0x1a1] sm:$0xff] }
 0x1e6   : > { %v1175_v62 = vpop.permute.xlu1 %1174  ;;  %v1205_v33 = vpop.permute.xlu0 %1204 }
 0x1e7   : > { %v1700_v42 = vsel %vm1677_vm6, %v1667_v43, %v1205_v33  ;;  %v1685_v54 = vsel %vm1677_vm6, %v1652_v57, %v1175_v62  ;;  %v2441_v62 = vld [vmem:[%s2821_s30 + $0x19a] sm:$0xff] }
 0x1e8   : > { %964 = vrot.lane.b32.xlu1 %v2313_v8, %s2734_s7  ;;  %1344 = vrot.lane.b32.xlu0 %v2313_v8, %s2737_s21  ;;  %v2425_v33 = vld [vmem:[%s2821_s30 + $0xda] sm:$0xff] }
 0x1ea   : > { %v1301_v12 = vpop.permute.xlu1 %1300  ;;  %v1207_v38 = vpop.permute.xlu0 %1206 }
 0x1eb   : > { %v1717_v36 = vsel %vm1710_vm7, %v1684_v50, %v1301_v12  ;;  %v1701_v9 = vsel %vm1677_vm6, %v1668_v28, %v1207_v38  ;;  %v2442_v12 = vld [vmem:[%s2821_s30 + $0x1a2] sm:$0xff] }
 0x1ec   : > { %1346 = vrot.lane.b32.xlu1 %v2408_v46, %s2737_s21  ;;  %1314 = vrot.lane.b32.xlu0 %v2392_v52, %s2737_s21  ;;  %v2426_v38 = vld [vmem:[%s2821_s30 + $0xe2] sm:$0xff]  ;;  %s185_s30 = sand.u32 1, %s2713_s13  }
 0x1ed   : > { %s4288_s15 = scalar_lea.sflag [#allocation3], %s185_s30 }
 0x1ee   : > { %v4001_v13 = vpop.permute.xlu1 %952  ;;  %v1333_v22 = vpop.permute.xlu0 %1332 }
 0x1ef   : > { %v1733_v21 = vsel %vm1710_vm7, %v1700_v42, %v1333_v22  ;;  %v1620_v22 = vsel %vm1611_vm4, %v3526_v39, %v3689_v5 }
 0x1f0   : > { %1472 = vrot.lane.b32.xlu1 %v2439_v29, %s2738_s6  ;;  %1440 = vrot.lane.b32.xlu0 %v2423_v40, %s2738_s6 }
 0x1f2   : > { %v1335_v53 = vpop.permute.xlu1 %1334  ;;  %v1303_v26 = vpop.permute.xlu0 %1302 }
 0x1f3   : > { %v1718_v2 = vsel %vm1710_vm7, %v1685_v54, %v1303_v26  ;;  %v1734_v18 = vsel %vm1710_vm7, %v1701_v9, %v1335_v53  ;;  %v1636_v53 = vsel %vm1611_vm4, %v3614_v0, %v4001_v13 }
 0x1f4   : > { %966 = vrot.lane.b32.xlu1 %v2408_v46, %s2734_s7  ;;  %934 = vrot.lane.b32.xlu0 %v2392_v52, %s2734_s7  ;;  %s2249_s7 = sshll.u32 %s185_s30, 8 }
 0x1f5   : > { %s4148_s10 = scalar_lea.vmem [#allocation2], %s2249_s7 }
 0x1f6   : > { %v1461_v56 = vpop.permute.xlu1 %1460  ;;  %v1429_v49 = vpop.permute.xlu0 %1428  ;;  %s2162_s18 = sshll.u32 %s4148_s10, 4  ;;  %s4282_s18 = int_to_ptr.vmem [resolvable:$true] %s2162_s18 }
 0x1f7   : > { %v1766_v61 = vsel %vm1743_vm8, %v1733_v21, %v1461_v56  ;;  %v1750_v30 = vsel %vm1743_vm8, %v1717_v36, %v1429_v49  ;;  %v1621_v21 = vsel %vm1611_vm4, %v3522_v41, %v3687_v55  ;;  %s2653_s26 = scalar_lea.vmem %s4282_s18, 4096  ;;  %p2660_p1 = scmp.lt.s32.totalorder %s4282_s18, %s2658_s28 }
 0x1f8   : > { %1092 = vrot.lane.b32.xlu1 %v2439_v29, %s2735_s8  ;;  %1060 = vrot.lane.b32.xlu0 %v2423_v40, %s2735_s8  ;;  %p2654_p12 = scmp.ne.s32.totalorder %s4282_s18, %s2653_s26  ;;  %p2661_p2 = scmp.lt.s32.totalorder %s2659_s29, %s2653_s26 }
 0x1f9   : > { %2539 = vmatprep.mubr.msk.f32.mxu0 %vm1788_vm9, %v1750_v30  ;;  %2563 = vmatprep.mubr.msk.f32.mxu1 %vm1788_vm9, %v1766_v61 }
 0x1fa   : > { %v1049_v37 = vpop.permute.xlu1 %1048  ;;  %v4027_v63 = vpop.permute.xlu0 %954  ;;  %p2655_p13 = pnand %p2654_p12, %p2801_p4  ;;  %p2662_p3 = por %p2661_p2, %p2660_p1 }
 0x1fb   : > { %v1653_v26 = vsel %vm1644_vm5, %v1620_v22, %v1049_v37 }
 0x1fc   : > { %1474 = vrot.lane.b32.xlu1 %v2440_v34, %s2738_s6  ;;  %1442 = vrot.lane.b32.xlu0 %v2424_v7, %s2738_s6  ;;  %p2656_p0 = pneg %p2655_p13 }
 0x1fe   : > { %v1431_v11 = vpop.permute.xlu1 %1430  ;;  %v1081_v31 = vpop.permute.xlu0 %1080  ;;  %p2663_p5 = pnand %p2662_p3, %p2656_p0 }
 0x1ff   : > { %v1751_v47 = vsel %vm1743_vm8, %v1718_v2, %v1431_v11  ;;  %v1669_v10 = vsel %vm1644_vm5, %v1636_v53, %v1081_v31 }
 0x200   : > { %1094 = vrot.lane.b32.xlu1 %v2440_v34, %s2735_s8  ;;  %1062 = vrot.lane.b32.xlu0 %v2424_v7, %s2735_s8  ;;  %v1637_v7 = vsel %vm1611_vm4, %v3610_v6, %v4027_v63 }
 0x201   : > { %2540 = vmatmul.mubr.msk.f32.gmra.mxu0 %vm1788_vm9, %v1751_v47 }
 0x202   : > { %v1051_v35 = vpop.permute.xlu1 %1050  ;;  %v1463_v15 = vpop.permute.xlu0 %1462 }
 0x203   : > { %v1767_v23 = vsel %vm1743_vm8, %v1734_v18, %v1463_v15  ;;  %v1654_v56 = vsel %vm1644_vm5, %v1621_v21, %v1051_v35  ;;  %v1622_v18 = vsel %vm1611_vm4, %v3538_v16, %v3697_v32  ;;  %v4480_v35 = vld [vmem:[#allocation44_spill] sm:$0xff] }
 0x204   : > { %1220 = vrot.lane.b32.xlu1 %v2377_v27, %s2736_s9  ;;  %1188 = vrot.lane.b32.xlu0 %v2361_v20, %s2736_s9 }
 0x205   : > { %2564 = vmatmul.mubr.msk.f32.gmra.mxu1 %vm1788_vm9, %v1767_v23 }
 0x206   : > { %v1177_v60 = vpop.permute.xlu1 %1176  ;;  %v1083_v58 = vpop.permute.xlu0 %1082 }
 0x207   : > { %v1686_v25 = vsel %vm1677_vm6, %v1653_v26, %v1177_v60  ;;  %v1670_v17 = vsel %vm1644_vm5, %v1637_v7, %v1083_v58 }
 0x208   : > { %1222 = vrot.lane.b32.xlu1 %v2378_v45, %s2736_s9  ;;  %1190 = vrot.lane.b32.xlu0 %v2362_v19, %s2736_s9 }
 0x20a   : > { %v1179_v44 = vpop.permute.xlu1 %1178  ;;  %v1209_v24 = vpop.permute.xlu0 %1208 }
 0x20b   : > { %v1702_v1 = vsel %vm1677_vm6, %v1669_v10, %v1209_v24  ;;  %v1687_v49 = vsel %vm1677_vm6, %v1654_v56, %v1179_v44 }
 0x20c   : > { %1348 = vrot.lane.b32.xlu1 %v2409_v4, %s2737_s21  ;;  %1316 = vrot.lane.b32.xlu0 %v2393_v14, %s2737_s21 }
 0x20e   : > { %v1305_v51 = vpop.permute.xlu1 %1304  ;;  %v1211_v8 = vpop.permute.xlu0 %1210 }
 0x20f   : > { %v1719_v43 = vsel %vm1710_vm7, %v1686_v25, %v1305_v51  ;;  %v1703_v41 = vsel %vm1677_vm6, %v1670_v17, %v1211_v8  ;;  %v4482_v51 = vld [vmem:[#allocation35_spill] sm:$0xff] }
 0x210   : > { %1350 = vrot.lane.b32.xlu1 %v2410_v3, %s2737_s21  ;;  %1318 = vrot.lane.b32.xlu0 %v2394_v48, %s2737_s21  ;;  %v4481_v48 = vld [vmem:[#allocation16_spill] sm:$0xff] }
 0x211   : > { %v1623_v8 = vsel %vm1611_vm4, %v4482_v51, %v4481_v48 }
 0x212   : > { %v957_v46 = vpop.permute.xlu1 %956  ;;  %v1337_v52 = vpop.permute.xlu0 %1336 }
 0x213   : > { %v1735_v39 = vsel %vm1710_vm7, %v1702_v1, %v1337_v52  ;;  %v1638_v15 = vsel %vm1611_vm4, %v4480_v35, %v957_v46 }
 0x214   : > { %1476 = vrot.lane.b32.xlu1 %v2441_v62, %s2738_s6  ;;  %1444 = vrot.lane.b32.xlu0 %v2425_v33, %s2738_s6 }
 0x216   : > { %v1339_v29 = vpop.permute.xlu1 %1338  ;;  %v1307_v40 = vpop.permute.xlu0 %1306 }
 0x217   : > { %v1720_v61 = vsel %vm1710_vm7, %v1687_v49, %v1307_v40  ;;  %v1736_v55 = vsel %vm1710_vm7, %v1703_v41, %v1339_v29 }
 0x218   : > { %1478 = vrot.lane.b32.xlu1 %v2442_v12, %s2738_s6  ;;  %1446 = vrot.lane.b32.xlu0 %v2426_v38, %s2738_s6  ;;  %v4483_v38 = vld [vmem:[#allocation38_spill] sm:$0xff] }
 0x21a   : > { %v1465_v5 = vpop.permute.xlu1 %1464  ;;  %v1433_v50 = vpop.permute.xlu0 %1432 }
 0x21b   : > { %v1768_v0 = vsel %vm1743_vm8, %v1735_v39, %v1465_v5  ;;  %v1752_v13 = vsel %vm1743_vm8, %v1719_v43, %v1433_v50 }
 0x21c   : > { %2542 = vmatprep.mubr.msk.f32.mxu0 %vm1788_vm9, %v1752_v13  ;;  %2566 = vmatprep.mubr.msk.f32.mxu1 %vm1788_vm9, %v1768_v0  ;;  %v4145_v0 = vld [vmem:[%s4336_s2] ss:$0 sm:$0xff] }
 0x21e   : > { %v1053_v42 = vpop.permute.xlu1 %1052  ;;  %v959_v36 = vpop.permute.xlu0 %958 }
 0x21f   : > { %v1655_v23 = vsel %vm1644_vm5, %v1622_v18, %v1053_v42  ;;  %v1639_v29 = vsel %vm1611_vm4, %v4483_v38, %v959_v36 }
 0x222   : > { %v1435_v30 = vpop.permute.xlu1 %1434  ;;  %v1085_v34 = vpop.permute.xlu0 %1084 }
 0x223   : > { %v1753_v37 = vsel %vm1743_vm8, %v1720_v61, %v1435_v30  ;;  %v1671_v45 = vsel %vm1644_vm5, %v1638_v15, %v1085_v34 }
 0x224   : > { %2543 = vmatmul.mubr.msk.f32.gmra.mxu0 %vm1788_vm9, %v1753_v37 }
 0x226   : > { %v1055_v57 = vpop.permute.xlu1 %1054  ;;  %v1467_v54 = vpop.permute.xlu0 %1466 }
 0x227   : > { %v1769_v2 = vsel %vm1743_vm8, %v1736_v55, %v1467_v54  ;;  %v1656_v62 = vsel %vm1644_vm5, %v1623_v8, %v1055_v57  ;;  %v4484_v57 = vld [vmem:[#allocation9_spill] sm:$0xff]  ;;  %v4485_v54 = vld [vmem:[#allocation14_spill] sm:$0xff] }
 0x228   : > { %2567 = vmatmul.mubr.msk.f32.gmra.mxu1 %vm1788_vm9, %v1769_v2  ;;  %v1624_v2 = vsel %vm1611_vm4, %v4485_v54, %v4484_v57 }
 0x22a   : > { %v1181_v11 = vpop.permute.xlu1 %1180  ;;  %v1087_v31 = vpop.permute.xlu0 %1086 }
 0x22b   : > { %v1688_v19 = vsel %vm1677_vm6, %v1655_v23, %v1181_v11  ;;  %v1672_v22 = vsel %vm1644_vm5, %v1639_v29, %v1087_v31  ;;  %v4486_v11 = vld [vmem:[#allocation40_spill] sm:$0xff] }
 0x22e   : > { %v1183_v59 = vpop.permute.xlu1 %1182  ;;  %v1213_v6 = vpop.permute.xlu0 %1212 }
 0x22f   : > { %v1704_v60 = vsel %vm1677_vm6, %v1671_v45, %v1213_v6  ;;  %v1689_v33 = vsel %vm1677_vm6, %v1656_v62, %v1183_v59 }
 0x232   : > { %v1309_v63 = vpop.permute.xlu1 %1308  ;;  %v1215_v47 = vpop.permute.xlu0 %1214 }
 0x233   : > { %v1721_v58 = vsel %vm1710_vm7, %v1688_v19, %v1309_v63  ;;  %v1705_v53 = vsel %vm1677_vm6, %v1672_v22, %v1215_v47 }
 0x236   : > { %v4105_v28 = vpop.permute.xlu1 %960  ;;  %v1341_v9 = vpop.permute.xlu0 %1340 }
 0x237   : > { %v1737_v4 = vsel %vm1710_vm7, %v1704_v60, %v1341_v9  ;;  %v1640_v31 = vsel %vm1611_vm4, %v4486_v11, %v4105_v28  ;;  %v4487_v60 = vld [vmem:[#allocation10_spill] sm:$0xff] }
 0x238   : > { %v4493_v11 = vld [vmem:[#allocation6_spill] sm:$0xff] }
 0x23a   : > { %v1343_v27 = vpop.permute.xlu1 %1342  ;;  %v1311_v20 = vpop.permute.xlu0 %1310 }
 0x23b   : > { %v1722_v46 = vsel %vm1710_vm7, %v1689_v33, %v1311_v20  ;;  %v1738_v26 = vsel %vm1710_vm7, %v1705_v53, %v1343_v27 }
 0x23e   : > { %v1469_v14 = vpop.permute.xlu1 %1468  ;;  %v1437_v44 = vpop.permute.xlu0 %1436 }
 0x23f   : > { %v1770_v24 = vsel %vm1743_vm8, %v1737_v4, %v1469_v14  ;;  %v1754_v16 = vsel %vm1743_vm8, %v1721_v58, %v1437_v44  ;;  %v4488_v58 = vld [vmem:[#allocation36_spill] sm:$0xff]  ;;  %v4489_v14 = vld [vmem:[#allocation39_spill] sm:$0xff] }
 0x240   : > { %2545 = vmatprep.mubr.msk.f32.mxu0 %vm1788_vm9, %v1754_v16  ;;  %2569 = vmatprep.mubr.msk.f32.mxu1 %vm1788_vm9, %v1770_v24  ;;  %v1625_v4 = vsel %vm1611_vm4, %v4488_v58, %v4487_v60 }
 0x242   : > { %v1057_v32 = vpop.permute.xlu1 %1056  ;;  %v4122_v3 = vpop.permute.xlu0 %962 }
 0x243   : > { %v1657_v59 = vsel %vm1644_vm5, %v1624_v2, %v1057_v32  ;;  %v1641_v44 = vsel %vm1611_vm4, %v4489_v14, %v4122_v3 }
 0x246   : > { %v1439_v52 = vpop.permute.xlu1 %1438  ;;  %v1089_v12 = vpop.permute.xlu0 %1088 }
 0x247   : > { %v1755_v40 = vsel %vm1743_vm8, %v1722_v46, %v1439_v52  ;;  %v1673_v6 = vsel %vm1644_vm5, %v1640_v31, %v1089_v12 }
 0x248   : > { %2546 = vmatmul.mubr.msk.f32.gmra.mxu0 %vm1788_vm9, %v1755_v40 }
 0x24a   : > { %v1059_v10 = vpop.permute.xlu1 %1058  ;;  %v1471_v25 = vpop.permute.xlu0 %1470 }
 0x24b   : > { %v1771_v1 = vsel %vm1743_vm8, %v1738_v26, %v1471_v25  ;;  %v1658_v24 = vsel %vm1644_vm5, %v1625_v4, %v1059_v10 }
 0x24c   : > { %2570 = vmatmul.mubr.msk.f32.gmra.mxu1 %vm1788_vm9, %v1771_v1 }
 0x24e   : > { %v1185_v43 = vpop.permute.xlu1 %1184  ;;  %v1091_v39 = vpop.permute.xlu0 %1090 }
 0x24f   : > { %v1690_v63 = vsel %vm1677_vm6, %v1657_v59, %v1185_v43  ;;  %v1674_v16 = vsel %vm1644_vm5, %v1641_v44, %v1091_v39  ;;  %v4494_v59 = vld [vmem:[#allocation37_spill] sm:$0xff] }
 0x252   : > { %v1187_v5 = vpop.permute.xlu1 %1186  ;;  %v1217_v50 = vpop.permute.xlu0 %1216 }
 0x253   : > { %v1706_v47 = vsel %vm1677_vm6, %v1673_v6, %v1217_v50  ;;  %v1691_v32 = vsel %vm1677_vm6, %v1658_v24, %v1187_v5 }
 0x255   : > { %v2532_v13 = vpop.f32.mrf.mxu0 }
 0x256   : > { %v1961_v42 = vadd.f32 %v2532_v13, %v4145_v0  ;;  %v1313_v36 = vpop.permute.xlu1 %1312  ;;  %v1219_v21 = vpop.permute.xlu0 %1218 }
 0x257   : > { %v1955_v56 = vpop.f32.mrf.mxu0  ;;  %v1723_v9 = vsel %vm1710_vm7, %v1690_v63, %v1313_v36  ;;  %v1707_v48 = vsel %vm1677_vm6, %v1674_v16, %v1219_v21  ;;  %v4490_v21 = vld [vmem:[#allocation15_spill] sm:$0xff] }
 0x258   : > { %2115 = vst [vmem:[%s4148_s10 + $0x8] sm:$0xff] %v1961_v42  ;;  %v1956_v49 = vadd.f32 %v4145_v0, %v1955_v56  ;;  %v4491_v56 = vld [vmem:[#allocation43_spill] sm:$0xff] }
 0x259   : > { %v2556_v61 = vpop.f32.mrf.mxu1 }
 0x25a   : > { %2114 = vst [vmem:[%s4148_s10] sm:$0xff] %v1956_v49  ;;  %v2041_v30 = vadd.f32 %v2556_v61, %v4145_v0  ;;  %v4154_v34 = vpop.permute.xlu1 %964  ;;  %v1345_v7 = vpop.permute.xlu0 %1344  ;;  %v1626_v49 = vsel %vm1611_vm4, %v4491_v56, %v4490_v21  ;;  %v4492_v61 = vld [vmem:[#allocation5_spill] sm:$0xff] }
 0x25b   : > { %v2035_v37 = vpop.f32.mrf.mxu1  ;;  %v1739_v27 = vsel %vm1710_vm7, %v1706_v47, %v1345_v7 }
 0x25c   : > { %2131 = vst [vmem:[%s4148_s10 + $0x88] sm:$0xff] %v2041_v30  ;;  %v2036_v17 = vadd.f32 %v4145_v0, %v2035_v37  ;;  %v1642_v30 = vsel %vm1611_vm4, %v4492_v61, %v4154_v34 }
 0x25e   : > { %2130 = vst [vmem:[%s4148_s10 + $0x80] sm:$0xff] %v2036_v17  ;;  %v1347_v41 = vpop.permute.xlu1 %1346  ;;  %v1315_v55 = vpop.permute.xlu0 %1314 }
 0x25f   : > { %v1740_v51 = vsel %vm1710_vm7, %v1707_v48, %v1347_v41  ;;  %v1724_v8 = vsel %vm1710_vm7, %v1691_v32, %v1315_v55 }
 0x262   : > { %v1473_v20 = vpop.permute.xlu1 %1472  ;;  %v1441_v18 = vpop.permute.xlu0 %1440 }
 0x263   : > { %v1772_v35 = vsel %vm1743_vm8, %v1739_v27, %v1473_v20  ;;  %v1756_v15 = vsel %vm1743_vm8, %v1723_v9, %v1441_v18 }
 0x264   : > { %2548 = vmatprep.mubr.msk.f32.mxu0 %vm1788_vm9, %v1756_v15  ;;  %2572 = vmatprep.mubr.msk.f32.mxu1 %vm1788_vm9, %v1772_v35 }
 0x266   : > { %v967_v28 = vpop.permute.xlu1 %966  ;;  %v935_v23 = vpop.permute.xlu0 %934 }
 0x267   : > { %v1643_v31 = vsel %vm1611_vm4, %v4493_v11, %v967_v28  ;;  %v1627_v34 = vsel %vm1611_vm4, %v4494_v59, %v935_v23 }
 0x26a   : > { %v1093_v45 = vpop.permute.xlu1 %1092  ;;  %v1061_v19 = vpop.permute.xlu0 %1060 }
 0x26b   : > { %v1675_v7 = vsel %vm1644_vm5, %v1642_v30, %v1093_v45  ;;  %v1659_v37 = vsel %vm1644_vm5, %v1626_v49, %v1061_v19 }
 0x26e   : > { %v1475_v62 = vpop.permute.xlu1 %1474  ;;  %v1443_v33 = vpop.permute.xlu0 %1442 }
 0x26f   : > { %v1773_v46 = vsel %vm1743_vm8, %v1740_v51, %v1475_v62  ;;  %v1757_v3 = vsel %vm1743_vm8, %v1724_v8, %v1443_v33 }
 0x270   : > { %2549 = vmatmul.mubr.msk.f32.gmra.mxu0 %vm1788_vm9, %v1757_v3  ;;  %2573 = vmatmul.mubr.msk.f32.gmra.mxu1 %vm1788_vm9, %v1773_v46 }
 0x272   : > { %v1095_v52 = vpop.permute.xlu1 %1094  ;;  %v1063_v12 = vpop.permute.xlu0 %1062 }
 0x273   : > { %v1676_v47 = vsel %vm1644_vm5, %v1643_v31, %v1095_v52  ;;  %v1660_v9 = vsel %vm1644_vm5, %v1627_v34, %v1063_v12 }
 0x276   : > { %v1221_v38 = vpop.permute.xlu1 %1220  ;;  %v1189_v29 = vpop.permute.xlu0 %1188 }
 0x277   : > { %v1708_v17 = vsel %vm1677_vm6, %v1675_v7, %v1221_v38  ;;  %v1692_v41 = vsel %vm1677_vm6, %v1659_v37, %v1189_v29 }
 0x279   : > { %v2535_v40 = vpop.f32.mrf.mxu0 }
 0x27a   : > { %v1971_v22 = vadd.f32 %v2535_v40, %v4145_v0  ;;  %v1223_v53 = vpop.permute.xlu1 %1222  ;;  %v1191_v26 = vpop.permute.xlu0 %1190 }
 0x27b   : > { %v1965_v10 = vpop.f32.mrf.mxu0  ;;  %v1709_v27 = vsel %vm1677_vm6, %v1676_v47, %v1223_v53  ;;  %v1693_v20 = vsel %vm1677_vm6, %v1660_v9, %v1191_v26 }
 0x27c   : > { %2117 = vst [vmem:[%s4148_s10 + $0x18] sm:$0xff] %v1971_v22  ;;  %v1966_v25 = vadd.f32 %v4145_v0, %v1965_v10 }
 0x27d   : > { %v2559_v1 = vpop.f32.mrf.mxu1 }
 0x27e   : > { %2116 = vst [vmem:[%s4148_s10 + $0x10] sm:$0xff] %v1966_v25  ;;  %v2051_v43 = vadd.f32 %v2559_v1, %v4145_v0  ;;  %v1349_v39 = vpop.permute.xlu1 %1348  ;;  %v1317_v5 = vpop.permute.xlu0 %1316 }
 0x27f   : > { %v2045_v50 = vpop.f32.mrf.mxu1  ;;  %v1741_v55 = vsel %vm1710_vm7, %v1708_v17, %v1349_v39  ;;  %v1725_v57 = vsel %vm1710_vm7, %v1692_v41, %v1317_v5 }
 0x280   : > { %2133 = vst [vmem:[%s4148_s10 + $0x98] sm:$0xff] %v2051_v43  ;;  %v2046_v13 = vadd.f32 %v4145_v0, %v2045_v50 }
 0x282   : > { %2132 = vst [vmem:[%s4148_s10 + $0x90] sm:$0xff] %v2046_v13  ;;  %v1351_v42 = vpop.permute.xlu1 %1350  ;;  %v1319_v36 = vpop.permute.xlu0 %1318 }
 0x283   : > { %v1742_v18 = vsel %vm1710_vm7, %v1709_v27, %v1351_v42  ;;  %v1726_v35 = vsel %vm1710_vm7, %v1693_v20, %v1319_v36 }
 0x286   : > { %v1477_v54 = vpop.permute.xlu1 %1476  ;;  %v1445_v2 = vpop.permute.xlu0 %1444 }
 0x287   : > { %v1774_v6 = vsel %vm1743_vm8, %v1741_v55, %v1477_v54  ;;  %v1758_v63 = vsel %vm1743_vm8, %v1725_v57, %v1445_v2 }
 0x288   : > { %2551 = vmatprep.mubr.msk.f32.mxu0 %vm1788_vm9, %v1758_v63  ;;  %2575 = vmatprep.mubr.msk.f32.mxu1 %vm1788_vm9, %v1774_v6 }
 0x28a   : > { %v1479_v15 = vpop.permute.xlu1 %1478  ;;  %v1447_v28 = vpop.permute.xlu0 %1446 }
 0x28b   : > { %v1775_v23 = vsel %vm1743_vm8, %v1742_v18, %v1479_v15  ;;  %v1759_v45 = vsel %vm1743_vm8, %v1726_v35, %v1447_v28 }
 0x28c   : > { %2552 = vmatmul.mubr.msk.f32.gmra.mxu0 %vm1788_vm9, %v1759_v45  ;;  %2576 = vmatmul.mubr.msk.f32.gmra.mxu1 %vm1788_vm9, %v1775_v23 }
 0x29d   : > { %v2538_v19 = vpop.f32.mrf.mxu0 }
 0x29e   : > { %v1981_v60 = vadd.f32 %v2538_v19, %v4145_v0 }
 0x29f   : > { %v1975_v58 = vpop.f32.mrf.mxu0 }
 0x2a0   : > { %2119 = vst [vmem:[%s4148_s10 + $0x28] sm:$0xff] %v1981_v60  ;;  %v1976_v4 = vadd.f32 %v4145_v0, %v1975_v58 }
 0x2a1   : > { %v2562_v14 = vpop.f32.mrf.mxu1 }
 0x2a2   : > { %2118 = vst [vmem:[%s4148_s10 + $0x20] sm:$0xff] %v1976_v4  ;;  %v2061_v44 = vadd.f32 %v2562_v14, %v4145_v0 }
 0x2a3   : > { %v2055_v24 = vpop.f32.mrf.mxu1 }
 0x2a4   : > { %2135 = vst [vmem:[%s4148_s10 + $0xa8] sm:$0xff] %v2061_v44  ;;  %v2056_v16 = vadd.f32 %v4145_v0, %v2055_v24 }
 0x2a6   : > { %2134 = vst [vmem:[%s4148_s10 + $0xa0] sm:$0xff] %v2056_v16 }
 0x2c1   : > { %v2541_v32 = vpop.f32.mrf.mxu0 }
 0x2c2   : > { %v1991_v48 = vadd.f32 %v2541_v32, %v4145_v0 }
 0x2c3   : > { %v1985_v51 = vpop.f32.mrf.mxu0 }
 0x2c4   : > { %2121 = vst [vmem:[%s4148_s10 + $0x38] sm:$0xff] %v1991_v48  ;;  %v1986_v8 = vadd.f32 %v4145_v0, %v1985_v51 }
 0x2c5   : > { %v2565_v62 = vpop.f32.mrf.mxu1 }
 0x2c6   : > { %2120 = vst [vmem:[%s4148_s10 + $0x30] sm:$0xff] %v1986_v8  ;;  %v2071_v33 = vadd.f32 %v2565_v62, %v4145_v0 }
 0x2c7   : > { %v2065_v46 = vpop.f32.mrf.mxu1 }
 0x2c8   : > { %2137 = vst [vmem:[%s4148_s10 + $0xb8] sm:$0xff] %v2071_v33  ;;  %v2066_v3 = vadd.f32 %v4145_v0, %v2065_v46 }
 0x2ca   : > { %2136 = vst [vmem:[%s4148_s10 + $0xb0] sm:$0xff] %v2066_v3 }
 0x2e4   : > { %v2544_v52 = vpop.f32.mrf.mxu0 }
 0x2e5   : > { %v2001_v12 = vadd.f32 %v2544_v52, %v4145_v0 }
 0x2e6   : > { %v1995_v38 = vpop.f32.mrf.mxu0 }
 0x2e7   : > { %2123 = vst [vmem:[%s4148_s10 + $0x48] sm:$0xff] %v2001_v12  ;;  %v1996_v29 = vadd.f32 %v4145_v0, %v1995_v38 }
 0x2e8   : > { %v2568_v40 = vpop.f32.mrf.mxu1 }
 0x2e9   : > { %2122 = vst [vmem:[%s4148_s10 + $0x40] sm:$0xff] %v1996_v29  ;;  %v2081_v22 = vadd.f32 %v2568_v40, %v4145_v0 }
 0x2ea   : > { %v2075_v53 = vpop.f32.mrf.mxu1 }
 0x2eb   : > { %2139 = vst [vmem:[%s4148_s10 + $0xc8] sm:$0xff] %v2081_v22  ;;  %v2076_v26 = vadd.f32 %v4145_v0, %v2075_v53 }
 0x2ed   : > { %2138 = vst [vmem:[%s4148_s10 + $0xc0] sm:$0xff] %v2076_v26 }
 0x308   : > { %v2547_v10 = vpop.f32.mrf.mxu0 }
 0x309   : > { %v2011_v25 = vadd.f32 %v2547_v10, %v4145_v0 }
 0x30a   : > { %v2005_v1 = vpop.f32.mrf.mxu0 }
 0x30b   : > { %2125 = vst [vmem:[%s4148_s10 + $0x58] sm:$0xff] %v2011_v25  ;;  %v2006_v43 = vadd.f32 %v4145_v0, %v2005_v1 }
 0x30c   : > { %v2571_v39 = vpop.f32.mrf.mxu1 }
 0x30d   : > { %2124 = vst [vmem:[%s4148_s10 + $0x50] sm:$0xff] %v2006_v43  ;;  %v2091_v5 = vadd.f32 %v2571_v39, %v4145_v0 }
 0x30e   : > { %v2085_v50 = vpop.f32.mrf.mxu1 }
 0x30f   : > { %2141 = vst [vmem:[%s4148_s10 + $0xd8] sm:$0xff] %v2091_v5  ;;  %v2086_v13 = vadd.f32 %v4145_v0, %v2085_v50 }
 0x311   : > { %2140 = vst [vmem:[%s4148_s10 + $0xd0] sm:$0xff] %v2086_v13 }
 0x330   : > { %v2550_v42 = vpop.f32.mrf.mxu0  ;;  %v2574_v36 = vpop.f32.mrf.mxu1 }
 0x331   : > { %v2021_v21 = vadd.f32 %v2550_v42, %v4145_v0  ;;  %v2101_v56 = vadd.f32 %v2574_v36, %v4145_v0 }
 0x332   : > { %v2015_v49 = vpop.f32.mrf.mxu0  ;;  %v2095_v61 = vpop.f32.mrf.mxu1 }
 0x333   : > { %2127 = vst [vmem:[%s4148_s10 + $0x68] sm:$0xff] %v2021_v21  ;;  %2143 = vst [vmem:[%s4148_s10 + $0xe8] sm:$0xff] %v2101_v56  ;;  %v2016_v30 = vadd.f32 %v4145_v0, %v2015_v49  ;;  %v2096_v7 = vadd.f32 %v4145_v0, %v2095_v61 }
 0x335   : > { %2126 = vst [vmem:[%s4148_s10 + $0x60] sm:$0xff] %v2016_v30  ;;  %2142 = vst [vmem:[%s4148_s10 + $0xe0] sm:$0xff] %v2096_v7 }
 0x34c   : > { %v2553_v37 = vpop.f32.mrf.mxu0  ;;  %v2577_v17 = vpop.f32.mrf.mxu1 }
 0x34d   : > { %v2031_v41 = vadd.f32 %v2553_v37, %v4145_v0  ;;  %v2111_v55 = vadd.f32 %v2577_v17, %v4145_v0 }
 0x34e   : > { %v2025_v57 = vpop.f32.mrf.mxu0  ;;  %v2105_v54 = vpop.f32.mrf.mxu1 }
 0x34f   : > { %2129 = vst [vmem:[%s4148_s10 + $0x78] sm:$0xff] %v2031_v41  ;;  %2145 = vst [vmem:[%s4148_s10 + $0xf8] sm:$0xff] %v2111_v55  ;;  %v2026_v2 = vadd.f32 %v4145_v0, %v2025_v57  ;;  %v2106_v11 = vadd.f32 %v4145_v0, %v2105_v54 }
 0x351   : > { %2128 = vst [vmem:[%s4148_s10 + $0x70] sm:$0xff] %v2026_v2  ;;  %2144 = vst [vmem:[%s4148_s10 + $0xf0] sm:$0xff] %v2106_v11 }
 0x352   : > { %2666 = shalt.err (!%p2663_p5)
}
 0x353   : > { %s2667_s4 = scalar_lea.hbm %s4276_s23, 4096  ;;  %s2671_s7 = scalar_lea.hbm %s4337_s3, 8192 }
 0x354   : > { %p2668_p6 = scmp.ne.s32.totalorder %s4276_s23, %s2667_s4  ;;  %p2672_p10 = scmp.lt.s32.totalorder %s4276_s23, %s4337_s3 }
 0x355   : > { %p2673_p11 = scmp.lt.s32.totalorder %s2671_s7, %s2667_s4 }
 0x356   : > { %p2669_p7 = pnand %p2668_p6, %p2801_p4 }
 0x357   : > { %p2674_p12 = por %p2673_p11, %p2672_p10 }
 0x358   : > { %p2670_p9 = pneg %p2669_p7 }
 0x35a   : > { %p2675_p13 = pnand %p2674_p12, %p2670_p9 }
 0x35c   : > { %2678 = shalt.err (!%p2675_p13)
}
 0x35d   : > { %s2740_s10 = smov 128  }
 0x35e   : > { %2589 = dma.vmem_to_hbm [thread:$0]  (%p2801_p4), %s4282_s18, 4096, %s4276_s23, %s4288_s15, %s2740_s10, %s2740_s10, %s2732_s5  }
 0x35f PF: > { %p2595_p0 = scmp.ge.s32.totalorder %s2729_s17, 2  ;;  %s2177_s11 = sand.u32 1, %s2709_s12  }
 0x360   : > { %s2178_s19 = scalar_lea.sflag [#allocation3], %s2177_s11 }
 0x361   : > { %p2592_p1 = pnand %p2595_p0, %p2808_p8 }
 0x363   : > { %p2593_p2 = pneg %p2592_p1 }
 0x365   : > { %2704 = dma.done.wait (%p2593_p2), %s2178_s19, 4096  }
 0x366   : > { %2706 = vsyncadd (%p2593_p2), %s2178_s19, 4294963200  ;;  %s16_s17 = sadd.s32 1, %s2729_s17   ;;  %s4495_s12 = smov %s2713_s13 }
 0x367   : > { %p13_p3 = scmp.ge.s32.totalorder %s16_s17, 4   ;;  %s4496_s13 = smov %s2717_s14 }
 0x368   : > { %s4497_s14 = smov %s2814_s25  ;;  %s4498_s15 = smov %s2725_s16 }
 0x369   : > { %s4499_s16 = smov %s4501_s20  ;;  %15 = sbr.rel (!%p13_p3) target bundleno = 4 (0x4), region = 69 }
 0x36e   :  { %2183 = vsyncpa [#allocation3], 1 }
 0x36f   :  { %2185 = vsyncpa [#allocation3 + $0x1], 1 }

</bundles_post_ra>
